<compile_context>
chip_gen: v5e
topology: v5e:2x2
jax: 0.10.0
libtpu: 0.0.40
codegen_flags: <defaults>
</compile_context>

<pallas_src>
import jax
import jax.numpy as jnp
from jax.experimental import pallas as pl
from jax.experimental.pallas import tpu as pltpu

NO_FILTER1 = 20
NO_FILTER2 = 50
NO_NEURONS = 500
NUM_CLASSES = 10

FC1_PAD = 512        # fc1 hidden 500 -> 512 (zero-padded weights/bias, exact)
CLASS_PAD = 128      # fc2 classes 10 -> 128 lanes (padded classes get -1e30 bias, exact)
_NEG_BIG = -1.0e30

_CONV_TILE_ROWS = 256   # pooled-output rows per grid step (matmul M = 4 * 256 = 1024)
_FC_TILE_ROWS = 128     # batch rows per grid step for the fused MLP head


def _round_up(x, m):
    return (x + m - 1) // m * m


def _pick_tile(rows, max_tile):
    return min(max_tile, _round_up(rows, 8))


# ----------------------------- Pallas kernels ------------------------------ #

def _conv_relu_pool_kernel(p_ref, w_ref, b_ref, o_ref):
    """Fused im2col-conv + bias + relu + 2x2 maxpool.

    p_ref : (4, TR, K)  bf16 -- im2col patches, corner-major: block q holds the
                                patches of pool-window corner q for TR pooled pixels.
    w_ref : (K, C)      bf16
    b_ref : (1, C)      f32
    o_ref : (TR, C)     bf16 -- pooled output, rows ordered (b, hp, wp)
    """
    w = w_ref[...]
    b = b_ref[...]
    acc = None
    for q in range(4):                        # static unroll: 4 corners of the 2x2 window
        y = jnp.dot(p_ref[q], w, preferred_element_type=jnp.float32)   # MXU, f32 acc
        y = jnp.maximum(y + b, 0.0)           # bias + relu in f32 (VPU)
        acc = y if acc is None else jnp.maximum(acc, y)                # fused maxpool
    o_ref[...] = acc.astype(o_ref.dtype)


def _mlp_head_kernel(x_ref, w1_ref, b1_ref, w2_ref, b2_ref, o_ref):
    """Fused fc1 + relu + fc2 + log_softmax. The (TB, 512) intermediate stays in VMEM."""
    h = jnp.dot(x_ref[...], w1_ref[...], preferred_element_type=jnp.float32)
    h = jnp.maximum(h + b1_ref[...], 0.0)
    z = jnp.dot(h.astype(jnp.bfloat16), w2_ref[...],
                preferred_element_type=jnp.float32) + b2_ref[...]
    m = jnp.max(z, axis=-1, keepdims=True)
    lse = m + jnp.log(jnp.sum(jnp.exp(z - m), axis=-1, keepdims=True))
    o_ref[...] = z - lse


# ------------------------------- wrappers ----------------------------------- #

def _pooled_patches(x, k):
    """im2col with rows grouped by 2x2 pool-window corner.

    x: (N, H, W, C) NHWC. Returns (patches, (Hp, Wp)) with
    patches: (4, N*Hp*Wp, k*k*C); patches[q, r] is the (kh, kw, cin)-flattened
    5x5 patch of pool corner q for pooled output pixel r = (n, hp, wp).
    """
    N, H, W, C = x.shape
    Ho, Wo = H - k + 1, W - k + 1
    Hp, Wp = Ho // 2, Wo // 2
    cols = [x[:, i:i + Ho, j:j + Wo, :] for i in range(k) for j in range(k)]
    p = jnp.stack(cols, axis=3).reshape(N, Ho, Wo, k * k * C)
    corners = [p[:, py::2, px::2, :] for py in (0, 1) for px in (0, 1)]
    p4 = jnp.stack(corners, axis=0).reshape(4, N * Hp * Wp, k * k * C)
    return p4, (Hp, Wp)


def _conv_relu_pool(x_nhwc, w, b, cout):
    """One fused conv -> relu -> maxpool2x2 layer. Returns pooled NHWC bf16."""
    N = x_nhwc.shape[0]
    p4, (hp, wp) = _pooled_patches(x_nhwc.astype(jnp.bfloat16), 5)
    _, R, K = p4.shape
    tile_r = _pick_tile(R, _CONV_TILE_ROWS)
    Rp = _round_up(R, tile_r)
    if Rp != R:                               # pad rows so the grid divides evenly
        p4 = jnp.pad(p4, ((0, 0), (0, Rp - R), (0, 0)))
    grid = (Rp // tile_r,)
    cost = pl.CostEstimate(
        flops=2 * 4 * Rp * K * cout,
        transcendentals=0,
        bytes_accessed=p4.size * 2 + w.size * 2 + b.size * 4 + Rp * cout * 2)
    out = pl.pallas_call(
        _conv_relu_pool_kernel,
        out_shape=jax.ShapeDtypeStruct((Rp, cout), jnp.bfloat16),
        grid=grid,
        in_specs=[
            pl.BlockSpec((4, tile_r, K), lambda i: (0, i, 0)),   # patches: tiled over rows
            pl.BlockSpec((K, cout), lambda i: (0, 0)),           # weights: VMEM-resident
            pl.BlockSpec((1, cout), lambda i: (0, 0)),           # bias
        ],
        out_specs=pl.BlockSpec((tile_r, cout), lambda i: (i, 0)),
        compiler_params=pltpu.CompilerParams(dimension_semantics=("parallel",)),
        cost_estimate=cost,
    )(p4, w, b)
    return out[:R].reshape(N, hp, wp, cout)


def _mlp_head(flat, w1, b1, w2, b2):
    """Fused fc1+relu+fc2+log_softmax. flat: (N, 800) bf16 in (h, w, c) feature order."""
    N, K = flat.shape
    H, C = w1.shape[1], w2.shape[1]
    tile_b = _pick_tile(N, _FC_TILE_ROWS)
    Np = _round_up(N, tile_b)
    if Np != N:
        flat = jnp.pad(flat, ((0, Np - N), (0, 0)))
    grid = (Np // tile_b,)
    cost = pl.CostEstimate(
        flops=2 * Np * K * H + 2 * Np * H * C,
        transcendentals=Np * C,
        bytes_accessed=(flat.size + w1.size + w2.size) * 2
                       + (b1.size + b2.size) * 4 + Np * C * 4)
    out = pl.pallas_call(
        _mlp_head_kernel,
        out_shape=jax.ShapeDtypeStruct((Np, C), jnp.float32),
        grid=grid,
        in_specs=[
            pl.BlockSpec((tile_b, K), lambda i: (i, 0)),
            pl.BlockSpec((K, H), lambda i: (0, 0)),
            pl.BlockSpec((1, H), lambda i: (0, 0)),
            pl.BlockSpec((H, C), lambda i: (0, 0)),
            pl.BlockSpec((1, C), lambda i: (0, 0)),
        ],
        out_specs=pl.BlockSpec((tile_b, C), lambda i: (i, 0)),
        compiler_params=pltpu.CompilerParams(dimension_semantics=("parallel",)),
        cost_estimate=cost,
    )(flat, w1, b1, w2, b2)
    return out[:N, :NUM_CLASSES]


# ------------------------------ parameters ---------------------------------- #

def init_params(key):
    """Random parameters in the native PyTorch layouts (used by the reference)."""
    ks = jax.random.split(key, 8)
    return {
        "conv1_w": jax.random.normal(ks[0], (NO_FILTER1, 1, 5, 5), jnp.float32) * 0.1,
        "conv1_b": jax.random.normal(ks[1], (NO_FILTER1,), jnp.float32) * 0.1,
        "conv2_w": jax.random.normal(ks[2], (NO_FILTER2, NO_FILTER1, 5, 5), jnp.float32) * 0.05,
        "conv2_b": jax.random.normal(ks[3], (NO_FILTER2,), jnp.float32) * 0.1,
        "fc1_w": jax.random.normal(ks[4], (NO_NEURONS, 4 * 4 * NO_FILTER2), jnp.float32) * 0.03,
        "fc1_b": jax.random.normal(ks[5], (NO_NEURONS,), jnp.float32) * 0.1,
        "fc2_w": jax.random.normal(ks[6], (NUM_CLASSES, NO_NEURONS), jnp.float32) * 0.05,
        "fc2_b": jax.random.normal(ks[7], (NUM_CLASSES,), jnp.float32) * 0.1,
    }


def prepare_kernel_params(tp):
    """Convert PyTorch-layout params to the kernel layouts (one-time, off the hot path)."""
    p = {}
    # conv weights: (Cout, Cin, kh, kw) -> (kh*kw*Cin, Cout), bf16 for the MXU.
    p["conv1_w"] = jnp.transpose(tp["conv1_w"], (2, 3, 1, 0)).reshape(25 * 1, NO_FILTER1).astype(jnp.bfloat16)
    p["conv1_b"] = tp["conv1_b"].reshape(1, NO_FILTER1).astype(jnp.float32)
    p["conv2_w"] = jnp.transpose(tp["conv2_w"], (2, 3, 1, 0)).reshape(25 * NO_FILTER1, NO_FILTER2).astype(jnp.bfloat16)
    p["conv2_b"] = tp["conv2_b"].reshape(1, NO_FILTER2).astype(jnp.float32)
    # fc1: PyTorch flatten order is (c, h, w); our NHWC flatten is (h, w, c).
    # Permute the weight rows once at init so no runtime transpose is needed.
    w1 = tp["fc1_w"].T                                    # (800, 500), rows (c, h, w)
    w1 = w1.reshape(NO_FILTER2, 4, 4, NO_NEURONS)
    w1 = jnp.transpose(w1, (1, 2, 0, 3)).reshape(4 * 4 * NO_FILTER2, NO_NEURONS)  # rows (h, w, c)
    w1 = jnp.pad(w1, ((0, 0), (0, FC1_PAD - NO_NEURONS)))
    p["fc1_w"] = w1.astype(jnp.bfloat16)                  # (800, 512)
    p["fc1_b"] = jnp.pad(tp["fc1_b"], (0, FC1_PAD - NO_NEURONS)).reshape(1, FC1_PAD).astype(jnp.float32)
    # fc2: pad hidden to 512 (zero rows) and classes to 128 lanes (zero cols, -1e30 bias).
    w2 = jnp.pad(tp["fc2_w"].T, ((0, FC1_PAD - NO_NEURONS), (0, CLASS_PAD - NUM_CLASSES)))
    p["fc2_w"] = w2.astype(jnp.bfloat16)                  # (512, 128)
    b2 = jnp.pad(tp["fc2_b"], (0, CLASS_PAD - NUM_CLASSES), constant_values=_NEG_BIG)
    p["fc2_b"] = b2.reshape(1, CLASS_PAD).astype(jnp.float32)
    return p


# ------------------------------- forward ------------------------------------ #

@jax.jit
def cnn_forward(x_nchw, params):
    # x_nchw: (N, 1, 28, 28) float32 (PyTorch NCHW interface)
    N = x_nchw.shape[0]
    x = jnp.transpose(x_nchw, (0, 2, 3, 1)).astype(jnp.bfloat16)                 # NHWC
    h1 = _conv_relu_pool(x, params["conv1_w"], params["conv1_b"], NO_FILTER1)    # (N,12,12,20)
    h2 = _conv_relu_pool(h1, params["conv2_w"], params["conv2_b"], NO_FILTER2)   # (N,4,4,50)
    flat = h2.reshape(N, 4 * 4 * NO_FILTER2)     # (h, w, c) order; fc1_w pre-permuted to match
    return _mlp_head(flat, params["fc1_w"], params["fc1_b"],
                     params["fc2_w"], params["fc2_b"])                           # (N, 10) f32


# --------------------------- pure-JAX reference ------------------------------ #

def reference_forward(x_nchw, tp):
    """f32 reference in the original PyTorch layouts (independent of the kernel path)."""
    dn = ("NCHW", "OIHW", "NCHW")
    y = jax.lax.conv_general_dilated(x_nchw.astype(jnp.float32), tp["conv1_w"],
                                     (1, 1), "VALID", dimension_numbers=dn)
    y = jax.nn.relu(y + tp["conv1_b"][None, :, None, None])
    y = jax.lax.reduce_window(y, -jnp.inf, jax.lax.max, (1, 1, 2, 2), (1, 1, 2, 2), "VALID")
    y = jax.lax.conv_general_dilated(y, tp["conv2_w"], (1, 1), "VALID", dimension_numbers=dn)
    y = jax.nn.relu(y + tp["conv2_b"][None, :, None, None])
    y = jax.lax.reduce_window(y, -jnp.inf, jax.lax.max, (1, 1, 2, 2), (1, 1, 2, 2), "VALID")
    y = y.reshape(y.shape[0], -1)                           # NCHW flatten, like .view()
    y = jax.nn.relu(y @ tp["fc1_w"].T + tp["fc1_b"])
    y = y @ tp["fc2_w"].T + tp["fc2_b"]
    return jax.nn.log_softmax(y, axis=-1)


if __name__ == "__main__":
    key = jax.random.PRNGKey(0)
    k_in, k_par = jax.random.split(key)
    # 28x28 input is dictated by fc1's 4*4*50 = 800 input features
    x = jax.random.normal(k_in, (2, 1, 28, 28), jnp.float32)
    torch_params = init_params(k_par)
    params = prepare_kernel_params(torch_params)

    logp = cnn_forward(x, params)
    jax.block_until_ready(logp)

    assert logp.shape == (2, NUM_CLASSES) and logp.dtype == jnp.float32
    assert bool(jnp.all(jnp.isfinite(logp)))
    # log_softmax rows must (numerically) sum to 1 in prob space
    assert jnp.allclose(jnp.sum(jnp.exp(logp), axis=1), 1.0, atol=1e-3)
    # cross-check against an independent f32 reference (tolerance covers bf16 matmuls)
    ref = reference_forward(x, torch_params)
    max_err = float(jnp.max(jnp.abs(logp - ref)))
    assert max_err < 0.1, f"kernel/reference mismatch: max abs err = {max_err}"

    print("KERNEL_OK")
</pallas_src>

<mosaic_0001>
module attributes {stable_mosaic.version = 11 : i64} {
  func.func @_conv_relu_pool_kernel(%arg0: i32, %arg1: memref<4x256x25xbf16, #tpu.memory_space<vmem>>, %arg2: memref<25x20xbf16, #tpu.memory_space<vmem>>, %arg3: memref<1x20xf32, #tpu.memory_space<vmem>>, %arg4: memref<256x20xbf16, #tpu.memory_space<vmem>>) attributes {dimension_semantics = [#tpu.dimension_semantics<parallel>], iteration_bounds = array<i64: 2>, scalar_prefetch = 0 : i64, scratch_operands = 0 : i64, tpu.core_type = #tpu.core_type<tc>, window_params = [{transform_indices = @transform_0, window_bounds = array<i64: 4, 256, 25>}, {pipeline_mode = #tpu.pipeline_mode<synchronous>, transform_indices = @transform_1, window_bounds = array<i64: 25, 20>}, {pipeline_mode = #tpu.pipeline_mode<synchronous>, transform_indices = @transform_2, window_bounds = array<i64: 1, 20>}, {transform_indices = @transform_3, window_bounds = array<i64: 256, 20>}]} {
    %c0 = arith.constant 0 : index
    %c0_0 = arith.constant 0 : index
    %0 = vector.load %arg2[%c0, %c0_0] : memref<25x20xbf16, #tpu.memory_space<vmem>>, vector<25x20xbf16>
    %c0_1 = arith.constant 0 : index
    %c0_2 = arith.constant 0 : index
    %1 = vector.load %arg3[%c0_1, %c0_2] : memref<1x20xf32, #tpu.memory_space<vmem>>, vector<1x20xf32>
    %c0_3 = arith.constant 0 : index
    %c0_4 = arith.constant 0 : index
    %c0_5 = arith.constant 0 : index
    %2 = vector.load %arg1[%c0_3, %c0_4, %c0_5] : memref<4x256x25xbf16, #tpu.memory_space<vmem>>, vector<1x256x25xbf16>
    %3 = vector.shape_cast %2 : vector<1x256x25xbf16> to vector<256x25xbf16>
    %cst = arith.constant dense<0.000000e+00> : vector<256x20xf32>
    %4 = tpu.matmul %3, %0, %cst {dimension_numbers = #tpu.dot_dimension_numbers<[1], [0], [0], [1], [0, 0, 1, 1], [], []>} : vector<256x25xbf16>, vector<25x20xbf16>, vector<256x20xf32> -> vector<256x20xf32>
    %5 = vector.broadcast %1 : vector<1x20xf32> to vector<256x20xf32>
    %6 = arith.addf %4, %5 : vector<256x20xf32>
    %cst_6 = arith.constant 0.000000e+00 : f32
    %7 = vector.broadcast %cst_6 : f32 to vector<256x20xf32>
    %8 = arith.maximumf %6, %7 : vector<256x20xf32>
    %c1 = arith.constant 1 : index
    %c0_7 = arith.constant 0 : index
    %c0_8 = arith.constant 0 : index
    %9 = vector.load %arg1[%c1, %c0_7, %c0_8] : memref<4x256x25xbf16, #tpu.memory_space<vmem>>, vector<1x256x25xbf16>
    %10 = vector.shape_cast %9 : vector<1x256x25xbf16> to vector<256x25xbf16>
    %cst_9 = arith.constant dense<0.000000e+00> : vector<256x20xf32>
    %11 = tpu.matmul %10, %0, %cst_9 {dimension_numbers = #tpu.dot_dimension_numbers<[1], [0], [0], [1], [0, 0, 1, 1], [], []>} : vector<256x25xbf16>, vector<25x20xbf16>, vector<256x20xf32> -> vector<256x20xf32>
    %12 = vector.broadcast %1 : vector<1x20xf32> to vector<256x20xf32>
    %13 = arith.addf %11, %12 : vector<256x20xf32>
    %cst_10 = arith.constant 0.000000e+00 : f32
    %14 = vector.broadcast %cst_10 : f32 to vector<256x20xf32>
    %15 = arith.maximumf %13, %14 : vector<256x20xf32>
    %16 = arith.maximumf %8, %15 : vector<256x20xf32>
    %c2 = arith.constant 2 : index
    %c0_11 = arith.constant 0 : index
    %c0_12 = arith.constant 0 : index
    %17 = vector.load %arg1[%c2, %c0_11, %c0_12] : memref<4x256x25xbf16, #tpu.memory_space<vmem>>, vector<1x256x25xbf16>
    %18 = vector.shape_cast %17 : vector<1x256x25xbf16> to vector<256x25xbf16>
    %cst_13 = arith.constant dense<0.000000e+00> : vector<256x20xf32>
    %19 = tpu.matmul %18, %0, %cst_13 {dimension_numbers = #tpu.dot_dimension_numbers<[1], [0], [0], [1], [0, 0, 1, 1], [], []>} : vector<256x25xbf16>, vector<25x20xbf16>, vector<256x20xf32> -> vector<256x20xf32>
    %20 = vector.broadcast %1 : vector<1x20xf32> to vector<256x20xf32>
    %21 = arith.addf %19, %20 : vector<256x20xf32>
    %cst_14 = arith.constant 0.000000e+00 : f32
    %22 = vector.broadcast %cst_14 : f32 to vector<256x20xf32>
    %23 = arith.maximumf %21, %22 : vector<256x20xf32>
    %24 = arith.maximumf %16, %23 : vector<256x20xf32>
    %c3 = arith.constant 3 : index
    %c0_15 = arith.constant 0 : index
    %c0_16 = arith.constant 0 : index
    %25 = vector.load %arg1[%c3, %c0_15, %c0_16] : memref<4x256x25xbf16, #tpu.memory_space<vmem>>, vector<1x256x25xbf16>
    %26 = vector.shape_cast %25 : vector<1x256x25xbf16> to vector<256x25xbf16>
    %cst_17 = arith.constant dense<0.000000e+00> : vector<256x20xf32>
    %27 = tpu.matmul %26, %0, %cst_17 {dimension_numbers = #tpu.dot_dimension_numbers<[1], [0], [0], [1], [0, 0, 1, 1], [], []>} : vector<256x25xbf16>, vector<25x20xbf16>, vector<256x20xf32> -> vector<256x20xf32>
    %28 = vector.broadcast %1 : vector<1x20xf32> to vector<256x20xf32>
    %29 = arith.addf %27, %28 : vector<256x20xf32>
    %cst_18 = arith.constant 0.000000e+00 : f32
    %30 = vector.broadcast %cst_18 : f32 to vector<256x20xf32>
    %31 = arith.maximumf %29, %30 : vector<256x20xf32>
    %32 = arith.maximumf %24, %31 : vector<256x20xf32>
    %33 = arith.truncf %32 : vector<256x20xf32> to vector<256x20xbf16>
    %c0_19 = arith.constant 0 : index
    %c0_20 = arith.constant 0 : index
    %34 = vector.load %arg4[%c0_19, %c0_20] : memref<256x20xbf16, #tpu.memory_space<vmem>>, vector<256x20xbf16>
    tpu.vector_store %arg4[%c0_19, %c0_20], %33 {strides = array<i32>} : memref<256x20xbf16, #tpu.memory_space<vmem>>, vector<256x20xbf16>,
    return
  }
  func.func @transform_0(%arg0: i32) -> (i32, i32, i32) {
    %c0_i32 = arith.constant 0 : i32
    %c0_i32_0 = arith.constant 0 : i32
    %c0_i32_1 = arith.constant 0 : i32
    return %c0_i32, %arg0, %c0_i32_0 : i32, i32, i32
  }
  func.func @transform_1(%arg0: i32) -> (i32, i32) {
    %c0_i32 = arith.constant 0 : i32
    %c0_i32_0 = arith.constant 0 : i32
    %c0_i32_1 = arith.constant 0 : i32
    return %c0_i32, %c0_i32_0 : i32, i32
  }
  func.func @transform_2(%arg0: i32) -> (i32, i32) {
    %c0_i32 = arith.constant 0 : i32
    %c0_i32_0 = arith.constant 0 : i32
    %c0_i32_1 = arith.constant 0 : i32
    return %c0_i32, %c0_i32_0 : i32, i32
  }
  func.func @transform_3(%arg0: i32) -> (i32, i32) {
    %c0_i32 = arith.constant 0 : i32
    %c0_i32_0 = arith.constant 0 : i32
    return %arg0, %c0_i32 : i32, i32
  }
}

module attributes {stable_mosaic.version = 11 : i64} {
  func.func @_conv_relu_pool_kernel(%arg0: i32, %arg1: memref<4x32x500xbf16, #tpu.memory_space<vmem>>, %arg2: memref<500x50xbf16, #tpu.memory_space<vmem>>, %arg3: memref<1x50xf32, #tpu.memory_space<vmem>>, %arg4: memref<32x50xbf16, #tpu.memory_space<vmem>>) attributes {dimension_semantics = [#tpu.dimension_semantics<parallel>], iteration_bounds = array<i64: 1>, scalar_prefetch = 0 : i64, scratch_operands = 0 : i64, tpu.core_type = #tpu.core_type<tc>, window_params = [{transform_indices = @transform_0, window_bounds = array<i64: 4, 32, 500>}, {pipeline_mode = #tpu.pipeline_mode<synchronous>, transform_indices = @transform_1, window_bounds = array<i64: 500, 50>}, {pipeline_mode = #tpu.pipeline_mode<synchronous>, transform_indices = @transform_2, window_bounds = array<i64: 1, 50>}, {transform_indices = @transform_3, window_bounds = array<i64: 32, 50>}]} {
    %c0 = arith.constant 0 : index
    %c0_0 = arith.constant 0 : index
    %0 = vector.load %arg2[%c0, %c0_0] : memref<500x50xbf16, #tpu.memory_space<vmem>>, vector<500x50xbf16>
    %c0_1 = arith.constant 0 : index
    %c0_2 = arith.constant 0 : index
    %1 = vector.load %arg3[%c0_1, %c0_2] : memref<1x50xf32, #tpu.memory_space<vmem>>, vector<1x50xf32>
    %c0_3 = arith.constant 0 : index
    %c0_4 = arith.constant 0 : index
    %c0_5 = arith.constant 0 : index
    %2 = vector.load %arg1[%c0_3, %c0_4, %c0_5] : memref<4x32x500xbf16, #tpu.memory_space<vmem>>, vector<1x32x500xbf16>
    %3 = vector.shape_cast %2 : vector<1x32x500xbf16> to vector<32x500xbf16>
    %cst = arith.constant dense<0.000000e+00> : vector<32x50xf32>
    %4 = tpu.matmul %3, %0, %cst {dimension_numbers = #tpu.dot_dimension_numbers<[1], [0], [0], [1], [0, 0, 1, 1], [], []>} : vector<32x500xbf16>, vector<500x50xbf16>, vector<32x50xf32> -> vector<32x50xf32>
    %5 = vector.broadcast %1 : vector<1x50xf32> to vector<32x50xf32>
    %6 = arith.addf %4, %5 : vector<32x50xf32>
    %cst_6 = arith.constant 0.000000e+00 : f32
    %7 = vector.broadcast %cst_6 : f32 to vector<32x50xf32>
    %8 = arith.maximumf %6, %7 : vector<32x50xf32>
    %c1 = arith.constant 1 : index
    %c0_7 = arith.constant 0 : index
    %c0_8 = arith.constant 0 : index
    %9 = vector.load %arg1[%c1, %c0_7, %c0_8] : memref<4x32x500xbf16, #tpu.memory_space<vmem>>, vector<1x32x500xbf16>
    %10 = vector.shape_cast %9 : vector<1x32x500xbf16> to vector<32x500xbf16>
    %cst_9 = arith.constant dense<0.000000e+00> : vector<32x50xf32>
    %11 = tpu.matmul %10, %0, %cst_9 {dimension_numbers = #tpu.dot_dimension_numbers<[1], [0], [0], [1], [0, 0, 1, 1], [], []>} : vector<32x500xbf16>, vector<500x50xbf16>, vector<32x50xf32> -> vector<32x50xf32>
    %12 = vector.broadcast %1 : vector<1x50xf32> to vector<32x50xf32>
    %13 = arith.addf %11, %12 : vector<32x50xf32>
    %cst_10 = arith.constant 0.000000e+00 : f32
    %14 = vector.broadcast %cst_10 : f32 to vector<32x50xf32>
    %15 = arith.maximumf %13, %14 : vector<32x50xf32>
    %16 = arith.maximumf %8, %15 : vector<32x50xf32>
    %c2 = arith.constant 2 : index
    %c0_11 = arith.constant 0 : index
    %c0_12 = arith.constant 0 : index
    %17 = vector.load %arg1[%c2, %c0_11, %c0_12] : memref<4x32x500xbf16, #tpu.memory_space<vmem>>, vector<1x32x500xbf16>
    %18 = vector.shape_cast %17 : vector<1x32x500xbf16> to vector<32x500xbf16>
    %cst_13 = arith.constant dense<0.000000e+00> : vector<32x50xf32>
    %19 = tpu.matmul %18, %0, %cst_13 {dimension_numbers = #tpu.dot_dimension_numbers<[1], [0], [0], [1], [0, 0, 1, 1], [], []>} : vector<32x500xbf16>, vector<500x50xbf16>, vector<32x50xf32> -> vector<32x50xf32>
    %20 = vector.broadcast %1 : vector<1x50xf32> to vector<32x50xf32>
    %21 = arith.addf %19, %20 : vector<32x50xf32>
    %cst_14 = arith.constant 0.000000e+00 : f32
    %22 = vector.broadcast %cst_14 : f32 to vector<32x50xf32>
    %23 = arith.maximumf %21, %22 : vector<32x50xf32>
    %24 = arith.maximumf %16, %23 : vector<32x50xf32>
    %c3 = arith.constant 3 : index
    %c0_15 = arith.constant 0 : index
    %c0_16 = arith.constant 0 : index
    %25 = vector.load %arg1[%c3, %c0_15, %c0_16] : memref<4x32x500xbf16, #tpu.memory_space<vmem>>, vector<1x32x500xbf16>
    %26 = vector.shape_cast %25 : vector<1x32x500xbf16> to vector<32x500xbf16>
    %cst_17 = arith.constant dense<0.000000e+00> : vector<32x50xf32>
    %27 = tpu.matmul %26, %0, %cst_17 {dimension_numbers = #tpu.dot_dimension_numbers<[1], [0], [0], [1], [0, 0, 1, 1], [], []>} : vector<32x500xbf16>, vector<500x50xbf16>, vector<32x50xf32> -> vector<32x50xf32>
    %28 = vector.broadcast %1 : vector<1x50xf32> to vector<32x50xf32>
    %29 = arith.addf %27, %28 : vector<32x50xf32>
    %cst_18 = arith.constant 0.000000e+00 : f32
    %30 = vector.broadcast %cst_18 : f32 to vector<32x50xf32>
    %31 = arith.maximumf %29, %30 : vector<32x50xf32>
    %32 = arith.maximumf %24, %31 : vector<32x50xf32>
    %33 = arith.truncf %32 : vector<32x50xf32> to vector<32x50xbf16>
    %c0_19 = arith.constant 0 : index
    %c0_20 = arith.constant 0 : index
    %34 = vector.load %arg4[%c0_19, %c0_20] : memref<32x50xbf16, #tpu.memory_space<vmem>>, vector<32x50xbf16>
    tpu.vector_store %arg4[%c0_19, %c0_20], %33 {strides = array<i32>} : memref<32x50xbf16, #tpu.memory_space<vmem>>, vector<32x50xbf16>,
    return
  }
  func.func @transform_0(%arg0: i32) -> (i32, i32, i32) {
    %c0_i32 = arith.constant 0 : i32
    %c0_i32_0 = arith.constant 0 : i32
    %c0_i32_1 = arith.constant 0 : i32
    return %c0_i32, %arg0, %c0_i32_0 : i32, i32, i32
  }
  func.func @transform_1(%arg0: i32) -> (i32, i32) {
    %c0_i32 = arith.constant 0 : i32
    %c0_i32_0 = arith.constant 0 : i32
    %c0_i32_1 = arith.constant 0 : i32
    return %c0_i32, %c0_i32_0 : i32, i32
  }
  func.func @transform_2(%arg0: i32) -> (i32, i32) {
    %c0_i32 = arith.constant 0 : i32
    %c0_i32_0 = arith.constant 0 : i32
    %c0_i32_1 = arith.constant 0 : i32
    return %c0_i32, %c0_i32_0 : i32, i32
  }
  func.func @transform_3(%arg0: i32) -> (i32, i32) {
    %c0_i32 = arith.constant 0 : i32
    %c0_i32_0 = arith.constant 0 : i32
    return %arg0, %c0_i32 : i32, i32
  }
}

module attributes {stable_mosaic.version = 11 : i64} {
  func.func @_mlp_head_kernel(%arg0: i32, %arg1: memref<8x800xbf16, #tpu.memory_space<vmem>>, %arg2: memref<800x512xbf16, #tpu.memory_space<vmem>>, %arg3: memref<1x512xf32, #tpu.memory_space<vmem>>, %arg4: memref<512x128xbf16, #tpu.memory_space<vmem>>, %arg5: memref<1x128xf32, #tpu.memory_space<vmem>>, %arg6: memref<8x128xf32, #tpu.memory_space<vmem>>) attributes {dimension_semantics = [#tpu.dimension_semantics<parallel>], iteration_bounds = array<i64: 1>, scalar_prefetch = 0 : i64, scratch_operands = 0 : i64, tpu.core_type = #tpu.core_type<tc>, window_params = [{transform_indices = @transform_0, window_bounds = array<i64: 8, 800>}, {pipeline_mode = #tpu.pipeline_mode<synchronous>, transform_indices = @transform_1, window_bounds = array<i64: 800, 512>}, {pipeline_mode = #tpu.pipeline_mode<synchronous>, transform_indices = @transform_2, window_bounds = array<i64: 1, 512>}, {pipeline_mode = #tpu.pipeline_mode<synchronous>, transform_indices = @transform_3, window_bounds = array<i64: 512, 128>}, {pipeline_mode = #tpu.pipeline_mode<synchronous>, transform_indices = @transform_4, window_bounds = array<i64: 1, 128>}, {transform_indices = @transform_5, window_bounds = array<i64: 8, 128>}]} {
    %c0 = arith.constant 0 : index
    %c0_0 = arith.constant 0 : index
    %0 = vector.load %arg1[%c0, %c0_0] : memref<8x800xbf16, #tpu.memory_space<vmem>>, vector<8x800xbf16>
    %c0_1 = arith.constant 0 : index
    %c0_2 = arith.constant 0 : index
    %1 = vector.load %arg2[%c0_1, %c0_2] : memref<800x512xbf16, #tpu.memory_space<vmem>>, vector<800x512xbf16>
    %cst = arith.constant dense<0.000000e+00> : vector<8x512xf32>
    %2 = tpu.matmul %0, %1, %cst {dimension_numbers = #tpu.dot_dimension_numbers<[1], [0], [0], [1], [0, 0, 1, 1], [], []>} : vector<8x800xbf16>, vector<800x512xbf16>, vector<8x512xf32> -> vector<8x512xf32>
    %c0_3 = arith.constant 0 : index
    %c0_4 = arith.constant 0 : index
    %3 = vector.load %arg3[%c0_3, %c0_4] : memref<1x512xf32, #tpu.memory_space<vmem>>, vector<1x512xf32>
    %4 = vector.broadcast %3 : vector<1x512xf32> to vector<8x512xf32>
    %5 = arith.addf %2, %4 : vector<8x512xf32>
    %cst_5 = arith.constant 0.000000e+00 : f32
    %6 = vector.broadcast %cst_5 : f32 to vector<8x512xf32>
    %7 = arith.maximumf %5, %6 : vector<8x512xf32>
    %8 = arith.truncf %7 : vector<8x512xf32> to vector<8x512xbf16>
    %c0_6 = arith.constant 0 : index
    %c0_7 = arith.constant 0 : index
    %9 = vector.load %arg4[%c0_6, %c0_7] : memref<512x128xbf16, #tpu.memory_space<vmem>>, vector<512x128xbf16>
    %cst_8 = arith.constant dense<0.000000e+00> : vector<8x128xf32>
    %10 = tpu.matmul %8, %9, %cst_8 {dimension_numbers = #tpu.dot_dimension_numbers<[1], [0], [0], [1], [0, 0, 1, 1], [], []>} : vector<8x512xbf16>, vector<512x128xbf16>, vector<8x128xf32> -> vector<8x128xf32>
    %c0_9 = arith.constant 0 : index
    %c0_10 = arith.constant 0 : index
    %11 = vector.load %arg5[%c0_9, %c0_10] : memref<1x128xf32, #tpu.memory_space<vmem>>, vector<1x128xf32>
    %12 = vector.broadcast %11 : vector<1x128xf32> to vector<8x128xf32>
    %13 = arith.addf %10, %12 : vector<8x128xf32>
    %cst_11 = arith.constant dense<0xFF800000> : vector<8xf32>
    %14 = vector.multi_reduction <maximumf>, %13, %cst_11 [1] : vector<8x128xf32> to vector<8xf32>
    %15 = vector.shape_cast %14 : vector<8xf32> to vector<8x1xf32>
    %16 = vector.broadcast %15 : vector<8x1xf32> to vector<8x128xf32>
    %17 = arith.subf %13, %16 : vector<8x128xf32>
    %18 = math.exp %17 : vector<8x128xf32>
    %cst_12 = arith.constant dense<0.000000e+00> : vector<8xf32>
    %19 = vector.multi_reduction <add>, %18, %cst_12 [1] : vector<8x128xf32> to vector<8xf32>
    %20 = vector.shape_cast %19 : vector<8xf32> to vector<8x1xf32>
    %21 = math.log %20 : vector<8x1xf32>
    %22 = arith.addf %15, %21 : vector<8x1xf32>
    %23 = vector.broadcast %22 : vector<8x1xf32> to vector<8x128xf32>
    %24 = arith.subf %13, %23 : vector<8x128xf32>
    %c0_13 = arith.constant 0 : index
    %c0_14 = arith.constant 0 : index
    %25 = vector.load %arg6[%c0_13, %c0_14] : memref<8x128xf32, #tpu.memory_space<vmem>>, vector<8x128xf32>
    tpu.vector_store %arg6[%c0_13, %c0_14], %24 {strides = array<i32>} : memref<8x128xf32, #tpu.memory_space<vmem>>, vector<8x128xf32>,
    return
  }
  func.func @transform_0(%arg0: i32) -> (i32, i32) {
    %c0_i32 = arith.constant 0 : i32
    %c0_i32_0 = arith.constant 0 : i32
    return %arg0, %c0_i32 : i32, i32
  }
  func.func @transform_1(%arg0: i32) -> (i32, i32) {
    %c0_i32 = arith.constant 0 : i32
    %c0_i32_0 = arith.constant 0 : i32
    %c0_i32_1 = arith.constant 0 : i32
    return %c0_i32, %c0_i32_0 : i32, i32
  }
  func.func @transform_2(%arg0: i32) -> (i32, i32) {
    %c0_i32 = arith.constant 0 : i32
    %c0_i32_0 = arith.constant 0 : i32
    %c0_i32_1 = arith.constant 0 : i32
    return %c0_i32, %c0_i32_0 : i32, i32
  }
  func.func @transform_3(%arg0: i32) -> (i32, i32) {
    %c0_i32 = arith.constant 0 : i32
    %c0_i32_0 = arith.constant 0 : i32
    %c0_i32_1 = arith.constant 0 : i32
    return %c0_i32, %c0_i32_0 : i32, i32
  }
  func.func @transform_4(%arg0: i32) -> (i32, i32) {
    %c0_i32 = arith.constant 0 : i32
    %c0_i32_0 = arith.constant 0 : i32
    %c0_i32_1 = arith.constant 0 : i32
    return %c0_i32, %c0_i32_0 : i32, i32
  }
  func.func @transform_5(%arg0: i32) -> (i32, i32) {
    %c0_i32 = arith.constant 0 : i32
    %c0_i32_0 = arith.constant 0 : i32
    return %arg0, %c0_i32 : i32, i32
  }
}

</mosaic_0001>

<bundles_post_ra>
// kernel: cnn_forward.3
= control target key start
LH: loop header
LB: loop body
LE: loop exit
PB: predicated region body
PF: predicated region fallthrough
CT: control target
= control target key end

     0   :  { %s2679_s12 = smov 0   ;;  %s2681_s13 = smov 0   ;;  %s3206_s0 = inlined_call_operand.vmem [shape: bf16[4,512,25], index: 0, kind: input, shape index: {}]   ;;  %s3207_s1 = inlined_call_operand.vmem [shape: bf16[25,20], index: 1, kind: input, shape index: {}]   ;;  %s3208_s2 = inlined_call_operand.vmem [shape: f32[1,20], index: 2, kind: input, shape index: {}]   ;;  %s3209_s3 = inlined_call_operand.vmem [shape: bf16[512,20], index: 3, kind: output, shape index: {}]  }
   0x1   :  { %s2683_s14 = smov 0  }
   0x2 LB: > { %s2103_s15 = sadd.s32 4294967295, %s2656_s14   ;;  %s2696_s16 = sadd.s32 1, %s2656_s14   ;;  %s2656_s14 = sphi %s2683_s14, %s3212_s14   ;;  %s2652_s13 = sphi %s2681_s13, %s3211_s13   ;;  %s2648_s12 = sphi %s2679_s12, %s3210_s12  }
   0x3   : > { %s17_s17 = ssub.s32 %s2656_s14, %s2696_s16  ;;  %s20_s18 = sadd.s32 1, %s2652_s13 }
   0x4   : > { %p18_p0 = scmp.eq.s32.totalorder %s17_s17, 0  ;;  %p27_p1 = scmp.ne.s32.totalorder %s2652_s13, %s2648_s12 }
   0x5   : > { %p28_p2 = scmp.eq.s32.totalorder %s2656_s14, 0  ;;  %p2106_p4 = scmp.ge.s32.totalorder %s2656_s14, 2 }
   0x6   : > { %s2705_s19 = scalar_select %p18_p0, %s2652_s13, %s20_s18  }
   0x7   : > { %p29_p3 = por %p28_p2, %p27_p1  ;;  %127 = sbr.rel (%p2106_p4) target bundleno = 80 (0x50), region = 24 }
   0xc   : > { %130 = sbr.rel (!%p29_p3) target bundleno = 80 (0x50), region = 28  ;;  %s132_s20 = sand.u32 (%p29_p3), 1, %s2652_s13  }
   0xd   : > { %s2540_s21 = sshll.u32 (%p29_p3), %s2656_s14, 7  ;;  %s2107_s22 = sshll.u32 (%p29_p3), %s132_s20, 9 }
   0xe   : > { %s2713_s25 = scalar_lea.vmem (%p29_p3), %s3206_s0, %s2540_s21  ;;  %s2718_s26 = scalar_lea.vmem (%p29_p3), [#allocation2], %s2107_s22 }
   0xf   : > { %v154_v0 = vld [vmem:[%s2713_s25] sm:$0xff] (%p29_p3)   ;;  %v158_v1 = vld [vmem:[%s2713_s25 + $0x8] sm:$0xff] (%p29_p3)   ;;  %v162_v2 = vld [vmem:[%s2713_s25 + $0x10] sm:$0xff] (%p29_p3)  }
  0x10   : > { %155 = vst [vmem:[%s2718_s26] sm:$0xff] (%p29_p3), %v154_v0   ;;  %v166_v3 = vld [vmem:[%s2713_s25 + $0x18] sm:$0xff] (%p29_p3)   ;;  %v170_v4 = vld [vmem:[%s2713_s25 + $0x20] sm:$0xff] (%p29_p3)   ;;  %v174_v5 = vld [vmem:[%s2713_s25 + $0x28] sm:$0xff] (%p29_p3)  }
  0x11   : > { %159 = vst [vmem:[%s2718_s26 + $0x8] sm:$0xff] %v158_v1   ;;  %v178_v6 = vld [vmem:[%s2713_s25 + $0x30] sm:$0xff]   ;;  %v182_v7 = vld [vmem:[%s2713_s25 + $0x38] sm:$0xff]   ;;  %v186_v8 = vld [vmem:[%s2713_s25 + $0x40] sm:$0xff]  }
  0x12   : > { %163 = vst [vmem:[%s2718_s26 + $0x10] sm:$0xff] %v162_v2   ;;  %v190_v9 = vld [vmem:[%s2713_s25 + $0x48] sm:$0xff]   ;;  %v194_v10 = vld [vmem:[%s2713_s25 + $0x50] sm:$0xff]   ;;  %v198_v11 = vld [vmem:[%s2713_s25 + $0x58] sm:$0xff]  }
  0x13   : > { %167 = vst [vmem:[%s2718_s26 + $0x18] sm:$0xff] %v166_v3   ;;  %v202_v12 = vld [vmem:[%s2713_s25 + $0x60] sm:$0xff]   ;;  %v206_v13 = vld [vmem:[%s2713_s25 + $0x68] sm:$0xff]   ;;  %v210_v14 = vld [vmem:[%s2713_s25 + $0x70] sm:$0xff]  }
  0x14   : > { %171 = vst [vmem:[%s2718_s26 + $0x20] sm:$0xff] %v170_v4   ;;  %v214_v15 = vld [vmem:[%s2713_s25 + $0x78] sm:$0xff]   ;;  %v218_v16 = vld [vmem:[%s2713_s25 + $0x100] sm:$0xff]   ;;  %v222_v17 = vld [vmem:[%s2713_s25 + $0x108] sm:$0xff]  }
  0x15   : > { %175 = vst [vmem:[%s2718_s26 + $0x28] sm:$0xff] %v174_v5   ;;  %v226_v18 = vld [vmem:[%s2713_s25 + $0x110] sm:$0xff]   ;;  %v230_v19 = vld [vmem:[%s2713_s25 + $0x118] sm:$0xff]   ;;  %v234_v20 = vld [vmem:[%s2713_s25 + $0x120] sm:$0xff]  }
  0x16   : > { %179 = vst [vmem:[%s2718_s26 + $0x30] sm:$0xff] %v178_v6   ;;  %v238_v21 = vld [vmem:[%s2713_s25 + $0x128] sm:$0xff]   ;;  %v242_v22 = vld [vmem:[%s2713_s25 + $0x130] sm:$0xff]   ;;  %v246_v23 = vld [vmem:[%s2713_s25 + $0x138] sm:$0xff]  }
  0x17   : > { %183 = vst [vmem:[%s2718_s26 + $0x38] sm:$0xff] %v182_v7   ;;  %v250_v24 = vld [vmem:[%s2713_s25 + $0x140] sm:$0xff]   ;;  %v254_v25 = vld [vmem:[%s2713_s25 + $0x148] sm:$0xff]   ;;  %v258_v26 = vld [vmem:[%s2713_s25 + $0x150] sm:$0xff]  }
  0x18   : > { %187 = vst [vmem:[%s2718_s26 + $0x40] sm:$0xff] %v186_v8   ;;  %v262_v27 = vld [vmem:[%s2713_s25 + $0x158] sm:$0xff]   ;;  %v266_v28 = vld [vmem:[%s2713_s25 + $0x160] sm:$0xff]   ;;  %v270_v29 = vld [vmem:[%s2713_s25 + $0x168] sm:$0xff]  }
  0x19   : > { %191 = vst [vmem:[%s2718_s26 + $0x48] sm:$0xff] %v190_v9   ;;  %v274_v30 = vld [vmem:[%s2713_s25 + $0x170] sm:$0xff]   ;;  %v278_v31 = vld [vmem:[%s2713_s25 + $0x178] sm:$0xff]   ;;  %v282_v32 = vld [vmem:[%s2713_s25 + $0x200] sm:$0xff]  }
  0x1a   : > { %195 = vst [vmem:[%s2718_s26 + $0x50] sm:$0xff] %v194_v10   ;;  %v286_v33 = vld [vmem:[%s2713_s25 + $0x208] sm:$0xff]   ;;  %v290_v34 = vld [vmem:[%s2713_s25 + $0x210] sm:$0xff]   ;;  %v294_v35 = vld [vmem:[%s2713_s25 + $0x218] sm:$0xff]  }
  0x1b   : > { %199 = vst [vmem:[%s2718_s26 + $0x58] sm:$0xff] %v198_v11   ;;  %v298_v36 = vld [vmem:[%s2713_s25 + $0x220] sm:$0xff]   ;;  %v302_v37 = vld [vmem:[%s2713_s25 + $0x228] sm:$0xff]   ;;  %v306_v38 = vld [vmem:[%s2713_s25 + $0x230] sm:$0xff]  }
  0x1c   : > { %203 = vst [vmem:[%s2718_s26 + $0x60] sm:$0xff] %v202_v12   ;;  %v310_v39 = vld [vmem:[%s2713_s25 + $0x238] sm:$0xff]   ;;  %v314_v40 = vld [vmem:[%s2713_s25 + $0x240] sm:$0xff]   ;;  %v318_v41 = vld [vmem:[%s2713_s25 + $0x248] sm:$0xff]  }
  0x1d   : > { %207 = vst [vmem:[%s2718_s26 + $0x68] sm:$0xff] %v206_v13   ;;  %v322_v42 = vld [vmem:[%s2713_s25 + $0x250] sm:$0xff]   ;;  %v326_v43 = vld [vmem:[%s2713_s25 + $0x258] sm:$0xff]   ;;  %v330_v44 = vld [vmem:[%s2713_s25 + $0x260] sm:$0xff]  }
  0x1e   : > { %211 = vst [vmem:[%s2718_s26 + $0x70] sm:$0xff] %v210_v14   ;;  %v334_v45 = vld [vmem:[%s2713_s25 + $0x268] sm:$0xff]   ;;  %v338_v46 = vld [vmem:[%s2713_s25 + $0x270] sm:$0xff]   ;;  %v342_v47 = vld [vmem:[%s2713_s25 + $0x278] sm:$0xff]  }
  0x1f   : > { %215 = vst [vmem:[%s2718_s26 + $0x78] sm:$0xff] %v214_v15   ;;  %v346_v48 = vld [vmem:[%s2713_s25 + $0x300] sm:$0xff]   ;;  %v350_v49 = vld [vmem:[%s2713_s25 + $0x308] sm:$0xff]   ;;  %v354_v50 = vld [vmem:[%s2713_s25 + $0x310] sm:$0xff]  }
  0x20   : > { %219 = vst [vmem:[%s2718_s26 + $0x80] sm:$0xff] %v218_v16   ;;  %v358_v51 = vld [vmem:[%s2713_s25 + $0x318] sm:$0xff]   ;;  %v362_v52 = vld [vmem:[%s2713_s25 + $0x320] sm:$0xff]   ;;  %v366_v53 = vld [vmem:[%s2713_s25 + $0x328] sm:$0xff]  }
  0x21   : > { %223 = vst [vmem:[%s2718_s26 + $0x88] sm:$0xff] %v222_v17   ;;  %v370_v54 = vld [vmem:[%s2713_s25 + $0x330] sm:$0xff]   ;;  %v374_v55 = vld [vmem:[%s2713_s25 + $0x338] sm:$0xff]   ;;  %v378_v56 = vld [vmem:[%s2713_s25 + $0x340] sm:$0xff]  }
  0x22   : > { %227 = vst [vmem:[%s2718_s26 + $0x90] sm:$0xff] %v226_v18   ;;  %v382_v57 = vld [vmem:[%s2713_s25 + $0x348] sm:$0xff]   ;;  %v386_v58 = vld [vmem:[%s2713_s25 + $0x350] sm:$0xff]   ;;  %v390_v59 = vld [vmem:[%s2713_s25 + $0x358] sm:$0xff]  }
  0x23   : > { %231 = vst [vmem:[%s2718_s26 + $0x98] sm:$0xff] %v230_v19   ;;  %v394_v60 = vld [vmem:[%s2713_s25 + $0x360] sm:$0xff]   ;;  %v398_v61 = vld [vmem:[%s2713_s25 + $0x368] sm:$0xff]   ;;  %v402_v62 = vld [vmem:[%s2713_s25 + $0x370] sm:$0xff]  }
  0x24   : > { %235 = vst [vmem:[%s2718_s26 + $0xa0] sm:$0xff] %v234_v20   ;;  %v406_v63 = vld [vmem:[%s2713_s25 + $0x378] sm:$0xff]  }
  0x25   : > { %239 = vst [vmem:[%s2718_s26 + $0xa8] sm:$0xff] %v238_v21  }
  0x26   : > { %243 = vst [vmem:[%s2718_s26 + $0xb0] sm:$0xff] %v242_v22  }
  0x27   : > { %247 = vst [vmem:[%s2718_s26 + $0xb8] sm:$0xff] %v246_v23  }
  0x28   : > { %251 = vst [vmem:[%s2718_s26 + $0xc0] sm:$0xff] %v250_v24  }
  0x29   : > { %255 = vst [vmem:[%s2718_s26 + $0xc8] sm:$0xff] %v254_v25  }
  0x2a   : > { %259 = vst [vmem:[%s2718_s26 + $0xd0] sm:$0xff] %v258_v26  }
  0x2b   : > { %263 = vst [vmem:[%s2718_s26 + $0xd8] sm:$0xff] %v262_v27  }
  0x2c   : > { %267 = vst [vmem:[%s2718_s26 + $0xe0] sm:$0xff] %v266_v28  }
  0x2d   : > { %271 = vst [vmem:[%s2718_s26 + $0xe8] sm:$0xff] %v270_v29  }
  0x2e   : > { %275 = vst [vmem:[%s2718_s26 + $0xf0] sm:$0xff] %v274_v30  }
  0x2f   : > { %279 = vst [vmem:[%s2718_s26 + $0xf8] sm:$0xff] %v278_v31  }
  0x30   : > { %283 = vst [vmem:[%s2718_s26 + $0x100] sm:$0xff] %v282_v32  }
  0x31   : > { %287 = vst [vmem:[%s2718_s26 + $0x108] sm:$0xff] %v286_v33  }
  0x32   : > { %291 = vst [vmem:[%s2718_s26 + $0x110] sm:$0xff] %v290_v34  }
  0x33   : > { %295 = vst [vmem:[%s2718_s26 + $0x118] sm:$0xff] %v294_v35  }
  0x34   : > { %299 = vst [vmem:[%s2718_s26 + $0x120] sm:$0xff] %v298_v36  }
  0x35   : > { %303 = vst [vmem:[%s2718_s26 + $0x128] sm:$0xff] %v302_v37  }
  0x36   : > { %307 = vst [vmem:[%s2718_s26 + $0x130] sm:$0xff] %v306_v38  }
  0x37   : > { %311 = vst [vmem:[%s2718_s26 + $0x138] sm:$0xff] %v310_v39  }
  0x38   : > { %315 = vst [vmem:[%s2718_s26 + $0x140] sm:$0xff] %v314_v40  }
  0x39   : > { %319 = vst [vmem:[%s2718_s26 + $0x148] sm:$0xff] %v318_v41  }
  0x3a   : > { %323 = vst [vmem:[%s2718_s26 + $0x150] sm:$0xff] %v322_v42  }
  0x3b   : > { %327 = vst [vmem:[%s2718_s26 + $0x158] sm:$0xff] %v326_v43  }
  0x3c   : > { %331 = vst [vmem:[%s2718_s26 + $0x160] sm:$0xff] %v330_v44  }
  0x3d   : > { %335 = vst [vmem:[%s2718_s26 + $0x168] sm:$0xff] %v334_v45  }
  0x3e   : > { %339 = vst [vmem:[%s2718_s26 + $0x170] sm:$0xff] %v338_v46  }
  0x3f   : > { %343 = vst [vmem:[%s2718_s26 + $0x178] sm:$0xff] %v342_v47  }
  0x40   : > { %347 = vst [vmem:[%s2718_s26 + $0x180] sm:$0xff] %v346_v48  }
  0x41   : > { %351 = vst [vmem:[%s2718_s26 + $0x188] sm:$0xff] %v350_v49  }
  0x42   : > { %355 = vst [vmem:[%s2718_s26 + $0x190] sm:$0xff] %v354_v50  }
  0x43   : > { %359 = vst [vmem:[%s2718_s26 + $0x198] sm:$0xff] %v358_v51  }
  0x44   : > { %363 = vst [vmem:[%s2718_s26 + $0x1a0] sm:$0xff] %v362_v52  }
  0x45   : > { %367 = vst [vmem:[%s2718_s26 + $0x1a8] sm:$0xff] %v366_v53  }
  0x46   : > { %371 = vst [vmem:[%s2718_s26 + $0x1b0] sm:$0xff] %v370_v54  }
  0x47   : > { %375 = vst [vmem:[%s2718_s26 + $0x1b8] sm:$0xff] %v374_v55  }
  0x48   : > { %379 = vst [vmem:[%s2718_s26 + $0x1c0] sm:$0xff] %v378_v56  }
  0x49   : > { %383 = vst [vmem:[%s2718_s26 + $0x1c8] sm:$0xff] %v382_v57  }
  0x4a   : > { %387 = vst [vmem:[%s2718_s26 + $0x1d0] sm:$0xff] %v386_v58  }
  0x4b   : > { %391 = vst [vmem:[%s2718_s26 + $0x1d8] sm:$0xff] %v390_v59  }
  0x4c   : > { %395 = vst [vmem:[%s2718_s26 + $0x1e0] sm:$0xff] %v394_v60  }
  0x4d   : > { %399 = vst [vmem:[%s2718_s26 + $0x1e8] sm:$0xff] %v398_v61  }
  0x4e   : > { %403 = vst [vmem:[%s2718_s26 + $0x1f0] sm:$0xff] %v402_v62  }
  0x4f   : > { %407 = vst [vmem:[%s2718_s26 + $0x1f8] sm:$0xff] %v406_v63  }
  0x50 PF: > { %p2110_p5 = scmp.ge.s32.totalorder %s2656_s14, 1  ;;  %p688_p6 = scmp.lt.s32.totalorder %s2656_s14, 3 }
  0x52   : > { %p689_p7 = pnand %p2110_p5, %p688_p6 }
  0x53   : > { %s695_s4 = sand.u32 (!%p689_p7), 1, %s2648_s12   ;;  %s2112_s11 = sshll.u32 (!%p689_p7), %s2103_s15, 5 }
  0x54   : > { %692 = sbr.rel (%p689_p7) target bundleno = 494 (0x1ee), region = 69  ;;  %s2111_s5 = sshll.u32 (!%p689_p7), %s695_s4, 9 }
  0x55   : > { %s2857_s8 = scalar_lea.vmem (!%p689_p7), [#allocation2], %s2111_s5  ;;  %p720_p8 = scmp.lt.s32.totalorder (!%p689_p7), %s2112_s11, 63 }
  0x59   : > { %v2184_v0 = vld [vmem:[%s3207_s1 + $0x8] sm:$0xf]  ;;  %v2542_v1 = vld [vmem:[%s3207_s1 + $0x8] sm:$0x10]  ;;  %vm906_vm0 = vcmask 1043456   ;;  %vm907_vm1 = vcmask 1044480  }
  0x5a   : > { %v2185_v2 = vor.u32 %v2542_v1, %v2184_v0  ;;  %v2658_v3 = vmov 65535   ;;  %v2541_v7 = vld [vmem:[%s3207_s1] sm:$0xff]  ;;  %vm857_vm2 = vcmask 203776   ;;  %v2544_v12 = vld [vmem:[%s2857_s8 + $0x8] sm:$0xff]  ;;  %v2545_v16 = vld [vmem:[%s2857_s8 + $0x10] sm:$0xff]  ;;  %s3214_s11 = smov (!%p720_p8, %s2112_s11), 63 }
  0x5b   : > { %v908_v4 = vsel %vm906_vm0, 4294967295, %v2658_v3  ;;  %v2543_v8 = vld [vmem:[%s2857_s8] sm:$0xff]  ;;  %v2560_v13 = vld [vmem:[%s2857_s8 + $0x88] sm:$0xff]  ;;  %v2561_v17 = vld [vmem:[%s2857_s8 + $0x90] sm:$0xff]  ;;  %s2113_s12 = sshll.u32 %s3214_s11, 2  ;;  %vm2008_vm3 = vcmask 158720  }
  0x5c   : > { %v909_v5 = vsel %vm907_vm1, %v908_v4, 0  ;;  %v2559_v9 = vld [vmem:[%s2857_s8 + $0x80] sm:$0xff]  ;;  %v2576_v14 = vld [vmem:[%s2857_s8 + $0x108] sm:$0xff]  ;;  %v2577_v18 = vld [vmem:[%s2857_s8 + $0x110] sm:$0xff]  ;;  %s2947_s17 = scalar_lea.vmem %s3209_s3, %s2113_s12 }
  0x5d   : > { %v911_v6 = vand.u32 %v2185_v2, %v909_v5  ;;  %v2575_v10 = vld [vmem:[%s2857_s8 + $0x100] sm:$0xff]  ;;  %v2592_v15 = vld [vmem:[%s2857_s8 + $0x188] sm:$0xff]  ;;  %v2593_v19 = vld [vmem:[%s2857_s8 + $0x190] sm:$0xff] }
  0x5e   : > { %v2591_v11 = vld [vmem:[%s2857_s8 + $0x180] sm:$0xff]  ;;  %v2546_v20 = vld [vmem:[%s2857_s8 + $0x18] sm:$0xff]  ;;  %v2548_v28 = vld [vmem:[%s2857_s8 + $0x28] sm:$0xff] }
  0x5f   : > { %919 = vmatpush.bf16.msra.mxu0 %v911_v6  ;;  %1201 = vmatpush.bf16.msra.mxu1 %v911_v6  ;;  %v2562_v21 = vld [vmem:[%s2857_s8 + $0x98] sm:$0xff]  ;;  %v2547_v24 = vld [vmem:[%s2857_s8 + $0x20] sm:$0xff]  ;;  %v2564_v29 = vld [vmem:[%s2857_s8 + $0xa8] sm:$0xff] }
  0x60   : > { %1515 = vmatpush.bf16.msra.mxu2 %v911_v6  ;;  %1829 = vmatpush.bf16.msra.mxu3 %v911_v6  ;;  %v2578_v22 = vld [vmem:[%s2857_s8 + $0x118] sm:$0xff]  ;;  %v2563_v25 = vld [vmem:[%s2857_s8 + $0xa0] sm:$0xff]  ;;  %v2580_v30 = vld [vmem:[%s2857_s8 + $0x128] sm:$0xff] }
  0x61   : > { %v2594_v23 = vld [vmem:[%s2857_s8 + $0x198] sm:$0xff]  ;;  %v2579_v26 = vld [vmem:[%s2857_s8 + $0x120] sm:$0xff]  ;;  %v2596_v31 = vld [vmem:[%s2857_s8 + $0x1a8] sm:$0xff] }
  0x62   : > { %v2595_v27 = vld [vmem:[%s2857_s8 + $0x1a0] sm:$0xff]  ;;  %v2549_v32 = vld [vmem:[%s2857_s8 + $0x30] sm:$0xff]  ;;  %v2550_v36 = vld [vmem:[%s2857_s8 + $0x38] sm:$0xff] }
  0x63   : > { %920 = vmatpush.bf16.msra.mxu0 %v2541_v7  ;;  %1202 = vmatpush.bf16.msra.mxu1 %v2541_v7  ;;  %v2565_v33 = vld [vmem:[%s2857_s8 + $0xb0] sm:$0xff]  ;;  %v2566_v37 = vld [vmem:[%s2857_s8 + $0xb8] sm:$0xff]  ;;  %v2926_v40 = vld [vmem:[%s3208_s2] ss:$0 sm:$0xff] }
  0x64   : > { %1516 = vmatpush.bf16.msra.mxu2 %v2541_v7  ;;  %1830 = vmatpush.bf16.msra.mxu3 %v2541_v7  ;;  %v2581_v34 = vld [vmem:[%s2857_s8 + $0x130] sm:$0xff]  ;;  %v2582_v38 = vld [vmem:[%s2857_s8 + $0x138] sm:$0xff]  ;;  %v2551_v41 = vld [vmem:[%s2857_s8 + $0x40] sm:$0xff] }
  0x65   : > { %v2597_v35 = vld [vmem:[%s2857_s8 + $0x1b0] sm:$0xff]  ;;  %v2598_v39 = vld [vmem:[%s2857_s8 + $0x1b8] sm:$0xff]  ;;  %v2567_v42 = vld [vmem:[%s2857_s8 + $0xc0] sm:$0xff] }
  0x66   : > { %2186 = vmatmul.msk.bf16.vlgmr.msra.gmra.mxu0 %vm857_vm2, %v2543_v8  ;;  %2298 = vmatmul.msk.bf16.vlgmr.msra.gmra.mxu1 %vm857_vm2, %v2559_v9  ;;  %v2583_v45 = vld [vmem:[%s2857_s8 + $0x140] sm:$0xff]  ;;  %v2552_v4 = vld [vmem:[%s2857_s8 + $0x48] sm:$0xff] }
  0x67   : > { %2410 = vmatmul.msk.bf16.vlgmr.msra.gmra.mxu2 %vm857_vm2, %v2575_v10  ;;  %2522 = vmatmul.msk.bf16.vlgmr.msra.gmra.mxu3 %vm857_vm2, %v2591_v11  ;;  %v2599_v46 = vld [vmem:[%s2857_s8 + $0x1c0] sm:$0xff]  ;;  %v2568_v5 = vld [vmem:[%s2857_s8 + $0xc8] sm:$0xff] }
  0x68   : > { %v2584_v11 = vld [vmem:[%s2857_s8 + $0x148] sm:$0xff] }
  0x76   : > { %2187 = vmatmul.msk.bf16.gmra.mxu0 %vm857_vm2, %v2544_v12  ;;  %2299 = vmatmul.msk.bf16.gmra.mxu1 %vm857_vm2, %v2560_v13  ;;  %v2600_v12 = vld [vmem:[%s2857_s8 + $0x1c8] sm:$0xff] }
  0x77   : > { %2411 = vmatmul.msk.bf16.gmra.mxu2 %vm857_vm2, %v2576_v14  ;;  %2523 = vmatmul.msk.bf16.gmra.mxu3 %vm857_vm2, %v2592_v15 }
  0x86   : > { %2188 = vmatmul.msk.bf16.gmra.mxu0 %vm857_vm2, %v2545_v16  ;;  %2300 = vmatmul.msk.bf16.gmra.mxu1 %vm857_vm2, %v2561_v17 }
  0x87   : > { %2412 = vmatmul.msk.bf16.gmra.mxu2 %vm857_vm2, %v2577_v18  ;;  %2524 = vmatmul.msk.bf16.gmra.mxu3 %vm857_vm2, %v2593_v19 }
  0x96   : > { %2189 = vmatmul.msk.bf16.gmra.mxu0 %vm857_vm2, %v2546_v20  ;;  %2301 = vmatmul.msk.bf16.gmra.mxu1 %vm857_vm2, %v2562_v21 }
  0x97   : > { %2413 = vmatmul.msk.bf16.gmra.mxu2 %vm857_vm2, %v2578_v22  ;;  %2525 = vmatmul.msk.bf16.gmra.mxu3 %vm857_vm2, %v2594_v23 }
  0xa6   : > { %2190 = vmatmul.msk.bf16.gmra.mxu0 %vm857_vm2, %v2547_v24  ;;  %2302 = vmatmul.msk.bf16.gmra.mxu1 %vm857_vm2, %v2563_v25 }
  0xa7   : > { %2414 = vmatmul.msk.bf16.gmra.mxu2 %vm857_vm2, %v2579_v26  ;;  %2526 = vmatmul.msk.bf16.gmra.mxu3 %vm857_vm2, %v2595_v27 }
  0xb6   : > { %2191 = vmatmul.msk.bf16.gmra.mxu0 %vm857_vm2, %v2548_v28  ;;  %2303 = vmatmul.msk.bf16.gmra.mxu1 %vm857_vm2, %v2564_v29 }
  0xb7   : > { %2415 = vmatmul.msk.bf16.gmra.mxu2 %vm857_vm2, %v2580_v30  ;;  %2527 = vmatmul.msk.bf16.gmra.mxu3 %vm857_vm2, %v2596_v31 }
  0xc6   : > { %2192 = vmatmul.msk.bf16.gmra.mxu0 %vm857_vm2, %v2549_v32  ;;  %2304 = vmatmul.msk.bf16.gmra.mxu1 %vm857_vm2, %v2565_v33 }
  0xc7   : > { %2416 = vmatmul.msk.bf16.gmra.mxu2 %vm857_vm2, %v2581_v34  ;;  %2528 = vmatmul.msk.bf16.gmra.mxu3 %vm857_vm2, %v2597_v35 }
  0xd6   : > { %2193 = vmatmul.msk.bf16.gmra.mxu0 %vm857_vm2, %v2550_v36  ;;  %2305 = vmatmul.msk.bf16.gmra.mxu1 %vm857_vm2, %v2566_v37 }
  0xd7   : > { %2417 = vmatmul.msk.bf16.gmra.mxu2 %vm857_vm2, %v2582_v38  ;;  %2529 = vmatmul.msk.bf16.gmra.mxu3 %vm857_vm2, %v2598_v39 }
  0xe3   : > { %v922_v43 = vpop.f32.mrf.mxu0  ;;  %v1204_v44 = vpop.f32.mrf.mxu1 }
  0xe4   : > { %v923_v47 = vadd.f32 %v2926_v40, %v922_v43  ;;  %v1205_v48 = vadd.f32 %v2926_v40, %v1204_v44 }
  0xe6   : > { %2194 = vmatmul.msk.bf16.gmra.mxu0 %vm857_vm2, %v2551_v41  ;;  %2306 = vmatmul.msk.bf16.gmra.mxu1 %vm857_vm2, %v2567_v42  ;;  %v1002_v49 = vmax.f32 %v923_v47, 0.0  ;;  %v1284_v50 = vmax.f32 %v1205_v48, 0.0  ;;  %v2553_v41 = vld [vmem:[%s2857_s8 + $0x50] sm:$0xff] }
  0xe7   : > { %2418 = vmatmul.msk.bf16.gmra.mxu2 %vm857_vm2, %v2583_v45  ;;  %2530 = vmatmul.msk.bf16.gmra.mxu3 %vm857_vm2, %v2599_v46  ;;  %v2569_v42 = vld [vmem:[%s2857_s8 + $0xd0] sm:$0xff] }
  0xe8   : > { %v1316_v53 = vmax.f32 %v1002_v49, %v1284_v50  ;;  %v2585_v48 = vld [vmem:[%s2857_s8 + $0x150] sm:$0xff] }
  0xe9   : > { %v2601_v49 = vld [vmem:[%s2857_s8 + $0x1d0] sm:$0xff] }
  0xea   : > { %v1518_v51 = vpop.f32.mrf.mxu2  ;;  %v1832_v52 = vpop.f32.mrf.mxu3 }
  0xeb   : > { %v1519_v54 = vadd.f32 %v2926_v40, %v1518_v51  ;;  %v1833_v55 = vadd.f32 %v2926_v40, %v1832_v52  ;;  %v924_v56 = vpop.f32.mrf.mxu0  ;;  %v1206_v57 = vpop.f32.mrf.mxu1 }
  0xec   : > { %v925_v60 = vadd.f32 %v2926_v40, %v924_v56  ;;  %v1207_v61 = vadd.f32 %v2926_v40, %v1206_v57 }
  0xed   : > { %v1598_v58 = vmax.f32 %v1519_v54, 0.0  ;;  %v1912_v59 = vmax.f32 %v1833_v55, 0.0 }
  0xee   : > { %v1003_v0 = vmax.f32 %v925_v60, 0.0  ;;  %v1285_v1 = vmax.f32 %v1207_v61, 0.0 }
  0xef   : > { %v1630_v62 = vmax.f32 %v1316_v53, %v1598_v58 }
  0xf0   : > { %v1317_v15 = vmax.f32 %v1003_v0, %v1285_v1 }
  0xf1   : > { %v1944_v63 = vmax.f32 %v1630_v62, %v1912_v59 }
  0xf2   : > { %v1520_v2 = vpop.f32.mrf.mxu2  ;;  %v1834_v3 = vpop.f32.mrf.mxu3 }
  0xf3   : > { %v1976_v6 = vpack.c.bf16 %v1944_v63, %v1944_v63  ;;  %v1521_v7 = vadd.f32 %v2926_v40, %v1520_v2  ;;  %v1835_v8 = vadd.f32 %v2926_v40, %v1834_v3  ;;  %v927_v9 = vpop.f32.mrf.mxu0  ;;  %v1209_v10 = vpop.f32.mrf.mxu1 }
  0xf4   : > { %v928_v13 = vadd.f32 %v2926_v40, %v927_v9  ;;  %v1210_v14 = vadd.f32 %v2926_v40, %v1209_v10 }
  0xf5   : > { %2009 = vst.msk [vmem:[%s2947_s17] sm:$0xf] %vm2008_vm3, %v1976_v6  ;;  %v1599_v16 = vmax.f32 %v1521_v7, 0.0  ;;  %v1913_v18 = vmax.f32 %v1835_v8, 0.0 }
  0xf6   : > { %2195 = vmatmul.msk.bf16.gmra.mxu0 %vm857_vm2, %v2552_v4  ;;  %2307 = vmatmul.msk.bf16.gmra.mxu1 %vm857_vm2, %v2568_v5  ;;  %v1004_v19 = vmax.f32 %v928_v13, 0.0  ;;  %v1286_v20 = vmax.f32 %v1210_v14, 0.0  ;;  %v2554_v13 = vld [vmem:[%s2857_s8 + $0x58] sm:$0xff] }
  0xf7   : > { %v1631_v17 = vmax.f32 %v1317_v15, %v1599_v16  ;;  %2419 = vmatmul.msk.bf16.gmra.mxu2 %vm857_vm2, %v2584_v11  ;;  %2531 = vmatmul.msk.bf16.gmra.mxu3 %vm857_vm2, %v2600_v12  ;;  %v2570_v14 = vld [vmem:[%s2857_s8 + $0xd8] sm:$0xff] }
  0xf8   : > { %v1318_v25 = vmax.f32 %v1004_v19, %v1286_v20  ;;  %v2586_v20 = vld [vmem:[%s2857_s8 + $0x158] sm:$0xff] }
  0xf9   : > { %v1945_v21 = vmax.f32 %v1631_v17, %v1913_v18 }
  0xfa   : > { %v1523_v22 = vpop.f32.mrf.mxu2  ;;  %v1837_v23 = vpop.f32.mrf.mxu3 }
  0xfb   : > { %v1977_v24 = vpack.c.bf16 %v1945_v21, %v1945_v21  ;;  %v1524_v26 = vadd.f32 %v2926_v40, %v1523_v22  ;;  %v1838_v27 = vadd.f32 %v2926_v40, %v1837_v23  ;;  %v929_v28 = vpop.f32.mrf.mxu0  ;;  %v1211_v29 = vpop.f32.mrf.mxu1  ;;  %v2602_v21 = vld [vmem:[%s2857_s8 + $0x1d8] sm:$0xff] }
  0xfc   : > { %v930_v32 = vadd.f32 %v2926_v40, %v929_v28  ;;  %v1212_v33 = vadd.f32 %v2926_v40, %v1211_v29 }
  0xfd   : > { %2010 = vst.msk [vmem:[%s2947_s17 + $0x4] sm:$0xf] %vm2008_vm3, %v1977_v24  ;;  %v1600_v30 = vmax.f32 %v1524_v26, 0.0  ;;  %v1914_v31 = vmax.f32 %v1838_v27, 0.0 }
  0xfe   : > { %v1005_v36 = vmax.f32 %v930_v32, 0.0  ;;  %v1287_v37 = vmax.f32 %v1212_v33, 0.0 }
  0xff   : > { %v1632_v34 = vmax.f32 %v1318_v25, %v1600_v30 }
 0x100   : > { %v1319_v52 = vmax.f32 %v1005_v36, %v1287_v37 }
 0x101   : > { %v1946_v35 = vmax.f32 %v1632_v34, %v1914_v31 }
 0x102   : > { %v1525_v38 = vpop.f32.mrf.mxu2  ;;  %v1839_v39 = vpop.f32.mrf.mxu3 }
 0x103   : > { %v1978_v43 = vpack.c.bf16 %v1946_v35, %v1946_v35  ;;  %v1526_v44 = vadd.f32 %v2926_v40, %v1525_v38  ;;  %v1840_v45 = vadd.f32 %v2926_v40, %v1839_v39  ;;  %v932_v46 = vpop.f32.mrf.mxu0  ;;  %v1214_v47 = vpop.f32.mrf.mxu1 }
 0x104   : > { %v933_v50 = vadd.f32 %v2926_v40, %v932_v46  ;;  %v1215_v51 = vadd.f32 %v2926_v40, %v1214_v47 }
 0x105   : > { %2011 = vst.msk [vmem:[%s2947_s17 + $0x8] sm:$0xf] %vm2008_vm3, %v1978_v43  ;;  %v1601_v53 = vmax.f32 %v1526_v44, 0.0  ;;  %v1915_v55 = vmax.f32 %v1840_v45, 0.0 }
 0x106   : > { %2196 = vmatmul.msk.bf16.gmra.mxu0 %vm857_vm2, %v2553_v41  ;;  %2308 = vmatmul.msk.bf16.gmra.mxu1 %vm857_vm2, %v2569_v42  ;;  %v1006_v56 = vmax.f32 %v933_v50, 0.0  ;;  %v1288_v57 = vmax.f32 %v1215_v51, 0.0  ;;  %v2555_v50 = vld [vmem:[%s2857_s8 + $0x60] sm:$0xff] }
 0x107   : > { %v1633_v54 = vmax.f32 %v1319_v52, %v1601_v53  ;;  %2420 = vmatmul.msk.bf16.gmra.mxu2 %vm857_vm2, %v2585_v48  ;;  %2532 = vmatmul.msk.bf16.gmra.mxu3 %vm857_vm2, %v2601_v49  ;;  %v2571_v51 = vld [vmem:[%s2857_s8 + $0xe0] sm:$0xff] }
 0x108   : > { %v1320_v62 = vmax.f32 %v1006_v56, %v1288_v57  ;;  %v2587_v57 = vld [vmem:[%s2857_s8 + $0x160] sm:$0xff] }
 0x109   : > { %v1947_v58 = vmax.f32 %v1633_v54, %v1915_v55 }
 0x10a   : > { %v1528_v59 = vpop.f32.mrf.mxu2  ;;  %v1842_v60 = vpop.f32.mrf.mxu3 }
 0x10b   : > { %v1979_v61 = vpack.c.bf16 %v1947_v58, %v1947_v58  ;;  %v1529_v63 = vadd.f32 %v2926_v40, %v1528_v59  ;;  %v1843_v0 = vadd.f32 %v2926_v40, %v1842_v60  ;;  %v934_v1 = vpop.f32.mrf.mxu0  ;;  %v1216_v2 = vpop.f32.mrf.mxu1  ;;  %v2603_v58 = vld [vmem:[%s2857_s8 + $0x1e0] sm:$0xff] }
 0x10c   : > { %v935_v5 = vadd.f32 %v2926_v40, %v934_v1  ;;  %v1217_v6 = vadd.f32 %v2926_v40, %v1216_v2 }
 0x10d   : > { %2012 = vst.msk [vmem:[%s2947_s17 + $0xc] sm:$0xf] %vm2008_vm3, %v1979_v61  ;;  %v1602_v3 = vmax.f32 %v1529_v63, 0.0  ;;  %v1916_v4 = vmax.f32 %v1843_v0, 0.0 }
 0x10e   : > { %v1007_v9 = vmax.f32 %v935_v5, 0.0  ;;  %v1289_v10 = vmax.f32 %v1217_v6, 0.0 }
 0x10f   : > { %v1634_v7 = vmax.f32 %v1320_v62, %v1602_v3 }
 0x110   : > { %v1321_v24 = vmax.f32 %v1007_v9, %v1289_v10 }
 0x111   : > { %v1948_v8 = vmax.f32 %v1634_v7, %v1916_v4 }
 0x112   : > { %v1530_v11 = vpop.f32.mrf.mxu2  ;;  %v1844_v12 = vpop.f32.mrf.mxu3 }
 0x113   : > { %v1980_v15 = vpack.c.bf16 %v1948_v8, %v1948_v8  ;;  %v1531_v16 = vadd.f32 %v2926_v40, %v1530_v11  ;;  %v1845_v17 = vadd.f32 %v2926_v40, %v1844_v12  ;;  %v937_v18 = vpop.f32.mrf.mxu0  ;;  %v1219_v19 = vpop.f32.mrf.mxu1 }
 0x114   : > { %v938_v22 = vadd.f32 %v2926_v40, %v937_v18  ;;  %v1220_v23 = vadd.f32 %v2926_v40, %v1219_v19 }
 0x115   : > { %2013 = vst.msk [vmem:[%s2947_s17 + $0x10] sm:$0xf] %vm2008_vm3, %v1980_v15  ;;  %v1603_v25 = vmax.f32 %v1531_v16, 0.0  ;;  %v1917_v27 = vmax.f32 %v1845_v17, 0.0 }
 0x116   : > { %2197 = vmatmul.msk.bf16.gmra.mxu0 %vm857_vm2, %v2554_v13  ;;  %2309 = vmatmul.msk.bf16.gmra.mxu1 %vm857_vm2, %v2570_v14  ;;  %v1008_v28 = vmax.f32 %v938_v22, 0.0  ;;  %v1290_v29 = vmax.f32 %v1220_v23, 0.0  ;;  %v2556_v22 = vld [vmem:[%s2857_s8 + $0x68] sm:$0xff] }
 0x117   : > { %v1635_v26 = vmax.f32 %v1321_v24, %v1603_v25  ;;  %2421 = vmatmul.msk.bf16.gmra.mxu2 %vm857_vm2, %v2586_v20  ;;  %2533 = vmatmul.msk.bf16.gmra.mxu3 %vm857_vm2, %v2602_v21  ;;  %v2572_v23 = vld [vmem:[%s2857_s8 + $0xe8] sm:$0xff] }
 0x118   : > { %v1322_v34 = vmax.f32 %v1008_v28, %v1290_v29  ;;  %v2588_v29 = vld [vmem:[%s2857_s8 + $0x168] sm:$0xff] }
 0x119   : > { %v1949_v30 = vmax.f32 %v1635_v26, %v1917_v27 }
 0x11a   : > { %v1533_v31 = vpop.f32.mrf.mxu2  ;;  %v1847_v32 = vpop.f32.mrf.mxu3 }
 0x11b   : > { %v1981_v33 = vpack.c.bf16 %v1949_v30, %v1949_v30  ;;  %v1534_v35 = vadd.f32 %v2926_v40, %v1533_v31  ;;  %v1848_v36 = vadd.f32 %v2926_v40, %v1847_v32  ;;  %v939_v37 = vpop.f32.mrf.mxu0  ;;  %v1221_v38 = vpop.f32.mrf.mxu1  ;;  %v2604_v30 = vld [vmem:[%s2857_s8 + $0x1e8] sm:$0xff] }
 0x11c   : > { %v940_v42 = vadd.f32 %v2926_v40, %v939_v37  ;;  %v1222_v43 = vadd.f32 %v2926_v40, %v1221_v38 }
 0x11d   : > { %2014 = vst.msk [vmem:[%s2947_s17 + $0x14] sm:$0xf] %vm2008_vm3, %v1981_v33  ;;  %v1604_v39 = vmax.f32 %v1534_v35, 0.0  ;;  %v1918_v41 = vmax.f32 %v1848_v36, 0.0 }
 0x11e   : > { %v1009_v46 = vmax.f32 %v940_v42, 0.0  ;;  %v1291_v47 = vmax.f32 %v1222_v43, 0.0 }
 0x11f   : > { %v1636_v44 = vmax.f32 %v1322_v34, %v1604_v39 }
 0x120   : > { %v1323_v61 = vmax.f32 %v1009_v46, %v1291_v47 }
 0x121   : > { %v1950_v45 = vmax.f32 %v1636_v44, %v1918_v41 }
 0x122   : > { %v1535_v48 = vpop.f32.mrf.mxu2  ;;  %v1849_v49 = vpop.f32.mrf.mxu3 }
 0x123   : > { %v1982_v52 = vpack.c.bf16 %v1950_v45, %v1950_v45  ;;  %v1536_v53 = vadd.f32 %v2926_v40, %v1535_v48  ;;  %v1850_v54 = vadd.f32 %v2926_v40, %v1849_v49  ;;  %v942_v55 = vpop.f32.mrf.mxu0  ;;  %v1224_v56 = vpop.f32.mrf.mxu1 }
 0x124   : > { %v943_v59 = vadd.f32 %v2926_v40, %v942_v55  ;;  %v1225_v60 = vadd.f32 %v2926_v40, %v1224_v56 }
 0x125   : > { %2015 = vst.msk [vmem:[%s2947_s17 + $0x18] sm:$0xf] %vm2008_vm3, %v1982_v52  ;;  %v1605_v62 = vmax.f32 %v1536_v53, 0.0  ;;  %v1919_v0 = vmax.f32 %v1850_v54, 0.0 }
 0x126   : > { %2198 = vmatmul.msk.bf16.gmra.mxu0 %vm857_vm2, %v2555_v50  ;;  %2310 = vmatmul.msk.bf16.gmra.mxu1 %vm857_vm2, %v2571_v51  ;;  %v1010_v1 = vmax.f32 %v943_v59, 0.0  ;;  %v1292_v2 = vmax.f32 %v1225_v60, 0.0  ;;  %v2557_v59 = vld [vmem:[%s2857_s8 + $0x70] sm:$0xff] }
 0x127   : > { %v1637_v63 = vmax.f32 %v1323_v61, %v1605_v62  ;;  %2422 = vmatmul.msk.bf16.gmra.mxu2 %vm857_vm2, %v2587_v57  ;;  %2534 = vmatmul.msk.bf16.gmra.mxu3 %vm857_vm2, %v2603_v58  ;;  %v2573_v60 = vld [vmem:[%s2857_s8 + $0xf0] sm:$0xff] }
 0x128   : > { %v1324_v7 = vmax.f32 %v1010_v1, %v1292_v2  ;;  %v2589_v2 = vld [vmem:[%s2857_s8 + $0x170] sm:$0xff] }
 0x129   : > { %v1951_v3 = vmax.f32 %v1637_v63, %v1919_v0 }
 0x12a   : > { %v1538_v4 = vpop.f32.mrf.mxu2  ;;  %v1852_v5 = vpop.f32.mrf.mxu3 }
 0x12b   : > { %v1983_v6 = vpack.c.bf16 %v1951_v3, %v1951_v3  ;;  %v1539_v8 = vadd.f32 %v2926_v40, %v1538_v4  ;;  %v1853_v9 = vadd.f32 %v2926_v40, %v1852_v5  ;;  %v944_v10 = vpop.f32.mrf.mxu0  ;;  %v1226_v11 = vpop.f32.mrf.mxu1  ;;  %v2605_v3 = vld [vmem:[%s2857_s8 + $0x1f0] sm:$0xff] }
 0x12c   : > { %v945_v14 = vadd.f32 %v2926_v40, %v944_v10  ;;  %v1227_v15 = vadd.f32 %v2926_v40, %v1226_v11 }
 0x12d   : > { %2016 = vst.msk [vmem:[%s2947_s17 + $0x1c] sm:$0xf] %vm2008_vm3, %v1983_v6  ;;  %v1606_v12 = vmax.f32 %v1539_v8, 0.0  ;;  %v1920_v13 = vmax.f32 %v1853_v9, 0.0 }
 0x12e   : > { %v1011_v18 = vmax.f32 %v945_v14, 0.0  ;;  %v1293_v19 = vmax.f32 %v1227_v15, 0.0 }
 0x12f   : > { %v1638_v16 = vmax.f32 %v1324_v7, %v1606_v12 }
 0x130   : > { %v1325_v33 = vmax.f32 %v1011_v18, %v1293_v19 }
 0x131   : > { %v1952_v17 = vmax.f32 %v1638_v16, %v1920_v13 }
 0x132   : > { %v1540_v20 = vpop.f32.mrf.mxu2  ;;  %v1854_v21 = vpop.f32.mrf.mxu3 }
 0x133   : > { %v1984_v24 = vpack.c.bf16 %v1952_v17, %v1952_v17  ;;  %v1541_v25 = vadd.f32 %v2926_v40, %v1540_v20  ;;  %v1855_v26 = vadd.f32 %v2926_v40, %v1854_v21  ;;  %v947_v27 = vpop.f32.mrf.mxu0  ;;  %v1229_v28 = vpop.f32.mrf.mxu1 }
 0x134   : > { %v948_v31 = vadd.f32 %v2926_v40, %v947_v27  ;;  %v1230_v32 = vadd.f32 %v2926_v40, %v1229_v28 }
 0x135   : > { %2017 = vst.msk [vmem:[%s2947_s17 + $0x20] sm:$0xf] %vm2008_vm3, %v1984_v24  ;;  %v1607_v34 = vmax.f32 %v1541_v25, 0.0  ;;  %v1921_v36 = vmax.f32 %v1855_v26, 0.0 }
 0x136   : > { %2199 = vmatmul.msk.bf16.gmra.mxu0 %vm857_vm2, %v2556_v22  ;;  %2311 = vmatmul.msk.bf16.gmra.mxu1 %vm857_vm2, %v2572_v23  ;;  %v1012_v37 = vmax.f32 %v948_v31, 0.0  ;;  %v1294_v38 = vmax.f32 %v1230_v32, 0.0  ;;  %v2558_v31 = vld [vmem:[%s2857_s8 + $0x78] sm:$0xff] }
 0x137   : > { %v1639_v35 = vmax.f32 %v1325_v33, %v1607_v34  ;;  %2423 = vmatmul.msk.bf16.gmra.mxu2 %vm857_vm2, %v2588_v29  ;;  %2535 = vmatmul.msk.bf16.gmra.mxu3 %vm857_vm2, %v2604_v30  ;;  %v2574_v32 = vld [vmem:[%s2857_s8 + $0xf8] sm:$0xff] }
 0x138   : > { %v1326_v44 = vmax.f32 %v1012_v37, %v1294_v38  ;;  %v2590_v38 = vld [vmem:[%s2857_s8 + $0x178] sm:$0xff] }
 0x139   : > { %v1953_v39 = vmax.f32 %v1639_v35, %v1921_v36 }
 0x13a   : > { %v1543_v41 = vpop.f32.mrf.mxu2  ;;  %v1857_v42 = vpop.f32.mrf.mxu3 }
 0x13b   : > { %v1985_v43 = vpack.c.bf16 %v1953_v39, %v1953_v39  ;;  %v1544_v45 = vadd.f32 %v2926_v40, %v1543_v41  ;;  %v1858_v46 = vadd.f32 %v2926_v40, %v1857_v42  ;;  %v949_v47 = vpop.f32.mrf.mxu0  ;;  %v1231_v48 = vpop.f32.mrf.mxu1  ;;  %v2606_v39 = vld [vmem:[%s2857_s8 + $0x1f8] sm:$0xff] }
 0x13c   : > { %v950_v51 = vadd.f32 %v2926_v40, %v949_v47  ;;  %v1232_v52 = vadd.f32 %v2926_v40, %v1231_v48 }
 0x13d   : > { %2018 = vst.msk [vmem:[%s2947_s17 + $0x24] sm:$0xf] %vm2008_vm3, %v1985_v43  ;;  %v1608_v49 = vmax.f32 %v1544_v45, 0.0  ;;  %v1922_v50 = vmax.f32 %v1858_v46, 0.0 }
 0x13e   : > { %v1013_v55 = vmax.f32 %v950_v51, 0.0  ;;  %v1295_v56 = vmax.f32 %v1232_v52, 0.0 }
 0x13f   : > { %v1640_v53 = vmax.f32 %v1326_v44, %v1608_v49 }
 0x140   : > { %v1327_v6 = vmax.f32 %v1013_v55, %v1295_v56 }
 0x141   : > { %v1954_v54 = vmax.f32 %v1640_v53, %v1922_v50 }
 0x142   : > { %v1545_v57 = vpop.f32.mrf.mxu2  ;;  %v1859_v58 = vpop.f32.mrf.mxu3 }
 0x143   : > { %v1986_v61 = vpack.c.bf16 %v1954_v54, %v1954_v54  ;;  %v1546_v62 = vadd.f32 %v2926_v40, %v1545_v57  ;;  %v1860_v63 = vadd.f32 %v2926_v40, %v1859_v58  ;;  %v952_v0 = vpop.f32.mrf.mxu0  ;;  %v1234_v1 = vpop.f32.mrf.mxu1 }
 0x144   : > { %v953_v4 = vadd.f32 %v2926_v40, %v952_v0  ;;  %v1235_v5 = vadd.f32 %v2926_v40, %v1234_v1 }
 0x145   : > { %2019 = vst.msk [vmem:[%s2947_s17 + $0x28] sm:$0xf] %vm2008_vm3, %v1986_v61  ;;  %v1609_v7 = vmax.f32 %v1546_v62, 0.0  ;;  %v1923_v9 = vmax.f32 %v1860_v63, 0.0 }
 0x146   : > { %2200 = vmatmul.msk.bf16.gmra.mxu0 %vm857_vm2, %v2557_v59  ;;  %2312 = vmatmul.msk.bf16.gmra.mxu1 %vm857_vm2, %v2573_v60  ;;  %v1014_v10 = vmax.f32 %v953_v4, 0.0  ;;  %v1296_v11 = vmax.f32 %v1235_v5, 0.0 }
 0x147   : > { %v1641_v8 = vmax.f32 %v1327_v6, %v1609_v7  ;;  %2424 = vmatmul.msk.bf16.gmra.mxu2 %vm857_vm2, %v2589_v2  ;;  %2536 = vmatmul.msk.bf16.gmra.mxu3 %vm857_vm2, %v2605_v3 }
 0x148   : > { %v1328_v16 = vmax.f32 %v1014_v10, %v1296_v11 }
 0x149   : > { %v1955_v12 = vmax.f32 %v1641_v8, %v1923_v9 }
 0x14a   : > { %v1548_v13 = vpop.f32.mrf.mxu2  ;;  %v1862_v14 = vpop.f32.mrf.mxu3 }
 0x14b   : > { %v1987_v15 = vpack.c.bf16 %v1955_v12, %v1955_v12  ;;  %v1549_v17 = vadd.f32 %v2926_v40, %v1548_v13  ;;  %v1863_v18 = vadd.f32 %v2926_v40, %v1862_v14  ;;  %v954_v19 = vpop.f32.mrf.mxu0  ;;  %v1236_v20 = vpop.f32.mrf.mxu1 }
 0x14c   : > { %v955_v23 = vadd.f32 %v2926_v40, %v954_v19  ;;  %v1237_v24 = vadd.f32 %v2926_v40, %v1236_v20 }
 0x14d   : > { %2020 = vst.msk [vmem:[%s2947_s17 + $0x2c] sm:$0xf] %vm2008_vm3, %v1987_v15  ;;  %v1610_v21 = vmax.f32 %v1549_v17, 0.0  ;;  %v1924_v22 = vmax.f32 %v1863_v18, 0.0 }
 0x14e   : > { %v1015_v27 = vmax.f32 %v955_v23, 0.0  ;;  %v1297_v28 = vmax.f32 %v1237_v24, 0.0 }
 0x14f   : > { %v1642_v25 = vmax.f32 %v1328_v16, %v1610_v21 }
 0x150   : > { %v1329_v43 = vmax.f32 %v1015_v27, %v1297_v28 }
 0x151   : > { %v1956_v26 = vmax.f32 %v1642_v25, %v1924_v22 }
 0x152   : > { %v1550_v29 = vpop.f32.mrf.mxu2  ;;  %v1864_v30 = vpop.f32.mrf.mxu3 }
 0x153   : > { %v1988_v33 = vpack.c.bf16 %v1956_v26, %v1956_v26  ;;  %v1551_v34 = vadd.f32 %v2926_v40, %v1550_v29  ;;  %v1865_v35 = vadd.f32 %v2926_v40, %v1864_v30  ;;  %v957_v36 = vpop.f32.mrf.mxu0  ;;  %v1239_v37 = vpop.f32.mrf.mxu1 }
 0x154   : > { %v958_v41 = vadd.f32 %v2926_v40, %v957_v36  ;;  %v1240_v42 = vadd.f32 %v2926_v40, %v1239_v37 }
 0x155   : > { %2021 = vst.msk [vmem:[%s2947_s17 + $0x30] sm:$0xf] %vm2008_vm3, %v1988_v33  ;;  %v1611_v44 = vmax.f32 %v1551_v34, 0.0  ;;  %v1925_v46 = vmax.f32 %v1865_v35, 0.0 }
 0x156   : > { %2201 = vmatmul.msk.bf16.gmra.mxu0 %vm857_vm2, %v2558_v31  ;;  %2313 = vmatmul.msk.bf16.gmra.mxu1 %vm857_vm2, %v2574_v32  ;;  %v1016_v47 = vmax.f32 %v958_v41, 0.0  ;;  %v1298_v48 = vmax.f32 %v1240_v42, 0.0 }
 0x157   : > { %v1643_v45 = vmax.f32 %v1329_v43, %v1611_v44  ;;  %2425 = vmatmul.msk.bf16.gmra.mxu2 %vm857_vm2, %v2590_v38  ;;  %2537 = vmatmul.msk.bf16.gmra.mxu3 %vm857_vm2, %v2606_v39 }
 0x158   : > { %v1330_v53 = vmax.f32 %v1016_v47, %v1298_v48 }
 0x159   : > { %v1957_v49 = vmax.f32 %v1643_v45, %v1925_v46 }
 0x15a   : > { %v1553_v50 = vpop.f32.mrf.mxu2  ;;  %v1867_v51 = vpop.f32.mrf.mxu3 }
 0x15b   : > { %v1989_v52 = vpack.c.bf16 %v1957_v49, %v1957_v49  ;;  %v1554_v54 = vadd.f32 %v2926_v40, %v1553_v50  ;;  %v1868_v55 = vadd.f32 %v2926_v40, %v1867_v51  ;;  %v959_v56 = vpop.f32.mrf.mxu0  ;;  %v1241_v57 = vpop.f32.mrf.mxu1 }
 0x15c   : > { %v960_v60 = vadd.f32 %v2926_v40, %v959_v56  ;;  %v1242_v61 = vadd.f32 %v2926_v40, %v1241_v57 }
 0x15d   : > { %2022 = vst.msk [vmem:[%s2947_s17 + $0x34] sm:$0xf] %vm2008_vm3, %v1989_v52  ;;  %v1612_v58 = vmax.f32 %v1554_v54, 0.0  ;;  %v1926_v59 = vmax.f32 %v1868_v55, 0.0 }
 0x15e   : > { %v1017_v0 = vmax.f32 %v960_v60, 0.0  ;;  %v1299_v1 = vmax.f32 %v1242_v61, 0.0 }
 0x15f   : > { %v1644_v62 = vmax.f32 %v1330_v53, %v1612_v58 }
 0x160   : > { %v1331_v11 = vmax.f32 %v1017_v0, %v1299_v1 }
 0x161   : > { %v1958_v63 = vmax.f32 %v1644_v62, %v1926_v59 }
 0x162   : > { %v1555_v2 = vpop.f32.mrf.mxu2  ;;  %v1869_v3 = vpop.f32.mrf.mxu3 }
 0x163   : > { %v1990_v4 = vpack.c.bf16 %v1958_v63, %v1958_v63  ;;  %v1556_v5 = vadd.f32 %v2926_v40, %v1555_v2  ;;  %v1870_v6 = vadd.f32 %v2926_v40, %v1869_v3  ;;  %v962_v7 = vpop.f32.mrf.mxu0  ;;  %v1244_v8 = vpop.f32.mrf.mxu1 }
 0x164   : > { %v963_v9 = vadd.f32 %v2926_v40, %v962_v7  ;;  %v1245_v10 = vadd.f32 %v2926_v40, %v1244_v8 }
 0x165   : > { %2023 = vst.msk [vmem:[%s2947_s17 + $0x38] sm:$0xf] %vm2008_vm3, %v1990_v4  ;;  %v1613_v12 = vmax.f32 %v1556_v5, 0.0  ;;  %v1927_v14 = vmax.f32 %v1870_v6, 0.0 }
 0x166   : > { %v1018_v15 = vmax.f32 %v963_v9, 0.0  ;;  %v1300_v16 = vmax.f32 %v1245_v10, 0.0 }
 0x167   : > { %v1645_v13 = vmax.f32 %v1331_v11, %v1613_v12 }
 0x168   : > { %v1332_v21 = vmax.f32 %v1018_v15, %v1300_v16 }
 0x169   : > { %v1959_v17 = vmax.f32 %v1645_v13, %v1927_v14 }
 0x16a   : > { %v1558_v18 = vpop.f32.mrf.mxu2  ;;  %v1872_v19 = vpop.f32.mrf.mxu3 }
 0x16b   : > { %v1991_v20 = vpack.c.bf16 %v1959_v17, %v1959_v17  ;;  %v1559_v22 = vadd.f32 %v2926_v40, %v1558_v18  ;;  %v1873_v23 = vadd.f32 %v2926_v40, %v1872_v19  ;;  %v964_v24 = vpop.f32.mrf.mxu0  ;;  %v1246_v25 = vpop.f32.mrf.mxu1 }
 0x16c   : > { %v965_v28 = vadd.f32 %v2926_v40, %v964_v24  ;;  %v1247_v29 = vadd.f32 %v2926_v40, %v1246_v25 }
 0x16d   : > { %2024 = vst.msk [vmem:[%s2947_s17 + $0x3c] sm:$0xf] %vm2008_vm3, %v1991_v20  ;;  %v1614_v26 = vmax.f32 %v1559_v22, 0.0  ;;  %v1928_v27 = vmax.f32 %v1873_v23, 0.0 }
 0x16e   : > { %v1019_v32 = vmax.f32 %v965_v28, 0.0  ;;  %v1301_v33 = vmax.f32 %v1247_v29, 0.0 }
 0x16f   : > { %v1646_v30 = vmax.f32 %v1332_v21, %v1614_v26 }
 0x170   : > { %v1333_v44 = vmax.f32 %v1019_v32, %v1301_v33 }
 0x171   : > { %v1960_v31 = vmax.f32 %v1646_v30, %v1928_v27 }
 0x172   : > { %v1560_v34 = vpop.f32.mrf.mxu2  ;;  %v1874_v35 = vpop.f32.mrf.mxu3 }
 0x173   : > { %v1992_v36 = vpack.c.bf16 %v1960_v31, %v1960_v31  ;;  %v1561_v37 = vadd.f32 %v2926_v40, %v1560_v34  ;;  %v1875_v38 = vadd.f32 %v2926_v40, %v1874_v35  ;;  %v967_v39 = vpop.f32.mrf.mxu0  ;;  %v1249_v41 = vpop.f32.mrf.mxu1 }
 0x174   : > { %v968_v42 = vadd.f32 %v2926_v40, %v967_v39  ;;  %v1250_v43 = vadd.f32 %v2926_v40, %v1249_v41 }
 0x175   : > { %2025 = vst.msk [vmem:[%s2947_s17 + $0x40] sm:$0xf] %vm2008_vm3, %v1992_v36  ;;  %v1615_v45 = vmax.f32 %v1561_v37, 0.0  ;;  %v1929_v47 = vmax.f32 %v1875_v38, 0.0 }
 0x176   : > { %v1020_v48 = vmax.f32 %v968_v42, 0.0  ;;  %v1302_v49 = vmax.f32 %v1250_v43, 0.0 }
 0x177   : > { %v1647_v46 = vmax.f32 %v1333_v44, %v1615_v45 }
 0x178   : > { %v1334_v54 = vmax.f32 %v1020_v48, %v1302_v49 }
 0x179   : > { %v1961_v50 = vmax.f32 %v1647_v46, %v1929_v47 }
 0x17a   : > { %v1563_v51 = vpop.f32.mrf.mxu2  ;;  %v1877_v52 = vpop.f32.mrf.mxu3 }
 0x17b   : > { %v1993_v53 = vpack.c.bf16 %v1961_v50, %v1961_v50  ;;  %v1564_v55 = vadd.f32 %v2926_v40, %v1563_v51  ;;  %v1878_v56 = vadd.f32 %v2926_v40, %v1877_v52  ;;  %v969_v57 = vpop.f32.mrf.mxu0  ;;  %v1251_v58 = vpop.f32.mrf.mxu1 }
 0x17c   : > { %v970_v61 = vadd.f32 %v2926_v40, %v969_v57  ;;  %v1252_v62 = vadd.f32 %v2926_v40, %v1251_v58 }
 0x17d   : > { %2026 = vst.msk [vmem:[%s2947_s17 + $0x44] sm:$0xf] %vm2008_vm3, %v1993_v53  ;;  %v1616_v59 = vmax.f32 %v1564_v55, 0.0  ;;  %v1930_v60 = vmax.f32 %v1878_v56, 0.0 }
 0x17e   : > { %v1021_v1 = vmax.f32 %v970_v61, 0.0  ;;  %v1303_v2 = vmax.f32 %v1252_v62, 0.0 }
 0x17f   : > { %v1648_v63 = vmax.f32 %v1334_v54, %v1616_v59 }
 0x180   : > { %v1335_v12 = vmax.f32 %v1021_v1, %v1303_v2 }
 0x181   : > { %v1962_v0 = vmax.f32 %v1648_v63, %v1930_v60 }
 0x182   : > { %v1565_v3 = vpop.f32.mrf.mxu2  ;;  %v1879_v4 = vpop.f32.mrf.mxu3 }
 0x183   : > { %v1994_v5 = vpack.c.bf16 %v1962_v0, %v1962_v0  ;;  %v1566_v6 = vadd.f32 %v2926_v40, %v1565_v3  ;;  %v1880_v7 = vadd.f32 %v2926_v40, %v1879_v4  ;;  %v972_v8 = vpop.f32.mrf.mxu0  ;;  %v1254_v9 = vpop.f32.mrf.mxu1 }
 0x184   : > { %v973_v10 = vadd.f32 %v2926_v40, %v972_v8  ;;  %v1255_v11 = vadd.f32 %v2926_v40, %v1254_v9 }
 0x185   : > { %2027 = vst.msk [vmem:[%s2947_s17 + $0x48] sm:$0xf] %vm2008_vm3, %v1994_v5  ;;  %v1617_v13 = vmax.f32 %v1566_v6, 0.0  ;;  %v1931_v15 = vmax.f32 %v1880_v7, 0.0 }
 0x186   : > { %v1022_v16 = vmax.f32 %v973_v10, 0.0  ;;  %v1304_v17 = vmax.f32 %v1255_v11, 0.0 }
 0x187   : > { %v1649_v14 = vmax.f32 %v1335_v12, %v1617_v13 }
 0x188   : > { %v1336_v22 = vmax.f32 %v1022_v16, %v1304_v17 }
 0x189   : > { %v1963_v18 = vmax.f32 %v1649_v14, %v1931_v15 }
 0x18a   : > { %v1568_v19 = vpop.f32.mrf.mxu2  ;;  %v1882_v20 = vpop.f32.mrf.mxu3 }
 0x18b   : > { %v1995_v21 = vpack.c.bf16 %v1963_v18, %v1963_v18  ;;  %v1569_v23 = vadd.f32 %v2926_v40, %v1568_v19  ;;  %v1883_v24 = vadd.f32 %v2926_v40, %v1882_v20  ;;  %v974_v25 = vpop.f32.mrf.mxu0  ;;  %v1256_v26 = vpop.f32.mrf.mxu1 }
 0x18c   : > { %v975_v29 = vadd.f32 %v2926_v40, %v974_v25  ;;  %v1257_v30 = vadd.f32 %v2926_v40, %v1256_v26 }
 0x18d   : > { %2028 = vst.msk [vmem:[%s2947_s17 + $0x4c] sm:$0xf] %vm2008_vm3, %v1995_v21  ;;  %v1618_v27 = vmax.f32 %v1569_v23, 0.0  ;;  %v1932_v28 = vmax.f32 %v1883_v24, 0.0 }
 0x18e   : > { %v1023_v33 = vmax.f32 %v975_v29, 0.0  ;;  %v1305_v34 = vmax.f32 %v1257_v30, 0.0 }
 0x18f   : > { %v1650_v31 = vmax.f32 %v1336_v22, %v1618_v27 }
 0x190   : > { %v1337_v45 = vmax.f32 %v1023_v33, %v1305_v34 }
 0x191   : > { %v1964_v32 = vmax.f32 %v1650_v31, %v1932_v28 }
 0x192   : > { %v1570_v35 = vpop.f32.mrf.mxu2  ;;  %v1884_v36 = vpop.f32.mrf.mxu3 }
 0x193   : > { %v1996_v37 = vpack.c.bf16 %v1964_v32, %v1964_v32  ;;  %v1571_v38 = vadd.f32 %v2926_v40, %v1570_v35  ;;  %v1885_v39 = vadd.f32 %v2926_v40, %v1884_v36  ;;  %v977_v41 = vpop.f32.mrf.mxu0  ;;  %v1259_v42 = vpop.f32.mrf.mxu1 }
 0x194   : > { %v978_v43 = vadd.f32 %v2926_v40, %v977_v41  ;;  %v1260_v44 = vadd.f32 %v2926_v40, %v1259_v42 }
 0x195   : > { %2029 = vst.msk [vmem:[%s2947_s17 + $0x50] sm:$0xf] %vm2008_vm3, %v1996_v37  ;;  %v1619_v46 = vmax.f32 %v1571_v38, 0.0  ;;  %v1933_v48 = vmax.f32 %v1885_v39, 0.0 }
 0x196   : > { %v1024_v49 = vmax.f32 %v978_v43, 0.0  ;;  %v1306_v50 = vmax.f32 %v1260_v44, 0.0 }
 0x197   : > { %v1651_v47 = vmax.f32 %v1337_v45, %v1619_v46 }
 0x198   : > { %v1338_v55 = vmax.f32 %v1024_v49, %v1306_v50 }
 0x199   : > { %v1965_v51 = vmax.f32 %v1651_v47, %v1933_v48 }
 0x19a   : > { %v1573_v52 = vpop.f32.mrf.mxu2  ;;  %v1887_v53 = vpop.f32.mrf.mxu3 }
 0x19b   : > { %v1997_v54 = vpack.c.bf16 %v1965_v51, %v1965_v51  ;;  %v1574_v56 = vadd.f32 %v2926_v40, %v1573_v52  ;;  %v1888_v57 = vadd.f32 %v2926_v40, %v1887_v53  ;;  %v979_v58 = vpop.f32.mrf.mxu0  ;;  %v1261_v59 = vpop.f32.mrf.mxu1 }
 0x19c   : > { %v980_v62 = vadd.f32 %v2926_v40, %v979_v58  ;;  %v1262_v63 = vadd.f32 %v2926_v40, %v1261_v59 }
 0x19d   : > { %2030 = vst.msk [vmem:[%s2947_s17 + $0x54] sm:$0xf] %vm2008_vm3, %v1997_v54  ;;  %v1620_v60 = vmax.f32 %v1574_v56, 0.0  ;;  %v1934_v61 = vmax.f32 %v1888_v57, 0.0  ;;  %v3158_v57 = vld [vmem:[%s3208_s2] ss:$0 sm:$0xff] }
 0x19e   : > { %v1025_v2 = vmax.f32 %v980_v62, 0.0  ;;  %v1307_v3 = vmax.f32 %v1262_v63, 0.0 }
 0x19f   : > { %v1652_v0 = vmax.f32 %v1338_v55, %v1620_v60 }
 0x1a0   : > { %v1339_v13 = vmax.f32 %v1025_v2, %v1307_v3 }
 0x1a1   : > { %v1966_v1 = vmax.f32 %v1652_v0, %v1934_v61 }
 0x1a2   : > { %v1575_v4 = vpop.f32.mrf.mxu2  ;;  %v1889_v5 = vpop.f32.mrf.mxu3 }
 0x1a3   : > { %v1998_v6 = vpack.c.bf16 %v1966_v1, %v1966_v1  ;;  %v1576_v7 = vadd.f32 %v2926_v40, %v1575_v4  ;;  %v1890_v8 = vadd.f32 %v2926_v40, %v1889_v5  ;;  %v982_v9 = vpop.f32.mrf.mxu0  ;;  %v1264_v10 = vpop.f32.mrf.mxu1 }
 0x1a4   : > { %v983_v11 = vadd.f32 %v2926_v40, %v982_v9  ;;  %v1265_v12 = vadd.f32 %v2926_v40, %v1264_v10 }
 0x1a5   : > { %2031 = vst.msk [vmem:[%s2947_s17 + $0x58] sm:$0xf] %vm2008_vm3, %v1998_v6  ;;  %v1621_v14 = vmax.f32 %v1576_v7, 0.0  ;;  %v1935_v16 = vmax.f32 %v1890_v8, 0.0 }
 0x1a6   : > { %v1026_v17 = vmax.f32 %v983_v11, 0.0  ;;  %v1308_v18 = vmax.f32 %v1265_v12, 0.0 }
 0x1a7   : > { %v1653_v15 = vmax.f32 %v1339_v13, %v1621_v14 }
 0x1a8   : > { %v1340_v23 = vmax.f32 %v1026_v17, %v1308_v18 }
 0x1a9   : > { %v1967_v19 = vmax.f32 %v1653_v15, %v1935_v16 }
 0x1aa   : > { %v1578_v20 = vpop.f32.mrf.mxu2  ;;  %v1892_v21 = vpop.f32.mrf.mxu3 }
 0x1ab   : > { %v1999_v22 = vpack.c.bf16 %v1967_v19, %v1967_v19  ;;  %v1579_v24 = vadd.f32 %v2926_v40, %v1578_v20  ;;  %v1893_v25 = vadd.f32 %v2926_v40, %v1892_v21  ;;  %v984_v26 = vpop.f32.mrf.mxu0  ;;  %v1266_v27 = vpop.f32.mrf.mxu1 }
 0x1ac   : > { %v985_v30 = vadd.f32 %v2926_v40, %v984_v26  ;;  %v1267_v31 = vadd.f32 %v2926_v40, %v1266_v27 }
 0x1ad   : > { %2032 = vst.msk [vmem:[%s2947_s17 + $0x5c] sm:$0xf] %vm2008_vm3, %v1999_v22  ;;  %v1622_v28 = vmax.f32 %v1579_v24, 0.0  ;;  %v1936_v29 = vmax.f32 %v1893_v25, 0.0 }
 0x1ae   : > { %v1027_v34 = vmax.f32 %v985_v30, 0.0  ;;  %v1309_v35 = vmax.f32 %v1267_v31, 0.0 }
 0x1af   : > { %v1654_v32 = vmax.f32 %v1340_v23, %v1622_v28 }
 0x1b0   : > { %v1341_v46 = vmax.f32 %v1027_v34, %v1309_v35 }
 0x1b1   : > { %v1968_v33 = vmax.f32 %v1654_v32, %v1936_v29 }
 0x1b2   : > { %v1580_v36 = vpop.f32.mrf.mxu2  ;;  %v1894_v37 = vpop.f32.mrf.mxu3 }
 0x1b3   : > { %v2000_v38 = vpack.c.bf16 %v1968_v33, %v1968_v33  ;;  %v1581_v39 = vadd.f32 %v2926_v40, %v1580_v36  ;;  %v1895_v41 = vadd.f32 %v2926_v40, %v1894_v37  ;;  %v987_v42 = vpop.f32.mrf.mxu0  ;;  %v1269_v43 = vpop.f32.mrf.mxu1 }
 0x1b4   : > { %v988_v44 = vadd.f32 %v2926_v40, %v987_v42  ;;  %v1270_v45 = vadd.f32 %v2926_v40, %v1269_v43 }
 0x1b5   : > { %2033 = vst.msk [vmem:[%s2947_s17 + $0x60] sm:$0xf] %vm2008_vm3, %v2000_v38  ;;  %v1623_v47 = vmax.f32 %v1581_v39, 0.0  ;;  %v1937_v49 = vmax.f32 %v1895_v41, 0.0 }
 0x1b6   : > { %v1028_v50 = vmax.f32 %v988_v44, 0.0  ;;  %v1310_v51 = vmax.f32 %v1270_v45, 0.0 }
 0x1b7   : > { %v1655_v48 = vmax.f32 %v1341_v46, %v1623_v47 }
 0x1b8   : > { %v1342_v56 = vmax.f32 %v1028_v50, %v1310_v51 }
 0x1b9   : > { %v1969_v52 = vmax.f32 %v1655_v48, %v1937_v49 }
 0x1ba   : > { %v1583_v53 = vpop.f32.mrf.mxu2  ;;  %v1897_v54 = vpop.f32.mrf.mxu3 }
 0x1bb   : > { %v2001_v55 = vpack.c.bf16 %v1969_v52, %v1969_v52  ;;  %v1584_v40 = vadd.f32 %v3158_v57, %v1583_v53  ;;  %v1898_v58 = vadd.f32 %v3158_v57, %v1897_v54  ;;  %v989_v59 = vpop.f32.mrf.mxu0  ;;  %v1271_v60 = vpop.f32.mrf.mxu1 }
 0x1bc   : > { %v990_v63 = vadd.f32 %v3158_v57, %v989_v59  ;;  %v1272_v0 = vadd.f32 %v3158_v57, %v1271_v60 }
 0x1bd   : > { %2034 = vst.msk [vmem:[%s2947_s17 + $0x64] sm:$0xf] %vm2008_vm3, %v2001_v55  ;;  %v1624_v61 = vmax.f32 %v1584_v40, 0.0  ;;  %v1938_v62 = vmax.f32 %v1898_v58, 0.0 }
 0x1be   : > { %v1029_v3 = vmax.f32 %v990_v63, 0.0  ;;  %v1311_v4 = vmax.f32 %v1272_v0, 0.0 }
 0x1bf   : > { %v1656_v1 = vmax.f32 %v1342_v56, %v1624_v61 }
 0x1c0   : > { %v1343_v14 = vmax.f32 %v1029_v3, %v1311_v4 }
 0x1c1   : > { %v1970_v2 = vmax.f32 %v1656_v1, %v1938_v62 }
 0x1c2   : > { %v1585_v5 = vpop.f32.mrf.mxu2  ;;  %v1899_v6 = vpop.f32.mrf.mxu3 }
 0x1c3   : > { %v2002_v7 = vpack.c.bf16 %v1970_v2, %v1970_v2  ;;  %v1586_v8 = vadd.f32 %v3158_v57, %v1585_v5  ;;  %v1900_v9 = vadd.f32 %v3158_v57, %v1899_v6  ;;  %v992_v10 = vpop.f32.mrf.mxu0  ;;  %v1274_v11 = vpop.f32.mrf.mxu1 }
 0x1c4   : > { %v993_v12 = vadd.f32 %v3158_v57, %v992_v10  ;;  %v1275_v13 = vadd.f32 %v3158_v57, %v1274_v11 }
 0x1c5   : > { %2035 = vst.msk [vmem:[%s2947_s17 + $0x68] sm:$0xf] %vm2008_vm3, %v2002_v7  ;;  %v1625_v15 = vmax.f32 %v1586_v8, 0.0  ;;  %v1939_v17 = vmax.f32 %v1900_v9, 0.0 }
 0x1c6   : > { %v1030_v18 = vmax.f32 %v993_v12, 0.0  ;;  %v1312_v19 = vmax.f32 %v1275_v13, 0.0 }
 0x1c7   : > { %v1657_v16 = vmax.f32 %v1343_v14, %v1625_v15 }
 0x1c8   : > { %v1344_v24 = vmax.f32 %v1030_v18, %v1312_v19 }
 0x1c9   : > { %v1971_v20 = vmax.f32 %v1657_v16, %v1939_v17 }
 0x1ca   : > { %v1588_v21 = vpop.f32.mrf.mxu2  ;;  %v1902_v22 = vpop.f32.mrf.mxu3 }
 0x1cb   : > { %v2003_v23 = vpack.c.bf16 %v1971_v20, %v1971_v20  ;;  %v1589_v25 = vadd.f32 %v3158_v57, %v1588_v21  ;;  %v1903_v26 = vadd.f32 %v3158_v57, %v1902_v22  ;;  %v994_v27 = vpop.f32.mrf.mxu0  ;;  %v1276_v28 = vpop.f32.mrf.mxu1 }
 0x1cc   : > { %v995_v31 = vadd.f32 %v3158_v57, %v994_v27  ;;  %v1277_v32 = vadd.f32 %v3158_v57, %v1276_v28 }
 0x1cd   : > { %2036 = vst.msk [vmem:[%s2947_s17 + $0x6c] sm:$0xf] %vm2008_vm3, %v2003_v23  ;;  %v1626_v29 = vmax.f32 %v1589_v25, 0.0  ;;  %v1940_v30 = vmax.f32 %v1903_v26, 0.0 }
 0x1ce   : > { %v1031_v35 = vmax.f32 %v995_v31, 0.0  ;;  %v1313_v36 = vmax.f32 %v1277_v32, 0.0 }
 0x1cf   : > { %v1658_v33 = vmax.f32 %v1344_v24, %v1626_v29 }
 0x1d0   : > { %v1345_v47 = vmax.f32 %v1031_v35, %v1313_v36 }
 0x1d1   : > { %v1972_v34 = vmax.f32 %v1658_v33, %v1940_v30 }
 0x1d2   : > { %v1590_v37 = vpop.f32.mrf.mxu2  ;;  %v1904_v38 = vpop.f32.mrf.mxu3 }
 0x1d3   : > { %v2004_v39 = vpack.c.bf16 %v1972_v34, %v1972_v34  ;;  %v1591_v41 = vadd.f32 %v3158_v57, %v1590_v37  ;;  %v1905_v42 = vadd.f32 %v3158_v57, %v1904_v38  ;;  %v997_v43 = vpop.f32.mrf.mxu0  ;;  %v1279_v44 = vpop.f32.mrf.mxu1 }
 0x1d4   : > { %v998_v45 = vadd.f32 %v3158_v57, %v997_v43  ;;  %v1280_v46 = vadd.f32 %v3158_v57, %v1279_v44 }
 0x1d5   : > { %2037 = vst.msk [vmem:[%s2947_s17 + $0x70] sm:$0xf] %vm2008_vm3, %v2004_v39  ;;  %v1627_v48 = vmax.f32 %v1591_v41, 0.0  ;;  %v1941_v50 = vmax.f32 %v1905_v42, 0.0 }
 0x1d6   : > { %v1032_v51 = vmax.f32 %v998_v45, 0.0  ;;  %v1314_v52 = vmax.f32 %v1280_v46, 0.0 }
 0x1d7   : > { %v1659_v49 = vmax.f32 %v1345_v47, %v1627_v48 }
 0x1d8   : > { %v1346_v40 = vmax.f32 %v1032_v51, %v1314_v52 }
 0x1d9   : > { %v1973_v53 = vmax.f32 %v1659_v49, %v1941_v50 }
 0x1da   : > { %v1593_v54 = vpop.f32.mrf.mxu2  ;;  %v1907_v55 = vpop.f32.mrf.mxu3 }
 0x1db   : > { %v2005_v56 = vpack.c.bf16 %v1973_v53, %v1973_v53  ;;  %v1594_v58 = vadd.f32 %v3158_v57, %v1593_v54  ;;  %v1908_v59 = vadd.f32 %v3158_v57, %v1907_v55  ;;  %v999_v60 = vpop.f32.mrf.mxu0  ;;  %v1281_v61 = vpop.f32.mrf.mxu1 }
 0x1dc   : > { %v1000_v0 = vadd.f32 %v3158_v57, %v999_v60  ;;  %v1282_v1 = vadd.f32 %v3158_v57, %v1281_v61 }
 0x1dd   : > { %2038 = vst.msk [vmem:[%s2947_s17 + $0x74] sm:$0xf] %vm2008_vm3, %v2005_v56  ;;  %v1628_v62 = vmax.f32 %v1594_v58, 0.0  ;;  %v1942_v63 = vmax.f32 %v1908_v59, 0.0 }
 0x1de   : > { %v1033_v4 = vmax.f32 %v1000_v0, 0.0  ;;  %v1315_v5 = vmax.f32 %v1282_v1, 0.0 }
 0x1df   : > { %v1660_v2 = vmax.f32 %v1346_v40, %v1628_v62 }
 0x1e0   : > { %v1347_v11 = vmax.f32 %v1033_v4, %v1315_v5 }
 0x1e1   : > { %v1974_v3 = vmax.f32 %v1660_v2, %v1942_v63 }
 0x1e2   : > { %v1595_v6 = vpop.f32.mrf.mxu2  ;;  %v1909_v7 = vpop.f32.mrf.mxu3 }
 0x1e3   : > { %v2006_v8 = vpack.c.bf16 %v1974_v3, %v1974_v3  ;;  %v1596_v9 = vadd.f32 %v3158_v57, %v1595_v6  ;;  %v1910_v10 = vadd.f32 %v3158_v57, %v1909_v7 }
 0x1e5   : > { %2039 = vst.msk [vmem:[%s2947_s17 + $0x78] sm:$0xf] %vm2008_vm3, %v2006_v8  ;;  %v1629_v12 = vmax.f32 %v1596_v9, 0.0  ;;  %v1943_v14 = vmax.f32 %v1910_v10, 0.0 }
 0x1e7   : > { %v1661_v13 = vmax.f32 %v1347_v11, %v1629_v12 }
 0x1e9   : > { %v1975_v15 = vmax.f32 %v1661_v13, %v1943_v14 }
 0x1eb   : > { %v2007_v16 = vpack.c.bf16 %v1975_v15, %v1975_v15 }
 0x1ed   : > { %2040 = vst.msk [vmem:[%s2947_s17 + $0x7c] sm:$0xf] %vm2008_vm3, %v2007_v16 }
 0x1ee PF: > { %p10_p9 = scmp.ge.s32.totalorder %s2696_s16, 4   ;;  %s3210_s12 = smov %s2652_s13 }
 0x1ef   : > { %s3211_s13 = smov %s2705_s19  ;;  %s3212_s14 = smov %s2696_s16 }
 0x1f0   :  { %12 = sbr.rel (!%p10_p9) target bundleno = 2 (0x2), region = 111 }

// kernel: cnn_forward.4
= control target key start
LH: loop header
LB: loop body
LE: loop exit
PB: predicated region body
PF: predicated region fallthrough
CT: control target
= control target key end

     0   :  { %vm323_vm0 = vcmask 1041408   ;;  %vm316_vm1 = vcmask 949248   ;;  %vm822_vm2 = vcmask 404480   ;;  %s1763_s1 = inlined_call_operand.vmem [shape: bf16[500,50], index: 1, kind: input, shape index: {}]   ;;  %s1764_s0 = inlined_call_operand.vmem [shape: bf16[4,32,500], index: 0, kind: input, shape index: {}]   ;;  %s1765_s2 = inlined_call_operand.vmem [shape: f32[1,50], index: 2, kind: input, shape index: {}]   ;;  %s1766_s3 = inlined_call_operand.vmem [shape: bf16[32,50], index: 3, kind: output, shape index: {}]  }
   0x1   :  { %v1202_v0 = vld [vmem:[%s1763_s1 + $0x38] sm:$0xff]  ;;  %v1222_v5 = vld [vmem:[%s1763_s1 + $0x30] sm:$0xff]  ;;  %v1242_v10 = vld [vmem:[%s1763_s1 + $0x28] sm:$0xff] }
   0x2   :  { %v1207_v1 = vld [vmem:[%s1763_s1 + $0x78] sm:$0xff]  ;;  %327 = vmatpush.bf16.msra.mxu0 %v1202_v0  ;;  %v1227_v6 = vld [vmem:[%s1763_s1 + $0x70] sm:$0xff]  ;;  %v1247_v11 = vld [vmem:[%s1763_s1 + $0x68] sm:$0xff] }
   0x3   :  { %v1212_v2 = vld [vmem:[%s1763_s1 + $0xb8] sm:$0xff]  ;;  %346 = vmatpush.bf16.msra.mxu1 %v1207_v1  ;;  %v1233_v7 = vld [vmem:[%s1763_s1 + $0xb0] sm:$0xff]  ;;  %v1259_v13 = vld [vmem:[%s1763_s1 + $0xa8] sm:$0xff] }
   0x4   :  { %v76_v3 = vld [vmem:[%s1763_s1 + $0xf8] sm:$0x3]  ;;  %365 = vmatpush.bf16.msra.mxu2 %v1212_v2  ;;  %v1254_v12 = vld [vmem:[%s1763_s1 + $0xf0] sm:$0xff]  ;;  %v1266_v14 = vld [vmem:[%s1763_s1 + $0x20] sm:$0xff] }
   0x5   :  { %v252_v4 = vunpack.c.l.b16 %v76_v3  ;;  %v1271_v15 = vld [vmem:[%s1763_s1 + $0x60] sm:$0xff]  ;;  %v1278_v16 = vld [vmem:[%s1763_s1 + $0xe8] sm:$0xff]  ;;  %v1290_v18 = vld [vmem:[%s1763_s1 + $0x18] sm:$0xff] }
   0x6   :  { %328 = vmatpush.bf16.msra.mxu0 %v1222_v5  ;;  %v1283_v17 = vld [vmem:[%s1763_s1 + $0xa0] sm:$0xff]  ;;  %v1295_v19 = vld [vmem:[%s1763_s1 + $0x58] sm:$0xff]  ;;  %v1314_v22 = vld [vmem:[%s1763_s1 + $0x10] sm:$0xff] }
   0x7   :  { %v284_v8 = vpack.c.b16 %v252_v4, %v252_v4  ;;  %347 = vmatpush.bf16.msra.mxu1 %v1227_v6  ;;  %v1302_v20 = vld [vmem:[%s1763_s1 + $0xe0] sm:$0xff]  ;;  %v1307_v21 = vld [vmem:[%s1763_s1 + $0x98] sm:$0xff]  ;;  %v1319_v23 = vld [vmem:[%s1763_s1 + $0x50] sm:$0xff] }
   0x8   :  { %366 = vmatpush.bf16.msra.mxu2 %v1233_v7  ;;  %v1326_v24 = vld [vmem:[%s1763_s1 + $0xd8] sm:$0xff]  ;;  %v1331_v25 = vld [vmem:[%s1763_s1 + $0x90] sm:$0xff]  ;;  %v1338_v26 = vld [vmem:[%s1763_s1 + $0x8] sm:$0xff] }
   0x9   :  { %v1235_v9 = vsel %vm323_vm0, %v284_v8, 0  ;;  %v1343_v27 = vld [vmem:[%s1763_s1 + $0x48] sm:$0xff]  ;;  %v1350_v28 = vld [vmem:[%s1763_s1 + $0xd0] sm:$0xff]  ;;  %v1365_v31 = vld [vmem:[%s1763_s1] sm:$0xff] }
   0xa   :  { %384 = vmatpush.bf16.msra.mxu3 %v1235_v9  ;;  %329 = vmatpush.bf16.msra.mxu0 %v1242_v10  ;;  %v1355_v29 = vld [vmem:[%s1763_s1 + $0x88] sm:$0xff]  ;;  %v1370_v32 = vld [vmem:[%s1763_s1 + $0x40] sm:$0xff]  ;;  %v1148_v34 = vld [vmem:[%s1764_s0 + $0xc] sm:$0xf0] }
   0xb   :  { %348 = vmatpush.bf16.msra.mxu1 %v1247_v11  ;;  %v1360_v30 = vld [vmem:[%s1763_s1 + $0xc8] sm:$0xff]  ;;  %v833_v33 = vld [vmem:[%s1764_s0] sm:$0xf]  ;;  %v1146_v35 = vld [vmem:[%s1764_s0 + $0x4] sm:$0xf] }
   0xc   :  { %367 = vmatpush.bf16.msra.mxu2 %v1259_v13  ;;  %v835_v36 = vld [vmem:[%s1764_s0 + $0x10] sm:$0xf0]  ;;  %v1391_v37 = vld [vmem:[%s1763_s1 + $0x80] sm:$0xff]  ;;  %v841_v38 = vld [vmem:[%s1764_s0 + $0x8] sm:$0xf]  ;;  %v834_v40 = vor.u32 %v1148_v34, %v833_v33 }
   0xd   :  { %v1149_v39 = vld [vmem:[%s1764_s0 + $0x14] sm:$0xf0]  ;;  %v838_v41 = vor.u32 %v1146_v35, %v835_v36  ;;  %v1406_v43 = vld [vmem:[%s1763_s1 + $0xc0] sm:$0xff]  ;;  %v1147_v44 = vld [vmem:[%s1764_s0 + $0xc] sm:$0xf] }
   0xe   :  { %385 = vmatpush.bf16.msra.mxu3 %v1254_v12  ;;  %330 = vmatpush.bf16.msra.mxu0 %v1266_v14  ;;  %v842_v42 = vor.u32 %v1149_v39, %v841_v38  ;;  %v843_v45 = vld [vmem:[%s1764_s0 + $0x18] sm:$0xf0]  ;;  %v849_v47 = vld [vmem:[%s1764_s0 + $0x20] sm:$0xf]  ;;  %v1152_v48 = vld [vmem:[%s1764_s0 + $0x2c] sm:$0xf0] }
   0xf   :  { %349 = vmatpush.bf16.msra.mxu1 %v1271_v15  ;;  %v846_v46 = vor.u32 %v1147_v44, %v843_v45  ;;  %v1150_v49 = vld [vmem:[%s1764_s0 + $0x24] sm:$0xf]  ;;  %v851_v50 = vld [vmem:[%s1764_s0 + $0x30] sm:$0xf0]  ;;  %v857_v51 = vld [vmem:[%s1764_s0 + $0x28] sm:$0xf]  ;;  %v850_v53 = vor.u32 %v1152_v48, %v849_v47 }
  0x10   :  { %368 = vmatpush.bf16.msra.mxu2 %v1283_v17  ;;  %v1153_v52 = vld [vmem:[%s1764_s0 + $0x34] sm:$0xf0]  ;;  %v854_v54 = vor.u32 %v1150_v49, %v851_v50  ;;  %v1151_v56 = vld [vmem:[%s1764_s0 + $0x2c] sm:$0xf]  ;;  %v859_v57 = vld [vmem:[%s1764_s0 + $0x38] sm:$0xf0] }
  0x11   :  { %v858_v55 = vor.u32 %v1153_v52, %v857_v51  ;;  %v862_v58 = vor.u32 %v1151_v56, %v859_v57  ;;  %v999_v59 = vld [vmem:[%s1764_s0 + $0x40] sm:$0xf]  ;;  %v1156_v60 = vld [vmem:[%s1764_s0 + $0x4c] sm:$0xf0]  ;;  %v1154_v61 = vld [vmem:[%s1764_s0 + $0x44] sm:$0xf] }
  0x12   :  { %386 = vmatpush.bf16.msra.mxu3 %v1278_v16  ;;  %331 = vmatpush.bf16.msra.mxu0 %v1290_v18  ;;  %v1001_v62 = vld [vmem:[%s1764_s0 + $0x50] sm:$0xf0]  ;;  %v1007_v63 = vld [vmem:[%s1764_s0 + $0x48] sm:$0xf]  ;;  %v1157_v3 = vld [vmem:[%s1764_s0 + $0x54] sm:$0xf0]  ;;  %v1000_v4 = vor.u32 %v1156_v60, %v999_v59 }
  0x13   :  { %350 = vmatpush.bf16.msra.mxu1 %v1295_v19  ;;  %v1004_v8 = vor.u32 %v1154_v61, %v1001_v62  ;;  %v1008_v33 = vor.u32 %v1157_v3, %v1007_v63  ;;  %v1155_v34 = vld [vmem:[%s1764_s0 + $0x4c] sm:$0xf]  ;;  %v1009_v35 = vld [vmem:[%s1764_s0 + $0x58] sm:$0xf0]  ;;  %v1015_v38 = vld [vmem:[%s1764_s0 + $0x60] sm:$0xf] }
  0x14   :  { %369 = vmatpush.bf16.msra.mxu2 %v1307_v21  ;;  %v1012_v36 = vor.u32 %v1155_v34, %v1009_v35  ;;  %v1160_v39 = vld [vmem:[%s1764_s0 + $0x6c] sm:$0xf0]  ;;  %v1161_v44 = vld [vmem:[%s1764_s0 + $0x74] sm:$0xf0]  ;;  %v1159_v48 = vld [vmem:[%s1764_s0 + $0x6c] sm:$0xf] }
  0x15   :  { %v1016_v45 = vor.u32 %v1160_v39, %v1015_v38  ;;  %v1025_v49 = vld [vmem:[%s1764_s0 + $0x78] sm:$0xf0]  ;;  %v1041_v51 = vld [vmem:[%s1764_s0 + $0x80] sm:$0xf]  ;;  %v1164_v52 = vld [vmem:[%s1764_s0 + $0x8c] sm:$0xf0] }
  0x16   :  { %387 = vmatpush.bf16.msra.mxu3 %v1302_v20  ;;  %332 = vmatpush.bf16.msra.mxu0 %v1314_v22  ;;  %v1028_v50 = vor.u32 %v1159_v48, %v1025_v49  ;;  %v1165_v56 = vld [vmem:[%s1764_s0 + $0x94] sm:$0xf0]  ;;  %v1042_v57 = vor.u32 %v1164_v52, %v1041_v51  ;;  %v1163_v60 = vld [vmem:[%s1764_s0 + $0x8c] sm:$0xf]  ;;  %v1051_v61 = vld [vmem:[%s1764_s0 + $0x98] sm:$0xf0] }
  0x17   :  { %351 = vmatpush.bf16.msra.mxu1 %v1319_v23  ;;  %v1175_v3 = vld [vmem:[%s1764_s0 + $0xec] sm:$0xf] }
  0x18   :  { %370 = vmatpush.bf16.msra.mxu2 %v1331_v25 }
  0x1a   :  { %388 = vmatpush.bf16.msra.mxu3 %v1326_v24  ;;  %333 = vmatpush.bf16.msra.mxu0 %v1338_v26 }
  0x1b   :  { %352 = vmatpush.bf16.msra.mxu1 %v1343_v27 }
  0x1c   :  { %371 = vmatpush.bf16.msra.mxu2 %v1355_v29 }
  0x1e   :  { %389 = vmatpush.bf16.msra.mxu3 %v1350_v28  ;;  %334 = vmatpush.bf16.msra.mxu0 %v1365_v31 }
  0x1f   :  { %353 = vmatpush.bf16.msra.mxu1 %v1370_v32 }
  0x20   :  { %372 = vmatpush.bf16.msra.mxu2 %v1391_v37 }
  0x21   :  { %335 = vmatmul.bf16.vlgmr.msra.gmra.mxu0 %v834_v40  ;;  %v1158_v40 = vld [vmem:[%s1764_s0 + $0x64] sm:$0xf] }
  0x22   :  { %390 = vmatpush.bf16.msra.mxu3 %v1360_v30  ;;  %460 = vmatpush.bf16.msrb.mxu0 %v1202_v0 }
  0x23   :  { %479 = vmatpush.bf16.msrb.mxu1 %v1207_v1  ;;  %373 = vmatmul.bf16.vlgmr.msra.gmra.mxu2 %v842_v42  ;;  %v1023_v42 = vld [vmem:[%s1764_s0 + $0x68] sm:$0xf] }
  0x24   :  { %354 = vmatmul.bf16.vlgmr.msra.gmra.mxu1 %v838_v41  ;;  %498 = vmatpush.bf16.msrb.mxu2 %v1212_v2  ;;  %v1017_v41 = vld [vmem:[%s1764_s0 + $0x70] sm:$0xf0]  ;;  %v1024_v47 = vor.u32 %v1161_v44, %v1023_v42 }
  0x26   :  { %391 = vmatpush.bf16.msra.mxu3 %v1406_v43  ;;  %461 = vmatpush.bf16.msrb.mxu0 %v1222_v5 }
  0x27   :  { %480 = vmatpush.bf16.msrb.mxu1 %v1227_v6 }
  0x28   :  { %499 = vmatpush.bf16.msrb.mxu2 %v1233_v7 }
  0x29   :  { %987 = vmatmul.msk.bf16.vlgmr.msra.gmra.mxu3 %vm316_vm1, %v846_v46  ;;  %v1020_v46 = vor.u32 %v1158_v40, %v1017_v41 }
  0x2a   :  { %517 = vmatpush.bf16.msrb.mxu3 %v1235_v9  ;;  %462 = vmatpush.bf16.msrb.mxu0 %v1242_v10 }
  0x2b   :  { %481 = vmatpush.bf16.msrb.mxu1 %v1247_v11 }
  0x2c   :  { %500 = vmatpush.bf16.msrb.mxu2 %v1259_v13 }
  0x2e   :  { %518 = vmatpush.bf16.msrb.mxu3 %v1254_v12  ;;  %463 = vmatpush.bf16.msrb.mxu0 %v1266_v14 }
  0x2f   :  { %482 = vmatpush.bf16.msrb.mxu1 %v1271_v15 }
  0x30   :  { %501 = vmatpush.bf16.msrb.mxu2 %v1283_v17 }
  0x31   :  { %340 = vmatmul.bf16.gmra.mxu0 %v850_v53  ;;  %v1162_v53 = vld [vmem:[%s1764_s0 + $0x84] sm:$0xf] }
  0x32   :  { %519 = vmatpush.bf16.msrb.mxu3 %v1278_v16  ;;  %464 = vmatpush.bf16.msrb.mxu0 %v1290_v18 }
  0x33   :  { %378 = vmatmul.bf16.gmra.mxu2 %v858_v55  ;;  %483 = vmatpush.bf16.msrb.mxu1 %v1295_v19  ;;  %v1049_v55 = vld [vmem:[%s1764_s0 + $0x88] sm:$0xf] }
  0x34   :  { %359 = vmatmul.bf16.gmra.mxu1 %v854_v54  ;;  %502 = vmatpush.bf16.msrb.mxu2 %v1307_v21  ;;  %v1043_v54 = vld [vmem:[%s1764_s0 + $0x90] sm:$0xf0]  ;;  %v1050_v59 = vor.u32 %v1165_v56, %v1049_v55 }
  0x36   :  { %520 = vmatpush.bf16.msrb.mxu3 %v1302_v20  ;;  %465 = vmatpush.bf16.msrb.mxu0 %v1314_v22 }
  0x37   :  { %484 = vmatpush.bf16.msrb.mxu1 %v1319_v23 }
  0x38   :  { %503 = vmatpush.bf16.msrb.mxu2 %v1331_v25 }
  0x39   :  { %988 = vmatmul.msk.bf16.gmra.mxu3 %vm316_vm1, %v862_v58  ;;  %v1046_v58 = vor.u32 %v1162_v53, %v1043_v54 }
  0x3a   :  { %521 = vmatpush.bf16.msrb.mxu3 %v1326_v24  ;;  %466 = vmatpush.bf16.msrb.mxu0 %v1338_v26 }
  0x3b   :  { %485 = vmatpush.bf16.msrb.mxu1 %v1343_v27 }
  0x3c   :  { %504 = vmatpush.bf16.msrb.mxu2 %v1355_v29 }
  0x3e   :  { %522 = vmatpush.bf16.msrb.mxu3 %v1350_v28  ;;  %467 = vmatpush.bf16.msrb.mxu0 %v1365_v31 }
  0x3f   :  { %486 = vmatpush.bf16.msrb.mxu1 %v1370_v32 }
  0x40   :  { %505 = vmatpush.bf16.msrb.mxu2 %v1391_v37 }
  0x41   :  { %468 = vmatmul.bf16.vlgmr.msrb.gmra.mxu0 %v1000_v4  ;;  %v1109_v4 = vld [vmem:[%s1764_s0 + $0xf8] sm:$0xf0] }
  0x42   :  { %523 = vmatpush.bf16.msrb.mxu3 %v1360_v30  ;;  %597 = vmatpush.bf16.msra.mxu0 %v1202_v0 }
  0x43   :  { %616 = vmatpush.bf16.msra.mxu1 %v1207_v1  ;;  %506 = vmatmul.bf16.vlgmr.msrb.gmra.mxu2 %v1008_v33  ;;  %v1690_v33 = vld [vmem:[%s1765_s2] ss:$0 sm:$0xff] }
  0x44   :  { %635 = vmatpush.bf16.msra.mxu2 %v1212_v2  ;;  %487 = vmatmul.bf16.vlgmr.msrb.gmra.mxu1 %v1004_v8  ;;  %v1112_v8 = vor.u32 %v1175_v3, %v1109_v4 }
  0x46   :  { %524 = vmatpush.bf16.msrb.mxu3 %v1406_v43  ;;  %598 = vmatpush.bf16.msra.mxu0 %v1222_v5 }
  0x47   :  { %617 = vmatpush.bf16.msra.mxu1 %v1227_v6 }
  0x48   :  { %636 = vmatpush.bf16.msra.mxu2 %v1233_v7 }
  0x49   :  { %1029 = vmatmul.msk.bf16.vlgmr.msrb.gmra.mxu3 %vm316_vm1, %v1012_v36 }
  0x4a   :  { %654 = vmatpush.bf16.msra.mxu3 %v1235_v9  ;;  %599 = vmatpush.bf16.msra.mxu0 %v1242_v10 }
  0x4b   :  { %618 = vmatpush.bf16.msra.mxu1 %v1247_v11 }
  0x4c   :  { %637 = vmatpush.bf16.msra.mxu2 %v1259_v13 }
  0x4e   :  { %655 = vmatpush.bf16.msra.mxu3 %v1254_v12  ;;  %600 = vmatpush.bf16.msra.mxu0 %v1266_v14 }
  0x4f   :  { %619 = vmatpush.bf16.msra.mxu1 %v1271_v15 }
  0x50   :  { %638 = vmatpush.bf16.msra.mxu2 %v1283_v17 }
  0x51   :  { %473 = vmatmul.bf16.gmra.mxu0 %v1016_v45 }
  0x52   :  { %656 = vmatpush.bf16.msra.mxu3 %v1278_v16  ;;  %601 = vmatpush.bf16.msra.mxu0 %v1290_v18 }
  0x53   :  { %620 = vmatpush.bf16.msra.mxu1 %v1295_v19  ;;  %511 = vmatmul.bf16.gmra.mxu2 %v1024_v47 }
  0x54   :  { %639 = vmatpush.bf16.msra.mxu2 %v1307_v21  ;;  %492 = vmatmul.bf16.gmra.mxu1 %v1020_v46 }
  0x56   :  { %657 = vmatpush.bf16.msra.mxu3 %v1302_v20  ;;  %602 = vmatpush.bf16.msra.mxu0 %v1314_v22 }
  0x57   :  { %621 = vmatpush.bf16.msra.mxu1 %v1319_v23 }
  0x58   :  { %640 = vmatpush.bf16.msra.mxu2 %v1331_v25 }
  0x59   :  { %1030 = vmatmul.msk.bf16.gmra.mxu3 %vm316_vm1, %v1028_v50 }
  0x5a   :  { %658 = vmatpush.bf16.msra.mxu3 %v1326_v24  ;;  %603 = vmatpush.bf16.msra.mxu0 %v1338_v26 }
  0x5b   :  { %622 = vmatpush.bf16.msra.mxu1 %v1343_v27 }
  0x5c   :  { %641 = vmatpush.bf16.msra.mxu2 %v1355_v29 }
  0x5e   :  { %659 = vmatpush.bf16.msra.mxu3 %v1350_v28  ;;  %604 = vmatpush.bf16.msra.mxu0 %v1365_v31 }
  0x5f   :  { %623 = vmatpush.bf16.msra.mxu1 %v1370_v32 }
  0x60   :  { %642 = vmatpush.bf16.msra.mxu2 %v1391_v37 }
  0x61   :  { %605 = vmatmul.bf16.vlgmr.msra.gmra.mxu0 %v1042_v57 }
  0x62   :  { %660 = vmatpush.bf16.msra.mxu3 %v1360_v30  ;;  %734 = vmatpush.bf16.msrb.mxu0 %v1202_v0  ;;  %v1054_v0 = vor.u32 %v1163_v60, %v1051_v61 }
  0x63   :  { %753 = vmatpush.bf16.msrb.mxu1 %v1207_v1  ;;  %643 = vmatmul.bf16.vlgmr.msra.gmra.mxu2 %v1050_v59  ;;  %v1057_v1 = vld [vmem:[%s1764_s0 + $0xa0] sm:$0xf] }
  0x64   :  { %772 = vmatpush.bf16.msrb.mxu2 %v1212_v2  ;;  %624 = vmatmul.bf16.vlgmr.msra.gmra.mxu1 %v1046_v58  ;;  %v1168_v2 = vld [vmem:[%s1764_s0 + $0xac] sm:$0xf0] }
  0x66   :  { %661 = vmatpush.bf16.msra.mxu3 %v1406_v43  ;;  %735 = vmatpush.bf16.msrb.mxu0 %v1222_v5  ;;  %v1166_v5 = vld [vmem:[%s1764_s0 + $0xa4] sm:$0xf] }
  0x67   :  { %754 = vmatpush.bf16.msrb.mxu1 %v1227_v6  ;;  %v1059_v6 = vld [vmem:[%s1764_s0 + $0xb0] sm:$0xf0] }
  0x68   :  { %773 = vmatpush.bf16.msrb.mxu2 %v1233_v7  ;;  %v1065_v7 = vld [vmem:[%s1764_s0 + $0xa8] sm:$0xf] }
  0x69   :  { %1071 = vmatmul.msk.bf16.vlgmr.msra.gmra.mxu3 %vm316_vm1, %v1054_v0 }
  0x6a   :  { %791 = vmatpush.bf16.msrb.mxu3 %v1235_v9  ;;  %736 = vmatpush.bf16.msrb.mxu0 %v1242_v10  ;;  %v1169_v9 = vld [vmem:[%s1764_s0 + $0xb4] sm:$0xf0]  ;;  %v1058_v10 = vor.u32 %v1168_v2, %v1057_v1 }
  0x6b   :  { %755 = vmatpush.bf16.msrb.mxu1 %v1247_v11  ;;  %v1062_v11 = vor.u32 %v1166_v5, %v1059_v6 }
  0x6c   :  { %774 = vmatpush.bf16.msrb.mxu2 %v1259_v13  ;;  %v1167_v13 = vld [vmem:[%s1764_s0 + $0xac] sm:$0xf] }
  0x6e   :  { %792 = vmatpush.bf16.msrb.mxu3 %v1254_v12  ;;  %737 = vmatpush.bf16.msrb.mxu0 %v1266_v14  ;;  %v1066_v12 = vor.u32 %v1169_v9, %v1065_v7  ;;  %v1067_v14 = vld [vmem:[%s1764_s0 + $0xb8] sm:$0xf0] }
  0x6f   :  { %756 = vmatpush.bf16.msrb.mxu1 %v1271_v15  ;;  %v1070_v15 = vor.u32 %v1167_v13, %v1067_v14 }
  0x70   :  { %775 = vmatpush.bf16.msrb.mxu2 %v1283_v17  ;;  %v1172_v17 = vld [vmem:[%s1764_s0 + $0xcc] sm:$0xf0] }
  0x71   :  { %610 = vmatmul.bf16.gmra.mxu0 %v1058_v10 }
  0x72   :  { %793 = vmatpush.bf16.msrb.mxu3 %v1278_v16  ;;  %738 = vmatpush.bf16.msrb.mxu0 %v1290_v18  ;;  %v1083_v16 = vld [vmem:[%s1764_s0 + $0xc0] sm:$0xf]  ;;  %v1170_v18 = vld [vmem:[%s1764_s0 + $0xc4] sm:$0xf] }
  0x73   :  { %757 = vmatpush.bf16.msrb.mxu1 %v1295_v19  ;;  %648 = vmatmul.bf16.gmra.mxu2 %v1066_v12  ;;  %v1085_v19 = vld [vmem:[%s1764_s0 + $0xd0] sm:$0xf0] }
  0x74   :  { %776 = vmatpush.bf16.msrb.mxu2 %v1307_v21  ;;  %629 = vmatmul.bf16.gmra.mxu1 %v1062_v11  ;;  %v1173_v21 = vld [vmem:[%s1764_s0 + $0xd4] sm:$0xf0] }
  0x76   :  { %794 = vmatpush.bf16.msrb.mxu3 %v1302_v20  ;;  %739 = vmatpush.bf16.msrb.mxu0 %v1314_v22  ;;  %v1091_v20 = vld [vmem:[%s1764_s0 + $0xc8] sm:$0xf]  ;;  %v1084_v22 = vor.u32 %v1172_v17, %v1083_v16 }
  0x77   :  { %758 = vmatpush.bf16.msrb.mxu1 %v1319_v23  ;;  %v1088_v23 = vor.u32 %v1170_v18, %v1085_v19 }
  0x78   :  { %777 = vmatpush.bf16.msrb.mxu2 %v1331_v25  ;;  %v1171_v25 = vld [vmem:[%s1764_s0 + $0xcc] sm:$0xf] }
  0x79   :  { %1072 = vmatmul.msk.bf16.gmra.mxu3 %vm316_vm1, %v1070_v15 }
  0x7a   :  { %795 = vmatpush.bf16.msrb.mxu3 %v1326_v24  ;;  %740 = vmatpush.bf16.msrb.mxu0 %v1338_v26  ;;  %v1092_v24 = vor.u32 %v1173_v21, %v1091_v20  ;;  %v1093_v26 = vld [vmem:[%s1764_s0 + $0xd8] sm:$0xf0] }
  0x7b   :  { %759 = vmatpush.bf16.msrb.mxu1 %v1343_v27  ;;  %v1096_v27 = vor.u32 %v1171_v25, %v1093_v26 }
  0x7c   :  { %778 = vmatpush.bf16.msrb.mxu2 %v1355_v29  ;;  %v1176_v29 = vld [vmem:[%s1764_s0 + $0xec] sm:$0xf0] }
  0x7e   :  { %796 = vmatpush.bf16.msrb.mxu3 %v1350_v28  ;;  %741 = vmatpush.bf16.msrb.mxu0 %v1365_v31  ;;  %v1099_v28 = vld [vmem:[%s1764_s0 + $0xe0] sm:$0xf]  ;;  %v1101_v31 = vld [vmem:[%s1764_s0 + $0xf0] sm:$0xf0] }
  0x7f   :  { %760 = vmatpush.bf16.msrb.mxu1 %v1370_v32  ;;  %v1107_v32 = vld [vmem:[%s1764_s0 + $0xe8] sm:$0xf] }
  0x80   :  { %779 = vmatpush.bf16.msrb.mxu2 %v1391_v37  ;;  %v1177_v37 = vld [vmem:[%s1764_s0 + $0xf4] sm:$0xf0] }
  0x81   :  { %742 = vmatmul.bf16.vlgmr.msrb.gmra.mxu0 %v1084_v22  ;;  %v1108_v63 = vor.u32 %v1177_v37, %v1107_v32 }
  0x82   :  { %797 = vmatpush.bf16.msrb.mxu3 %v1360_v30  ;;  %v1174_v30 = vld [vmem:[%s1764_s0 + $0xe4] sm:$0xf] }
  0x83   :  { %780 = vmatmul.bf16.vlgmr.msrb.gmra.mxu2 %v1092_v24  ;;  %v1104_v62 = vor.u32 %v1174_v30, %v1101_v31 }
  0x84   :  { %761 = vmatmul.bf16.vlgmr.msrb.gmra.mxu1 %v1088_v23 }
  0x86   :  { %798 = vmatpush.bf16.msrb.mxu3 %v1406_v43  ;;  %v1100_v43 = vor.u32 %v1176_v29, %v1099_v28 }
  0x89   :  { %1113 = vmatmul.msk.bf16.vlgmr.msrb.gmra.mxu3 %vm316_vm1, %v1096_v27 }
  0x91   :  { %747 = vmatmul.bf16.gmra.mxu0 %v1100_v43 }
  0x93   :  { %785 = vmatmul.bf16.gmra.mxu2 %v1108_v63 }
  0x94   :  { %766 = vmatmul.bf16.gmra.mxu1 %v1104_v62 }
  0x99   :  { %1114 = vmatmul.msk.bf16.gmra.mxu3 %vm316_vm1, %v1112_v8 }
  0x9e   :  { %v336_v34 = vpop.f32.mrf.mxu0 }
  0x9f   :  { %v337_v36 = vadd.f32 %v1690_v33, %v336_v34 }
  0xa1   :  { %v355_v35 = vpop.f32.mrf.mxu1 }
  0xa2   :  { %v356_v38 = vadd.f32 %v355_v35, %v337_v36 }
  0xa6   :  { %v374_v39 = vpop.f32.mrf.mxu2  ;;  %v338_v41 = vpop.f32.mrf.mxu0 }
  0xa7   :  { %v375_v40 = vadd.f32 %v374_v39, %v356_v38  ;;  %v339_v44 = vadd.f32 %v1690_v33, %v338_v41 }
  0xa9   :  { %v357_v42 = vpop.f32.mrf.mxu1 }
  0xaa   :  { %v358_v45 = vadd.f32 %v357_v42, %v339_v44 }
  0xac   :  { %v393_v46 = vpop.f32.mrf.mxu3 }
  0xad   :  { %v1694_v47 = vadd.f32 %v393_v46, %v375_v40 }
  0xae   :  { %v376_v48 = vpop.f32.mrf.mxu2  ;;  %v341_v50 = vpop.f32.mrf.mxu0 }
  0xaf   :  { %v377_v49 = vadd.f32 %v376_v48, %v358_v45  ;;  %v342_v52 = vadd.f32 %v1690_v33, %v341_v50 }
  0xb1   :  { %v360_v51 = vpop.f32.mrf.mxu1 }
  0xb2   :  { %v361_v53 = vadd.f32 %v360_v51, %v342_v52 }
  0xb4   :  { %v395_v54 = vpop.f32.mrf.mxu3 }
  0xb5   :  { %v1697_v55 = vadd.f32 %v395_v54, %v377_v49 }
  0xb6   :  { %v379_v56 = vpop.f32.mrf.mxu2  ;;  %v343_v58 = vpop.f32.mrf.mxu0 }
  0xb7   :  { %v380_v57 = vadd.f32 %v379_v56, %v361_v53  ;;  %v344_v60 = vadd.f32 %v1690_v33, %v343_v58 }
  0xb9   :  { %v362_v59 = vpop.f32.mrf.mxu1 }
  0xba   :  { %v363_v61 = vadd.f32 %v362_v59, %v344_v60  ;;  %v403_v59 = vmax.f32 %v1694_v47, 0.0 }
  0xbc   :  { %v398_v0 = vpop.f32.mrf.mxu3 }
  0xbd   :  { %v1700_v1 = vadd.f32 %v398_v0, %v380_v57 }
  0xbe   :  { %v381_v2 = vpop.f32.mrf.mxu2  ;;  %v469_v6 = vpop.f32.mrf.mxu0 }
  0xbf   :  { %v382_v5 = vadd.f32 %v381_v2, %v363_v61  ;;  %v470_v62 = vadd.f32 %v1690_v33, %v469_v6 }
  0xc1   :  { %v488_v7 = vpop.f32.mrf.mxu1 }
  0xc2   :  { %v489_v34 = vadd.f32 %v488_v7, %v470_v62 }
  0xc4   :  { %v400_v9 = vpop.f32.mrf.mxu3 }
  0xc5   :  { %v1702_v10 = vadd.f32 %v400_v9, %v382_v5 }
  0xc6   :  { %v507_v11 = vpop.f32.mrf.mxu2  ;;  %v471_v12 = vpop.f32.mrf.mxu0 }
  0xc7   :  { %v508_v38 = vadd.f32 %v507_v11, %v489_v34  ;;  %v472_v48 = vadd.f32 %v1690_v33, %v471_v12 }
  0xc9   :  { %v490_v13 = vpop.f32.mrf.mxu1 }
  0xca   :  { %v491_v56 = vadd.f32 %v490_v13, %v472_v48 }
  0xcc   :  { %v526_v14 = vpop.f32.mrf.mxu3 }
  0xcd   :  { %v527_v45 = vadd.f32 %v526_v14, %v508_v38 }
  0xce   :  { %v509_v15 = vpop.f32.mrf.mxu2  ;;  %v474_v16 = vpop.f32.mrf.mxu0 }
  0xcf   :  { %v536_v52 = vmax.f32 %v527_v45, 0.0  ;;  %v475_v53 = vadd.f32 %v1690_v33, %v474_v16  ;;  %v510_v61 = vadd.f32 %v509_v15, %v491_v56 }
  0xd1   :  { %v493_v17 = vpop.f32.mrf.mxu1  ;;  %v540_v6 = vmax.f32 %v403_v59, %v536_v52 }
  0xd2   :  { %v494_v7 = vadd.f32 %v493_v17, %v475_v53 }
  0xd4   :  { %v528_v18 = vpop.f32.mrf.mxu3 }
  0xd5   :  { %v529_v11 = vadd.f32 %v528_v18, %v510_v61 }
  0xd6   :  { %v512_v19 = vpop.f32.mrf.mxu2  ;;  %v1704_v20 = vpop.f32.mrf.mxu0 }
  0xd9   :  { %v1706_v21 = vpop.f32.mrf.mxu1 }
  0xdc   :  { %v1708_v22 = vpop.f32.mrf.mxu3 }
  0xde   :  { %v1710_v23 = vpop.f32.mrf.mxu2  ;;  %v606_v24 = vpop.f32.mrf.mxu0 }
  0xdf   :  { %v607_v8 = vadd.f32 %v1690_v33, %v606_v24 }
  0xe1   :  { %v625_v25 = vpop.f32.mrf.mxu1 }
  0xe2   :  { %v626_v36 = vadd.f32 %v625_v25, %v607_v8 }
  0xe4   :  { %v1712_v26 = vpop.f32.mrf.mxu3 }
  0xe6   :  { %v644_v27 = vpop.f32.mrf.mxu2  ;;  %v608_v28 = vpop.f32.mrf.mxu0 }
  0xe7   :  { %v645_v44 = vadd.f32 %v644_v27, %v626_v36  ;;  %v609_v50 = vadd.f32 %v1690_v33, %v608_v28  ;;  %v513_v28 = vadd.f32 %v512_v19, %v494_v7  ;;  %v477_v19 = vadd.f32 %v1690_v33, %v1704_v20 }
  0xe8   :  { %v405_v20 = vmax.f32 %v1700_v1, 0.0 }
  0xe9   :  { %v627_v29 = vpop.f32.mrf.mxu1  ;;  %v532_v36 = vadd.f32 %v1708_v22, %v513_v28  ;;  %v496_v48 = vadd.f32 %v1706_v21, %v477_v19 }
  0xea   :  { %v628_v0 = vadd.f32 %v627_v29, %v609_v50 }
  0xeb   :  { %v538_v22 = vmax.f32 %v532_v36, 0.0  ;;  %v515_v52 = vadd.f32 %v1710_v23, %v496_v48 }
  0xec   :  { %v663_v30 = vpop.f32.mrf.mxu3 }
  0xed   :  { %v664_v51 = vadd.f32 %v663_v30, %v645_v44  ;;  %v537_v30 = vmax.f32 %v529_v11, 0.0 }
  0xee   :  { %v646_v31 = vpop.f32.mrf.mxu2  ;;  %v611_v32 = vpop.f32.mrf.mxu0 }
  0xef   :  { %v673_v2 = vmax.f32 %v664_v51, 0.0  ;;  %v612_v5 = vadd.f32 %v1690_v33, %v611_v32  ;;  %v647_v12 = vadd.f32 %v646_v31, %v628_v0  ;;  %v404_v32 = vmax.f32 %v1697_v55, 0.0 }
  0xf1   :  { %v630_v37 = vpop.f32.mrf.mxu1  ;;  %v677_v24 = vmax.f32 %v540_v6, %v673_v2  ;;  %v541_v38 = vmax.f32 %v404_v32, %v537_v30 }
  0xf2   :  { %v631_v13 = vadd.f32 %v630_v37, %v612_v5 }
  0xf4   :  { %v665_v43 = vpop.f32.mrf.mxu3 }
  0xf5   :  { %v666_v25 = vadd.f32 %v665_v43, %v647_v12 }
  0xf6   :  { %v649_v63 = vpop.f32.mrf.mxu2  ;;  %v1715_v3 = vpop.f32.mrf.mxu0 }
  0xf7   :  { %v674_v18 = vmax.f32 %v666_v25, 0.0  ;;  %v650_v31 = vadd.f32 %v649_v63, %v631_v13  ;;  %v614_v63 = vadd.f32 %v1690_v33, %v1715_v3  ;;  %v534_v3 = vadd.f32 %v1712_v26, %v515_v52 }
  0xf8   :  { %v406_v26 = vmax.f32 %v1702_v10, 0.0 }
  0xf9   :  { %v1717_v4 = vpop.f32.mrf.mxu1  ;;  %v539_v0 = vmax.f32 %v534_v3, 0.0 }
  0xfa   :  { %v633_v53 = vadd.f32 %v1717_v4, %v614_v63 }
  0xfb   :  { %v543_v11 = vmax.f32 %v406_v26, %v539_v0 }
  0xfc   :  { %v668_v35 = vpop.f32.mrf.mxu3 }
  0xfe   :  { %v1720_v39 = vpop.f32.mrf.mxu2  ;;  %v743_v40 = vpop.f32.mrf.mxu0 }
  0xff   :  { %v744_v42 = vadd.f32 %v1690_v33, %v743_v40 }
 0x101   :  { %v762_v41 = vpop.f32.mrf.mxu1 }
 0x102   :  { %v763_v49 = vadd.f32 %v762_v41, %v744_v42  ;;  %v678_v41 = vmax.f32 %v541_v38, %v674_v18  ;;  %v669_v42 = vadd.f32 %v668_v35, %v650_v31  ;;  %v652_v35 = vadd.f32 %v1720_v39, %v633_v53 }
 0x104   :  { %v1723_v46 = vpop.f32.mrf.mxu3 }
 0x105   :  { %v671_v23 = vadd.f32 %v1723_v46, %v652_v35 }
 0x106   :  { %v781_v54 = vpop.f32.mrf.mxu2  ;;  %v745_v58 = vpop.f32.mrf.mxu0 }
 0x107   :  { %v782_v57 = vadd.f32 %v781_v54, %v763_v49  ;;  %v746_v14 = vadd.f32 %v1690_v33, %v745_v58  ;;  %v675_v54 = vmax.f32 %v669_v42, 0.0  ;;  %v676_v39 = vmax.f32 %v671_v23, 0.0 }
 0x109   :  { %v764_v60 = vpop.f32.mrf.mxu1  ;;  %v680_v46 = vmax.f32 %v543_v11, %v676_v39 }
 0x10a   :  { %v765_v15 = vadd.f32 %v764_v60, %v746_v14 }
 0x10c   :  { %v800_v9 = vpop.f32.mrf.mxu3 }
 0x10d   :  { %v801_v16 = vadd.f32 %v800_v9, %v782_v57  ;;  %v542_v57 = vmax.f32 %v405_v20, %v538_v22 }
 0x10e   :  { %v783_v47 = vpop.f32.mrf.mxu2  ;;  %v748_v62 = vpop.f32.mrf.mxu0 }
 0x10f   :  { %v810_v27 = vmax.f32 %v801_v16, 0.0  ;;  %v749_v17 = vadd.f32 %v1690_v33, %v748_v62  ;;  %v784_v34 = vadd.f32 %v783_v47, %v765_v15  ;;  %v679_v59 = vmax.f32 %v542_v57, %v675_v54 }
 0x111   :  { %v814_v29 = vmax.f32 %v677_v24, %v810_v27  ;;  %v767_v37 = vpop.f32.mrf.mxu1 }
 0x112   :  { %v768_v55 = vadd.f32 %v767_v37, %v749_v17 }
 0x113   :  { %v818_v8 = vpack.c.bf16 %v814_v29, %v814_v29 }
 0x114   :  { %v802_v43 = vpop.f32.mrf.mxu3 }
 0x115   :  { %823 = vst.msk [vmem:[%s1766_s3] sm:$0xf] %vm822_vm2, %v818_v8  ;;  %v803_v40 = vadd.f32 %v802_v43, %v784_v34 }
 0x116   :  { %v786_v45 = vpop.f32.mrf.mxu2  ;;  %v750_v51 = vpop.f32.mrf.mxu0 }
 0x117   :  { %v811_v44 = vmax.f32 %v803_v40, 0.0  ;;  %v787_v50 = vadd.f32 %v786_v45, %v768_v55  ;;  %v751_v1 = vadd.f32 %v1690_v33, %v750_v51 }
 0x119   :  { %v815_v49 = vmax.f32 %v678_v41, %v811_v44  ;;  %v769_v60 = vpop.f32.mrf.mxu1 }
 0x11a   :  { %v770_v2 = vadd.f32 %v769_v60, %v751_v1 }
 0x11b   :  { %v819_v56 = vpack.c.bf16 %v815_v49, %v815_v49 }
 0x11c   :  { %v805_v58 = vpop.f32.mrf.mxu3 }
 0x11d   :  { %824 = vst.msk [vmem:[%s1766_s3 + $0x4] sm:$0xf] %vm822_vm2, %v819_v56  ;;  %v806_v21 = vadd.f32 %v805_v58, %v787_v50 }
 0x11e   :  { %v788_v61 = vpop.f32.mrf.mxu2 }
 0x11f   :  { %v812_v4 = vmax.f32 %v806_v21, 0.0  ;;  %v789_v7 = vadd.f32 %v788_v61, %v770_v2 }
 0x121   :  { %v816_v5 = vmax.f32 %v679_v59, %v812_v4 }
 0x123   :  { %v820_v6 = vpack.c.bf16 %v816_v5, %v816_v5 }
 0x124   :  { %v807_v9 = vpop.f32.mrf.mxu3 }
 0x125   :  { %825 = vst.msk [vmem:[%s1766_s3 + $0x8] sm:$0xf] %vm822_vm2, %v820_v6  ;;  %v808_v33 = vadd.f32 %v807_v9, %v789_v7 }
 0x127   :  { %v813_v12 = vmax.f32 %v808_v33, 0.0 }
 0x129   :  { %v817_v14 = vmax.f32 %v680_v46, %v813_v12 }
 0x12b   :  { %v821_v16 = vpack.c.bf16 %v817_v14, %v817_v14 }
 0x12d   :  { %826 = vst.msk [vmem:[%s1766_s3 + $0xc] sm:$0xf] %vm822_vm2, %v821_v16 }

// kernel: cnn_forward.5
= control target key start
LH: loop header
LB: loop body
LE: loop exit
PB: predicated region body
PF: predicated region fallthrough
CT: control target
= control target key end

     0   :  { %vm1259_vm0 = vcmask 261120   ;;  %s4543_s1 = inlined_call_operand.vmem [shape: bf16[800,512], index: 1, kind: input, shape index: {}]   ;;  %s4544_s0 = inlined_call_operand.vmem [shape: bf16[8,800], index: 0, kind: input, shape index: {}]   ;;  %s4545_s2 = inlined_call_operand.vmem [shape: f32[1,512], index: 2, kind: input, shape index: {}]   ;;  %s4546_s3 = inlined_call_operand.vmem [shape: bf16[512,128], index: 3, kind: input, shape index: {}]   ;;  %s4547_s4 = inlined_call_operand.vmem [shape: f32[1,128], index: 4, kind: input, shape index: {}]   ;;  %s4548_s5 = inlined_call_operand.vmem [shape: f32[8,128], index: 5, kind: output, shape index: {}]  }
   0x1   :  { %v2077_v0 = vld [vmem:[%s4543_s1 + $0xe0] sm:$0xf]  ;;  %v2925_v1 = vld [vmem:[%s4543_s1 + $0xec] sm:$0xf0] }
   0x2   :  { %v2205_v2 = vld [vmem:[%s4543_s1 + $0x1e0] sm:$0xf]  ;;  %v2078_v3 = vor.u32 %v2925_v1, %v2077_v0  ;;  %v2957_v4 = vld [vmem:[%s4543_s1 + $0x1ec] sm:$0xf0] }
   0x3   :  { %v2333_v5 = vld [vmem:[%s4543_s1 + $0x2e0] sm:$0xf]  ;;  %v2989_v6 = vld [vmem:[%s4543_s1 + $0x2ec] sm:$0xf0]  ;;  %v2206_v7 = vor.u32 %v2957_v4, %v2205_v2 }
   0x4   :  { %v2334_v8 = vor.u32 %v2989_v6, %v2333_v5  ;;  %v2461_v9 = vld [vmem:[%s4543_s1 + $0x3e0] sm:$0xf]  ;;  %v3021_v10 = vld [vmem:[%s4543_s1 + $0x3ec] sm:$0xf0]  ;;  %1263 = vmatpush.bf16.msra.mxu0 %v2078_v3 }
   0x5   :  { %v2061_v11 = vld [vmem:[%s4543_s1 + $0xc0] sm:$0xf]  ;;  %v2462_v12 = vor.u32 %v3021_v10, %v2461_v9  ;;  %v2921_v13 = vld [vmem:[%s4543_s1 + $0xcc] sm:$0xf0]  ;;  %1276 = vmatpush.bf16.msra.mxu1 %v2206_v7 }
   0x6   :  { %v2189_v14 = vld [vmem:[%s4543_s1 + $0x1c0] sm:$0xf]  ;;  %v2953_v15 = vld [vmem:[%s4543_s1 + $0x1cc] sm:$0xf0]  ;;  %1289 = vmatpush.bf16.msra.mxu2 %v2334_v8  ;;  %v2062_v16 = vor.u32 %v2921_v13, %v2061_v11 }
   0x7   :  { %v2190_v17 = vor.u32 %v2953_v15, %v2189_v14  ;;  %v2317_v18 = vld [vmem:[%s4543_s1 + $0x2c0] sm:$0xf]  ;;  %v2985_v19 = vld [vmem:[%s4543_s1 + $0x2cc] sm:$0xf0]  ;;  %1302 = vmatpush.bf16.msra.mxu3 %v2462_v12 }
   0x8   :  { %v2445_v20 = vld [vmem:[%s4543_s1 + $0x3c0] sm:$0xf]  ;;  %v2318_v21 = vor.u32 %v2985_v19, %v2317_v18  ;;  %v3017_v22 = vld [vmem:[%s4543_s1 + $0x3cc] sm:$0xf0]  ;;  %1264 = vmatpush.bf16.msra.mxu0 %v2062_v16 }
   0x9   :  { %v2045_v23 = vld [vmem:[%s4543_s1 + $0xa0] sm:$0xf]  ;;  %v2917_v24 = vld [vmem:[%s4543_s1 + $0xac] sm:$0xf0]  ;;  %v2446_v25 = vor.u32 %v3017_v22, %v2445_v20  ;;  %1277 = vmatpush.bf16.msra.mxu1 %v2190_v17 }
   0xa   :  { %v2173_v26 = vld [vmem:[%s4543_s1 + $0x1a0] sm:$0xf]  ;;  %v2949_v27 = vld [vmem:[%s4543_s1 + $0x1ac] sm:$0xf0]  ;;  %v2046_v29 = vor.u32 %v2917_v24, %v2045_v23  ;;  %1290 = vmatpush.bf16.msra.mxu2 %v2318_v21  ;;  %v22_v24 = vld [vmem:[%s4544_s0 + $0x8] sm:$0xff] }
   0xb   :  { %v2301_v28 = vld [vmem:[%s4543_s1 + $0x2a0] sm:$0xf]  ;;  %v2981_v30 = vld [vmem:[%s4543_s1 + $0x2ac] sm:$0xf0]  ;;  %v2174_v33 = vor.u32 %v2949_v27, %v2173_v26  ;;  %1303 = vmatpush.bf16.msra.mxu3 %v2446_v25 }
   0xc   :  { %v2429_v31 = vld [vmem:[%s4543_s1 + $0x3a0] sm:$0xf]  ;;  %v3013_v32 = vld [vmem:[%s4543_s1 + $0x3ac] sm:$0xf0]  ;;  %v2302_v34 = vor.u32 %v2981_v30, %v2301_v28  ;;  %1265 = vmatpush.bf16.msra.mxu0 %v2046_v29 }
   0xd   :  { %v2029_v35 = vld [vmem:[%s4543_s1 + $0x80] sm:$0xf]  ;;  %v2913_v36 = vld [vmem:[%s4543_s1 + $0x8c] sm:$0xf0]  ;;  %v2430_v38 = vor.u32 %v3013_v32, %v2429_v31  ;;  %1278 = vmatpush.bf16.msra.mxu1 %v2174_v33 }
   0xe   :  { %v2157_v37 = vld [vmem:[%s4543_s1 + $0x180] sm:$0xf]  ;;  %v2945_v39 = vld [vmem:[%s4543_s1 + $0x18c] sm:$0xf0]  ;;  %v2030_v44 = vor.u32 %v2913_v36, %v2029_v35  ;;  %1291 = vmatpush.bf16.msra.mxu2 %v2302_v34  ;;  %v241_v36 = vunpack.c.l.b16 %v22_v24 }
   0xf   :  { %v2285_v40 = vld [vmem:[%s4543_s1 + $0x280] sm:$0xf]  ;;  %v2977_v41 = vld [vmem:[%s4543_s1 + $0x28c] sm:$0xf0]  ;;  %v2158_v45 = vor.u32 %v2945_v39, %v2157_v37  ;;  %1304 = vmatpush.bf16.msra.mxu3 %v2430_v38  ;;  %v2923_v39 = vld [vmem:[%s4543_s1 + $0xe4] sm:$0xf] }
  0x10   :  { %v2413_v42 = vld [vmem:[%s4543_s1 + $0x380] sm:$0xf]  ;;  %v3009_v43 = vld [vmem:[%s4543_s1 + $0x38c] sm:$0xf0]  ;;  %v2286_v46 = vor.u32 %v2977_v41, %v2285_v40  ;;  %1266 = vmatpush.bf16.msra.mxu0 %v2030_v44  ;;  %v2079_v40 = vld [vmem:[%s4543_s1 + $0xf0] sm:$0xf0]  ;;  %v242_v41 = vunpack.c.h.b16 %v22_v24 }
  0x11   :  { %v2013_v47 = vld [vmem:[%s4543_s1 + $0x60] sm:$0xf]  ;;  %v2909_v48 = vld [vmem:[%s4543_s1 + $0x6c] sm:$0xf0]  ;;  %v2414_v50 = vor.u32 %v3009_v43, %v2413_v42  ;;  %1279 = vmatpush.bf16.msra.mxu1 %v2158_v45  ;;  %v2175_v24 = vld [vmem:[%s4543_s1 + $0x1b0] sm:$0xf0] }
  0x12   :  { %v2141_v49 = vld [vmem:[%s4543_s1 + $0x160] sm:$0xf]  ;;  %v2941_v51 = vld [vmem:[%s4543_s1 + $0x16c] sm:$0xf0]  ;;  %v2014_v56 = vor.u32 %v2909_v48, %v2013_v47  ;;  %1292 = vmatpush.bf16.msra.mxu2 %v2286_v46 }
  0x13   :  { %v2269_v52 = vld [vmem:[%s4543_s1 + $0x260] sm:$0xf]  ;;  %v2973_v53 = vld [vmem:[%s4543_s1 + $0x26c] sm:$0xf0]  ;;  %v2142_v57 = vor.u32 %v2941_v51, %v2141_v49  ;;  %1305 = vmatpush.bf16.msra.mxu3 %v2414_v50 }
  0x14   :  { %v2397_v54 = vld [vmem:[%s4543_s1 + $0x360] sm:$0xf]  ;;  %v3005_v55 = vld [vmem:[%s4543_s1 + $0x36c] sm:$0xf0]  ;;  %v2270_v58 = vor.u32 %v2973_v53, %v2269_v52  ;;  %1267 = vmatpush.bf16.msra.mxu0 %v2014_v56  ;;  %v2082_v53 = vor.u32 %v2923_v39, %v2079_v40 }
  0x15   :  { %v1997_v59 = vld [vmem:[%s4543_s1 + $0x40] sm:$0xf]  ;;  %v2905_v60 = vld [vmem:[%s4543_s1 + $0x4c] sm:$0xf0]  ;;  %v2398_v62 = vor.u32 %v3005_v55, %v2397_v54  ;;  %1280 = vmatpush.bf16.msra.mxu1 %v2142_v57  ;;  %v3396_v54 = vpack.c.b16 %v241_v36, %v241_v36  ;;  %v2919_v57 = vld [vmem:[%s4543_s1 + $0xc4] sm:$0xf] }
  0x16   :  { %v2125_v61 = vld [vmem:[%s4543_s1 + $0x140] sm:$0xf]  ;;  %v2937_v63 = vld [vmem:[%s4543_s1 + $0x14c] sm:$0xf0]  ;;  %v1998_v4 = vor.u32 %v2905_v60, %v1997_v59  ;;  %1293 = vmatpush.bf16.msra.mxu2 %v2270_v58  ;;  %v2063_v58 = vld [vmem:[%s4543_s1 + $0xd0] sm:$0xf0] }
  0x17   :  { %v2253_v0 = vld [vmem:[%s4543_s1 + $0x240] sm:$0xf]  ;;  %v2969_v1 = vld [vmem:[%s4543_s1 + $0x24c] sm:$0xf0]  ;;  %v2126_v5 = vor.u32 %v2937_v63, %v2125_v61  ;;  %1306 = vmatpush.bf16.msra.mxu3 %v2398_v62  ;;  %v2955_v59 = vld [vmem:[%s4543_s1 + $0x1e4] sm:$0xf]  ;;  %v3418_v62 = vpack.c.b16 %v242_v41, %v242_v41 }
  0x18   :  { %v2381_v2 = vld [vmem:[%s4543_s1 + $0x340] sm:$0xf]  ;;  %v3001_v3 = vld [vmem:[%s4543_s1 + $0x34c] sm:$0xf0]  ;;  %v2254_v6 = vor.u32 %v2969_v1, %v2253_v0  ;;  %1268 = vmatpush.bf16.msra.mxu0 %v1998_v4  ;;  %v2207_v60 = vld [vmem:[%s4543_s1 + $0x1f0] sm:$0xf0] }
  0x19   :  { %v1981_v7 = vld [vmem:[%s4543_s1 + $0x20] sm:$0xf]  ;;  %v2901_v8 = vld [vmem:[%s4543_s1 + $0x2c] sm:$0xf0]  ;;  %v2382_v10 = vor.u32 %v3001_v3, %v2381_v2  ;;  %1281 = vmatpush.bf16.msra.mxu1 %v2126_v5  ;;  %v2066_v5 = vor.u32 %v2919_v57, %v2063_v58  ;;  %v2943_v36 = vld [vmem:[%s4543_s1 + $0x184] sm:$0xf] }
  0x1a   :  { %v2109_v9 = vld [vmem:[%s4543_s1 + $0x120] sm:$0xf]  ;;  %v2933_v11 = vld [vmem:[%s4543_s1 + $0x12c] sm:$0xf0]  ;;  %v1982_v16 = vor.u32 %v2901_v8, %v1981_v7  ;;  %1294 = vmatpush.bf16.msra.mxu2 %v2254_v6  ;;  %v2210_v6 = vor.u32 %v2955_v59, %v2207_v60 }
  0x1b   :  { %v2237_v12 = vld [vmem:[%s4543_s1 + $0x220] sm:$0xf]  ;;  %v2965_v13 = vld [vmem:[%s4543_s1 + $0x22c] sm:$0xf0]  ;;  %v2110_v20 = vor.u32 %v2933_v11, %v2109_v9  ;;  %1307 = vmatpush.bf16.msra.mxu3 %v2382_v10  ;;  %v2915_v9 = vld [vmem:[%s4543_s1 + $0xa4] sm:$0xf] }
  0x1c   :  { %v2365_v14 = vld [vmem:[%s4543_s1 + $0x320] sm:$0xf]  ;;  %v2997_v15 = vld [vmem:[%s4543_s1 + $0x32c] sm:$0xf0]  ;;  %v2238_v21 = vor.u32 %v2965_v13, %v2237_v12  ;;  %1269 = vmatpush.bf16.msra.mxu0 %v1982_v16  ;;  %v2047_v10 = vld [vmem:[%s4543_s1 + $0xb0] sm:$0xf0] }
  0x1d   :  { %v1965_v17 = vld [vmem:[%s4543_s1] sm:$0xf]  ;;  %v2897_v18 = vld [vmem:[%s4543_s1 + $0xc] sm:$0xf0]  ;;  %v2366_v25 = vor.u32 %v2997_v15, %v2365_v14  ;;  %1282 = vmatpush.bf16.msra.mxu1 %v2110_v20  ;;  %v2951_v11 = vld [vmem:[%s4543_s1 + $0x1c4] sm:$0xf] }
  0x1e   :  { %v2093_v19 = vld [vmem:[%s4543_s1 + $0x100] sm:$0xf]  ;;  %v2929_v22 = vld [vmem:[%s4543_s1 + $0x10c] sm:$0xf0]  ;;  %v1966_v32 = vor.u32 %v2897_v18, %v1965_v17  ;;  %1295 = vmatpush.bf16.msra.mxu2 %v2238_v21  ;;  %v2191_v12 = vld [vmem:[%s4543_s1 + $0x1d0] sm:$0xf0]  ;;  %v2050_v17 = vor.u32 %v2915_v9, %v2047_v10 }
  0x1f   :  { %v2221_v23 = vld [vmem:[%s4543_s1 + $0x200] sm:$0xf]  ;;  %v2961_v26 = vld [vmem:[%s4543_s1 + $0x20c] sm:$0xf0]  ;;  %v2094_v37 = vor.u32 %v2929_v22, %v2093_v19  ;;  %1308 = vmatpush.bf16.msra.mxu3 %v2366_v25  ;;  %v2194_v18 = vor.u32 %v2951_v11, %v2191_v12  ;;  %v2911_v21 = vld [vmem:[%s4543_s1 + $0x84] sm:$0xf] }
  0x20   :  { %v2349_v27 = vld [vmem:[%s4543_s1 + $0x300] sm:$0xf]  ;;  %v2993_v28 = vld [vmem:[%s4543_s1 + $0x30c] sm:$0xf0]  ;;  %v2222_v38 = vor.u32 %v2961_v26, %v2221_v23  ;;  %1270 = vmatpush.bf16.msra.mxu0 %v1966_v32  ;;  %v2031_v22 = vld [vmem:[%s4543_s1 + $0x90] sm:$0xf0] }
  0x21   :  { %v2589_v29 = vld [vmem:[%s4543_s1 + $0x4e0] sm:$0xf]  ;;  %v3053_v30 = vld [vmem:[%s4543_s1 + $0x4ec] sm:$0xf0]  ;;  %v2350_v42 = vor.u32 %v2993_v28, %v2349_v27  ;;  %1283 = vmatpush.bf16.msra.mxu1 %v2094_v37  ;;  %v2947_v23 = vld [vmem:[%s4543_s1 + $0x1a4] sm:$0xf] }
  0x22   :  { %v2717_v31 = vld [vmem:[%s4543_s1 + $0x5e0] sm:$0xf]  ;;  %v3085_v33 = vld [vmem:[%s4543_s1 + $0x5ec] sm:$0xf0]  ;;  %v2590_v43 = vor.u32 %v3053_v30, %v2589_v29  ;;  %1296 = vmatpush.bf16.msra.mxu2 %v2222_v38  ;;  %v24_v29 = vld [vmem:[%s4544_s0 + $0x18] sm:$0xf]  ;;  %v2034_v30 = vor.u32 %v2911_v21, %v2031_v22 }
  0x23   :  { %v2749_v34 = vld [vmem:[%s4543_s1 + $0x620] sm:$0xf]  ;;  %v3093_v35 = vld [vmem:[%s4543_s1 + $0x62c] sm:$0xf0]  ;;  %v2718_v46 = vor.u32 %v3085_v33, %v2717_v31  ;;  %1309 = vmatpush.bf16.msra.mxu3 %v2350_v42  ;;  %v2178_v31 = vor.u32 %v2947_v23, %v2175_v24  ;;  %v2159_v37 = vld [vmem:[%s4543_s1 + $0x190] sm:$0xf0]  ;;  %v245_v38 = vunpack.c.l.b16 %v24_v29 }
  0x24   :  { %v2573_v44 = vld [vmem:[%s4543_s1 + $0x4c0] sm:$0xf]  ;;  %v2750_v47 = vor.u32 %v3093_v35, %v2749_v34  ;;  %v3049_v48 = vld [vmem:[%s4543_s1 + $0x4cc] sm:$0xf0]  ;;  %1315 = vmatpush.bf16.msrb.mxu0 %v2590_v43  ;;  %v2907_v34 = vld [vmem:[%s4543_s1 + $0x64] sm:$0xf] }
  0x25   :  { %v21_v45 = vld [vmem:[%s4544_s0] sm:$0xff]  ;;  %v3081_v50 = vld [vmem:[%s4543_s1 + $0x5cc] sm:$0xf0]  ;;  %v2574_v63 = vor.u32 %v3049_v48, %v2573_v44  ;;  %1328 = vmatpush.bf16.msrb.mxu1 %v2718_v46  ;;  %1297 = vmatmul.bf16.vlgmr.msra.gmra.mxu2 %v3396_v54  ;;  %v2015_v35 = vld [vmem:[%s4543_s1 + $0x70] sm:$0xf0]  ;;  %v2162_v44 = vor.u32 %v2943_v36, %v2159_v37 }
  0x26   :  { %v2701_v49 = vld [vmem:[%s4543_s1 + $0x5c0] sm:$0xf]  ;;  %v239_v51 = vunpack.c.l.b16 %v21_v45  ;;  %v240_v52 = vunpack.c.h.b16 %v21_v45  ;;  %v3089_v56 = vld [vmem:[%s4543_s1 + $0x60c] sm:$0xf0]  ;;  %1347 = vmatpush.bf16.msrb.mxu2 %v2750_v47  ;;  %1310 = vmatmul.bf16.vlgmr.msra.gmra.mxu3 %v3418_v62  ;;  %v2018_v43 = vor.u32 %v2907_v34, %v2015_v35  ;;  %v2903_v47 = vld [vmem:[%s4543_s1 + $0x44] sm:$0xf] }
  0x27   :  { %v2733_v55 = vld [vmem:[%s4543_s1 + $0x600] sm:$0xf]  ;;  %v2702_v1 = vor.u32 %v3081_v50, %v2701_v49  ;;  %v3045_v4 = vld [vmem:[%s4543_s1 + $0x4ac] sm:$0xf0]  ;;  %1354 = vmatpush.bf16.msrb.mxu3 %v2082_v53  ;;  %v1999_v48 = vld [vmem:[%s4543_s1 + $0x50] sm:$0xf0] }
  0x28   :  { %v3416_v61 = vpack.c.b16 %v239_v51, %v239_v51  ;;  %v3420_v0 = vpack.c.b16 %v240_v52, %v240_v52  ;;  %v2734_v2 = vor.u32 %v3089_v56, %v2733_v55  ;;  %v2557_v3 = vld [vmem:[%s4543_s1 + $0x4a0] sm:$0xf]  ;;  %v3077_v8 = vld [vmem:[%s4543_s1 + $0x5ac] sm:$0xf0]  ;;  %1316 = vmatpush.bf16.msrb.mxu0 %v2574_v63  ;;  %v2939_v49 = vld [vmem:[%s4543_s1 + $0x164] sm:$0xf]  ;;  %v3525_v51 = vpack.c.b16 %v245_v38, %v245_v38 }
  0x29   :  { %v2685_v7 = vld [vmem:[%s4543_s1 + $0x5a0] sm:$0xf]  ;;  %v2558_v13 = vor.u32 %v3045_v4, %v2557_v3  ;;  %1329 = vmatpush.bf16.msrb.mxu1 %v2702_v1  ;;  %v3041_v16 = vld [vmem:[%s4543_s1 + $0x48c] sm:$0xf0]  ;;  %v2143_v50 = vld [vmem:[%s4543_s1 + $0x170] sm:$0xf0]  ;;  %v2002_v57 = vor.u32 %v2903_v47, %v1999_v48 }
  0x2a   :  { %1271 = vmatmul.bf16.vlgmr.msra.gmra.mxu0 %v3416_v61  ;;  %1284 = vmatmul.bf16.vlgmr.msra.gmra.mxu1 %v3420_v0  ;;  %v2686_v14 = vor.u32 %v3077_v8, %v2685_v7  ;;  %v2541_v15 = vld [vmem:[%s4543_s1 + $0x480] sm:$0xf]  ;;  %v3073_v20 = vld [vmem:[%s4543_s1 + $0x58c] sm:$0xf0]  ;;  %v2146_v58 = vor.u32 %v2939_v49, %v2143_v50  ;;  %v2899_v63 = vld [vmem:[%s4543_s1 + $0x24] sm:$0xf] }
  0x2b   :  { %1348 = vmatpush.bf16.msrb.mxu2 %v2734_v2  ;;  %1355 = vmatpush.bf16.msrb.mxu3 %v2066_v5  ;;  %v2669_v19 = vld [vmem:[%s4543_s1 + $0x580] sm:$0xf]  ;;  %v2542_v25 = vor.u32 %v3041_v16, %v2541_v15  ;;  %v3037_v28 = vld [vmem:[%s4543_s1 + $0x46c] sm:$0xf0]  ;;  %v1983_v1 = vld [vmem:[%s4543_s1 + $0x30] sm:$0xf0] }
  0x2c   :  { %1317 = vmatpush.bf16.msrb.mxu0 %v2558_v13  ;;  %v2670_v26 = vor.u32 %v3073_v20, %v2669_v19  ;;  %v2525_v27 = vld [vmem:[%s4543_s1 + $0x460] sm:$0xf]  ;;  %v3069_v33 = vld [vmem:[%s4543_s1 + $0x56c] sm:$0xf0]  ;;  %v2935_v2 = vld [vmem:[%s4543_s1 + $0x144] sm:$0xf]  ;;  %v1986_v12 = vor.u32 %v2899_v63, %v1983_v1 }
  0x2d   :  { %1330 = vmatpush.bf16.msrb.mxu1 %v2686_v14  ;;  %v2653_v32 = vld [vmem:[%s4543_s1 + $0x560] sm:$0xf]  ;;  %v2526_v39 = vor.u32 %v3037_v28, %v2525_v27  ;;  %v3033_v42 = vld [vmem:[%s4543_s1 + $0x44c] sm:$0xf0]  ;;  %v2127_v3 = vld [vmem:[%s4543_s1 + $0x150] sm:$0xf0] }
  0x2e   :  { %v2654_v40 = vor.u32 %v3069_v33, %v2653_v32  ;;  %v2509_v41 = vld [vmem:[%s4543_s1 + $0x440] sm:$0xf]  ;;  %v3065_v46 = vld [vmem:[%s4543_s1 + $0x54c] sm:$0xf0]  ;;  %v2895_v10 = vld [vmem:[%s4543_s1 + $0x4] sm:$0xf]  ;;  %v2130_v13 = vor.u32 %v2935_v2, %v2127_v3 }
  0x2f   :  { %1367 = vmatpush.bf16.msra.mxu2 %v2210_v6  ;;  %1356 = vmatpush.bf16.msrb.mxu3 %v2050_v17  ;;  %v2637_v45 = vld [vmem:[%s4543_s1 + $0x540] sm:$0xf]  ;;  %v2510_v52 = vor.u32 %v3033_v42, %v2509_v41  ;;  %v3029_v56 = vld [vmem:[%s4543_s1 + $0x42c] sm:$0xf0]  ;;  %v1967_v14 = vld [vmem:[%s4543_s1 + $0x10] sm:$0xf0] }
  0x30   :  { %1318 = vmatpush.bf16.msrb.mxu0 %v2542_v25  ;;  %v2638_v53 = vor.u32 %v3065_v46, %v2637_v45  ;;  %v2493_v55 = vld [vmem:[%s4543_s1 + $0x420] sm:$0xf]  ;;  %v3061_v60 = vld [vmem:[%s4543_s1 + $0x52c] sm:$0xf0]  ;;  %v2987_v15 = vld [vmem:[%s4543_s1 + $0x2e4] sm:$0xf]  ;;  %v1970_v28 = vor.u32 %v2895_v10, %v1967_v14 }
  0x31   :  { %1331 = vmatpush.bf16.msrb.mxu1 %v2670_v26  ;;  %v2621_v59 = vld [vmem:[%s4543_s1 + $0x520] sm:$0xf]  ;;  %v2494_v4 = vor.u32 %v3029_v56, %v2493_v55  ;;  %v3025_v6 = vld [vmem:[%s4543_s1 + $0x40c] sm:$0xf0]  ;;  %v2335_v16 = vld [vmem:[%s4543_s1 + $0x2f0] sm:$0xf0] }
  0x32   :  { %v2477_v5 = vld [vmem:[%s4543_s1 + $0x400] sm:$0xf]  ;;  %v2622_v8 = vor.u32 %v3061_v60, %v2621_v59  ;;  %v3057_v9 = vld [vmem:[%s4543_s1 + $0x50c] sm:$0xf0]  ;;  %v2931_v17 = vld [vmem:[%s4543_s1 + $0x124] sm:$0xf]  ;;  %v2338_v27 = vor.u32 %v2987_v15, %v2335_v16 }
  0x33   :  { %1368 = vmatpush.bf16.msra.mxu2 %v2194_v18  ;;  %1357 = vmatpush.bf16.msrb.mxu3 %v2034_v30  ;;  %v2605_v7 = vld [vmem:[%s4543_s1 + $0x500] sm:$0xf]  ;;  %v23_v11 = vld [vmem:[%s4544_s0 + $0x10] sm:$0xff]  ;;  %v3019_v19 = vld [vmem:[%s4543_s1 + $0x3e4] sm:$0xf]  ;;  %v2478_v20 = vor.u32 %v3025_v6, %v2477_v5 }
  0x34   :  { %1319 = vmatpush.bf16.msrb.mxu0 %v2526_v39  ;;  %v2111_v18 = vld [vmem:[%s4543_s1 + $0x130] sm:$0xf0]  ;;  %v3051_v22 = vld [vmem:[%s4543_s1 + $0x4e4] sm:$0xf]  ;;  %v243_v24 = vunpack.c.l.b16 %v23_v11  ;;  %v244_v25 = vunpack.c.h.b16 %v23_v11  ;;  %v2606_v26 = vor.u32 %v3057_v9, %v2605_v7 }
  0x35   :  { %1332 = vmatpush.bf16.msrb.mxu1 %v2654_v40  ;;  %2763 = vmatmul.msk.bf16.vlgmr.msrb.gmra.mxu2 %vm1259_vm0, %v3525_v51  ;;  %v2463_v21 = vld [vmem:[%s4543_s1 + $0x3f0] sm:$0xf0]  ;;  %v2114_v29 = vor.u32 %v2931_v17, %v2111_v18  ;;  %v2983_v30 = vld [vmem:[%s4543_s1 + $0x2c4] sm:$0xf] }
  0x36   :  { %v2591_v23 = vld [vmem:[%s4543_s1 + $0x4f0] sm:$0xf0]  ;;  %v2466_v32 = vor.u32 %v3019_v19, %v2463_v21  ;;  %v2927_v34 = vld [vmem:[%s4543_s1 + $0x104] sm:$0xf]  ;;  %v3613_v37 = vpack.c.b16 %v243_v24, %v243_v24  ;;  %v3615_v38 = vpack.c.b16 %v244_v25, %v244_v25 }
  0x37   :  { %1369 = vmatpush.bf16.msra.mxu2 %v2178_v31  ;;  %1358 = vmatpush.bf16.msrb.mxu3 %v2018_v43  ;;  %v2319_v31 = vld [vmem:[%s4543_s1 + $0x2d0] sm:$0xf0]  ;;  %v2594_v33 = vor.u32 %v3051_v22, %v2591_v23  ;;  %v3015_v36 = vld [vmem:[%s4543_s1 + $0x3c4] sm:$0xf] }
  0x38   :  { %1320 = vmatpush.bf16.msrb.mxu0 %v2510_v52  ;;  %v2095_v35 = vld [vmem:[%s4543_s1 + $0x110] sm:$0xf0]  ;;  %v3047_v40 = vld [vmem:[%s4543_s1 + $0x4c4] sm:$0xf]  ;;  %v2322_v42 = vor.u32 %v2983_v30, %v2319_v31 }
  0x39   :  { %1333 = vmatpush.bf16.msrb.mxu1 %v2638_v53  ;;  %v2447_v39 = vld [vmem:[%s4543_s1 + $0x3d0] sm:$0xf0]  ;;  %v3083_v43 = vld [vmem:[%s4543_s1 + $0x5e4] sm:$0xf]  ;;  %v2098_v45 = vor.u32 %v2927_v34, %v2095_v35 }
  0x3a   :  { %v2575_v41 = vld [vmem:[%s4543_s1 + $0x4d0] sm:$0xf0]  ;;  %v2979_v46 = vld [vmem:[%s4543_s1 + $0x2a4] sm:$0xf]  ;;  %v2450_v48 = vor.u32 %v3015_v36, %v2447_v39 }
  0x3b   :  { %1370 = vmatpush.bf16.msra.mxu2 %v2162_v44  ;;  %1359 = vmatpush.bf16.msrb.mxu3 %v2002_v57  ;;  %v2719_v44 = vld [vmem:[%s4543_s1 + $0x5f0] sm:$0xf0]  ;;  %v2578_v49 = vor.u32 %v3047_v40, %v2575_v41  ;;  %v3011_v50 = vld [vmem:[%s4543_s1 + $0x3a4] sm:$0xf] }
  0x3c   :  { %1321 = vmatpush.bf16.msrb.mxu0 %v2494_v4  ;;  %v2303_v47 = vld [vmem:[%s4543_s1 + $0x2b0] sm:$0xf0]  ;;  %v2722_v52 = vor.u32 %v3083_v43, %v2719_v44  ;;  %v3043_v55 = vld [vmem:[%s4543_s1 + $0x4a4] sm:$0xf] }
  0x3d   :  { %1334 = vmatpush.bf16.msrb.mxu1 %v2622_v8  ;;  %v2431_v53 = vld [vmem:[%s4543_s1 + $0x3b0] sm:$0xf0]  ;;  %v2306_v57 = vor.u32 %v2979_v46, %v2303_v47  ;;  %v2975_v60 = vld [vmem:[%s4543_s1 + $0x284] sm:$0xf] }
  0x3e   :  { %v2559_v56 = vld [vmem:[%s4543_s1 + $0x4b0] sm:$0xf0]  ;;  %v2434_v1 = vor.u32 %v3011_v50, %v2431_v53  ;;  %v3007_v3 = vld [vmem:[%s4543_s1 + $0x384] sm:$0xf] }
  0x3f   :  { %1371 = vmatpush.bf16.msra.mxu2 %v2146_v58  ;;  %1360 = vmatpush.bf16.msrb.mxu3 %v1986_v12  ;;  %v3079_v58 = vld [vmem:[%s4543_s1 + $0x5c4] sm:$0xf]  ;;  %v2703_v59 = vld [vmem:[%s4543_s1 + $0x5d0] sm:$0xf0]  ;;  %v2562_v2 = vor.u32 %v3043_v55, %v2559_v56 }
  0x40   :  { %1322 = vmatpush.bf16.msrb.mxu0 %v2478_v20  ;;  %v2287_v63 = vld [vmem:[%s4543_s1 + $0x290] sm:$0xf0]  ;;  %v2706_v4 = vor.u32 %v3079_v58, %v2703_v59  ;;  %v3039_v6 = vld [vmem:[%s4543_s1 + $0x484] sm:$0xf]  ;;  %v2990_v58 = vld [vmem:[%s4543_s1 + $0x2f4] sm:$0xf0] }
  0x41   :  { %1335 = vmatpush.bf16.msrb.mxu1 %v2606_v26  ;;  %v2415_v5 = vld [vmem:[%s4543_s1 + $0x390] sm:$0xf0]  ;;  %v2290_v8 = vor.u32 %v2975_v60, %v2287_v63  ;;  %v3075_v9 = vld [vmem:[%s4543_s1 + $0x5a4] sm:$0xf] }
  0x42   :  { %v2543_v7 = vld [vmem:[%s4543_s1 + $0x490] sm:$0xf0]  ;;  %v2971_v11 = vld [vmem:[%s4543_s1 + $0x264] sm:$0xf] }
  0x43   :  { %1372 = vmatpush.bf16.msra.mxu2 %v2130_v13  ;;  %1361 = vmatpush.bf16.msrb.mxu3 %v1970_v28  ;;  %v2687_v10 = vld [vmem:[%s4543_s1 + $0x5b0] sm:$0xf0]  ;;  %v2418_v13 = vor.u32 %v3007_v3, %v2415_v5  ;;  %v2546_v14 = vor.u32 %v3039_v6, %v2543_v7  ;;  %v3003_v15 = vld [vmem:[%s4543_s1 + $0x364] sm:$0xf]  ;;  %v2085_v6 = vld [vmem:[%s4543_s1 + $0xe8] sm:$0xf] }
  0x44   :  { %1380 = vmatpush.bf16.msra.mxu0 %v2338_v27  ;;  %1336 = vmatmul.bf16.vlgmr.msrb.gmra.mxu1 %v3615_v38  ;;  %v2271_v12 = vld [vmem:[%s4543_s1 + $0x270] sm:$0xf0]  ;;  %v2690_v16 = vor.u32 %v3075_v9, %v2687_v10  ;;  %v3035_v18 = vld [vmem:[%s4543_s1 + $0x464] sm:$0xf]  ;;  %v2926_v7 = vld [vmem:[%s4543_s1 + $0xf4] sm:$0xf0] }
  0x45   :  { %1393 = vmatpush.bf16.msra.mxu1 %v2466_v32  ;;  %1323 = vmatmul.bf16.vlgmr.msrb.gmra.mxu0 %v3613_v37  ;;  %v2399_v17 = vld [vmem:[%s4543_s1 + $0x370] sm:$0xf0]  ;;  %v2274_v20 = vor.u32 %v2971_v11, %v2271_v12  ;;  %v3071_v21 = vld [vmem:[%s4543_s1 + $0x584] sm:$0xf] }
  0x46   :  { %1362 = vmatmul.bf16.vlgmr.msrb.gmra.mxu3 %v3416_v61  ;;  %v2527_v19 = vld [vmem:[%s4543_s1 + $0x470] sm:$0xf0]  ;;  %v2967_v23 = vld [vmem:[%s4543_s1 + $0x244] sm:$0xf]  ;;  %v2402_v25 = vor.u32 %v3003_v15, %v2399_v17  ;;  %v2325_v15 = vld [vmem:[%s4543_s1 + $0x2c8] sm:$0xf]  ;;  %v2086_v17 = vor.u32 %v2926_v7, %v2085_v6 }
  0x47   :  { %1373 = vmatpush.bf16.msra.mxu2 %v2114_v29  ;;  %1406 = vmatpush.bf16.msra.mxu3 %v2594_v33  ;;  %v2671_v22 = vld [vmem:[%s4543_s1 + $0x590] sm:$0xf0]  ;;  %v2530_v26 = vor.u32 %v3035_v18, %v2527_v19  ;;  %v2999_v27 = vld [vmem:[%s4543_s1 + $0x344] sm:$0xf]  ;;  %v3010_v6 = vld [vmem:[%s4543_s1 + $0x394] sm:$0xf0] }
  0x48   :  { %1381 = vmatpush.bf16.msra.mxu0 %v2322_v42  ;;  %v2255_v24 = vld [vmem:[%s4543_s1 + $0x250] sm:$0xf0]  ;;  %v2674_v28 = vor.u32 %v3071_v21, %v2671_v22  ;;  %v3031_v30 = vld [vmem:[%s4543_s1 + $0x444] sm:$0xf]  ;;  %v2922_v21 = vld [vmem:[%s4543_s1 + $0xd4] sm:$0xf0] }
  0x49   :  { %1394 = vmatpush.bf16.msra.mxu1 %v2450_v48  ;;  %v2383_v29 = vld [vmem:[%s4543_s1 + $0x350] sm:$0xf0]  ;;  %v2258_v32 = vor.u32 %v2967_v23, %v2255_v24  ;;  %v3067_v33 = vld [vmem:[%s4543_s1 + $0x564] sm:$0xf]  ;;  %v2213_v22 = vld [vmem:[%s4543_s1 + $0x1e8] sm:$0xf] }
  0x4a   :  { %v2511_v31 = vld [vmem:[%s4543_s1 + $0x450] sm:$0xf0]  ;;  %v2963_v35 = vld [vmem:[%s4543_s1 + $0x224] sm:$0xf]  ;;  %v2386_v39 = vor.u32 %v2999_v27, %v2383_v29  ;;  %v2958_v23 = vld [vmem:[%s4543_s1 + $0x1f4] sm:$0xf0] }
  0x4b   :  { %1374 = vmatpush.bf16.msra.mxu2 %v2098_v45  ;;  %1407 = vmatpush.bf16.msra.mxu3 %v2578_v49  ;;  %v2655_v34 = vld [vmem:[%s4543_s1 + $0x570] sm:$0xf0]  ;;  %v2514_v40 = vor.u32 %v3031_v30, %v2511_v31  ;;  %v2995_v41 = vld [vmem:[%s4543_s1 + $0x324] sm:$0xf]  ;;  %v2469_v24 = vld [vmem:[%s4543_s1 + $0x3e8] sm:$0xf] }
  0x4c   :  { %1382 = vmatpush.bf16.msra.mxu0 %v2306_v57  ;;  %v2239_v36 = vld [vmem:[%s4543_s1 + $0x230] sm:$0xf0]  ;;  %v2658_v42 = vor.u32 %v3067_v33, %v2655_v34  ;;  %v3027_v44 = vld [vmem:[%s4543_s1 + $0x424] sm:$0xf]  ;;  %v2341_v57 = vld [vmem:[%s4543_s1 + $0x2e8] sm:$0xf] }
  0x4d   :  { %1395 = vmatpush.bf16.msra.mxu1 %v2434_v1  ;;  %v2367_v43 = vld [vmem:[%s4543_s1 + $0x330] sm:$0xf0]  ;;  %v2242_v46 = vor.u32 %v2963_v35, %v2239_v36  ;;  %v3063_v47 = vld [vmem:[%s4543_s1 + $0x544] sm:$0xf]  ;;  %v2309_v29 = vld [vmem:[%s4543_s1 + $0x2a8] sm:$0xf] }
  0x4e   :  { %1375 = vmatmul.bf16.vlgmr.msra.gmra.mxu2 %v3420_v0  ;;  %v2495_v45 = vld [vmem:[%s4543_s1 + $0x430] sm:$0xf0]  ;;  %v2959_v49 = vld [vmem:[%s4543_s1 + $0x204] sm:$0xf]  ;;  %v2370_v53 = vor.u32 %v2995_v41, %v2367_v43  ;;  %v2982_v30 = vld [vmem:[%s4543_s1 + $0x2b4] sm:$0xf0] }
  0x4f   :  { %1419 = vmatpush.bf16.msrb.mxu2 %v2722_v52  ;;  %1408 = vmatpush.bf16.msra.mxu3 %v2562_v2  ;;  %v2639_v48 = vld [vmem:[%s4543_s1 + $0x550] sm:$0xf0]  ;;  %v2991_v52 = vld [vmem:[%s4543_s1 + $0x304] sm:$0xf]  ;;  %v2498_v55 = vor.u32 %v3027_v44, %v2495_v45  ;;  %v2053_v33 = vld [vmem:[%s4543_s1 + $0xa8] sm:$0xf] }
  0x50   :  { %1383 = vmatpush.bf16.msra.mxu0 %v2290_v8  ;;  %v2223_v50 = vld [vmem:[%s4543_s1 + $0x210] sm:$0xf0]  ;;  %v2642_v59 = vor.u32 %v3063_v47, %v2639_v48  ;;  %v3023_v60 = vld [vmem:[%s4543_s1 + $0x404] sm:$0xf]  ;;  %v2342_v8 = vor.u32 %v2990_v58, %v2341_v57  ;;  %v2918_v35 = vld [vmem:[%s4543_s1 + $0xb4] sm:$0xf0] }
  0x51   :  { %1396 = vmatpush.bf16.msra.mxu1 %v2418_v13  ;;  %v2351_v56 = vld [vmem:[%s4543_s1 + $0x310] sm:$0xf0]  ;;  %v3059_v1 = vld [vmem:[%s4543_s1 + $0x524] sm:$0xf]  ;;  %v2226_v2 = vor.u32 %v2959_v49, %v2223_v50  ;;  %v2197_v36 = vld [vmem:[%s4543_s1 + $0x1c8] sm:$0xf]  ;;  %v2054_v45 = vor.u32 %v2918_v35, %v2053_v33 }
  0x52   :  { %v2479_v63 = vld [vmem:[%s4543_s1 + $0x410] sm:$0xf0]  ;;  %v2354_v9 = vor.u32 %v2991_v52, %v2351_v56  ;;  %v3055_v11 = vld [vmem:[%s4543_s1 + $0x504] sm:$0xf]  ;;  %v3018_v41 = vld [vmem:[%s4543_s1 + $0x3d4] sm:$0xf0] }
  0x53   :  { %1420 = vmatpush.bf16.msrb.mxu2 %v2706_v4  ;;  %1409 = vmatpush.bf16.msra.mxu3 %v2546_v14  ;;  %v2623_v3 = vld [vmem:[%s4543_s1 + $0x530] sm:$0xf0]  ;;  %v3091_v4 = vld [vmem:[%s4543_s1 + $0x624] sm:$0xf]  ;;  %v2482_v10 = vor.u32 %v3023_v60, %v2479_v63  ;;  %v2293_v43 = vld [vmem:[%s4543_s1 + $0x288] sm:$0xf] }
  0x54   :  { %1384 = vmatpush.bf16.msra.mxu0 %v2274_v20  ;;  %v2751_v5 = vld [vmem:[%s4543_s1 + $0x630] sm:$0xf0]  ;;  %v2626_v12 = vor.u32 %v3059_v1, %v2623_v3  ;;  %v3087_v18 = vld [vmem:[%s4543_s1 + $0x604] sm:$0xf]  ;;  %v2069_v20 = vld [vmem:[%s4543_s1 + $0xc8] sm:$0xf] }
  0x55   :  { %1397 = vmatpush.bf16.msra.mxu1 %v2402_v25  ;;  %v2754_v13 = vor.u32 %v3091_v4, %v2751_v5  ;;  %v2607_v14 = vld [vmem:[%s4543_s1 + $0x510] sm:$0xf0]  ;;  %v3022_v25 = vld [vmem:[%s4543_s1 + $0x3f4] sm:$0xf0]  ;;  %v2070_v31 = vor.u32 %v2922_v21, %v2069_v20  ;;  %v2037_v47 = vld [vmem:[%s4543_s1 + $0x88] sm:$0xf] }
  0x56   :  { %v2735_v19 = vld [vmem:[%s4543_s1 + $0x610] sm:$0xf0]  ;;  %v2610_v27 = vor.u32 %v3055_v11, %v2607_v14  ;;  %v2470_v34 = vor.u32 %v3022_v25, %v2469_v24  ;;  %v2978_v44 = vld [vmem:[%s4543_s1 + $0x294] sm:$0xf0]  ;;  %v2181_v50 = vld [vmem:[%s4543_s1 + $0x1a8] sm:$0xf] }
  0x57   :  { %1421 = vmatpush.bf16.msrb.mxu2 %v2690_v16  ;;  %1410 = vmatpush.bf16.msra.mxu3 %v2530_v26  ;;  %v2986_v16 = vld [vmem:[%s4543_s1 + $0x2d4] sm:$0xf0]  ;;  %v2294_v56 = vor.u32 %v2978_v44, %v2293_v43  ;;  %v2277_v57 = vld [vmem:[%s4543_s1 + $0x268] sm:$0xf] }
  0x58   :  { %1385 = vmatpush.bf16.msra.mxu0 %v2258_v32  ;;  %v2326_v26 = vor.u32 %v2986_v16, %v2325_v15  ;;  %v2214_v32 = vor.u32 %v2958_v23, %v2213_v22  ;;  %v2914_v49 = vld [vmem:[%s4543_s1 + $0x94] sm:$0xf0]  ;;  %v2021_v63 = vld [vmem:[%s4543_s1 + $0x68] sm:$0xf] }
  0x59   :  { %1398 = vmatpush.bf16.msra.mxu1 %v2386_v39  ;;  %v2954_v39 = vld [vmem:[%s4543_s1 + $0x1d4] sm:$0xf0]  ;;  %v2165_v3 = vld [vmem:[%s4543_s1 + $0x188] sm:$0xf] }
  0x5a   :  { %v2950_v52 = vld [vmem:[%s4543_s1 + $0x1b4] sm:$0xf0]  ;;  %v2421_v5 = vld [vmem:[%s4543_s1 + $0x388] sm:$0xf] }
  0x5b   :  { %1422 = vmatpush.bf16.msrb.mxu2 %v2674_v28  ;;  %1411 = vmatpush.bf16.msra.mxu3 %v2514_v40  ;;  %v2738_v28 = vor.u32 %v3087_v18, %v2735_v19  ;;  %v2453_v40 = vld [vmem:[%s4543_s1 + $0x3c8] sm:$0xf]  ;;  %v2974_v58 = vld [vmem:[%s4543_s1 + $0x274] sm:$0xf0]  ;;  %v2182_v60 = vor.u32 %v2950_v52, %v2181_v50 }
  0x5c   :  { %1386 = vmatpush.bf16.msra.mxu0 %v2242_v46  ;;  %v2198_v46 = vor.u32 %v2954_v39, %v2197_v36  ;;  %v2454_v48 = vor.u32 %v3018_v41, %v2453_v40  ;;  %v2946_v4 = vld [vmem:[%s4543_s1 + $0x194] sm:$0xf0]  ;;  %v2278_v7 = vor.u32 %v2974_v58, %v2277_v57  ;;  %v2149_v15 = vld [vmem:[%s4543_s1 + $0x168] sm:$0xf] }
  0x5d   :  { %1399 = vmatpush.bf16.msra.mxu1 %v2370_v53  ;;  %v2437_v53 = vld [vmem:[%s4543_s1 + $0x3a8] sm:$0xf]  ;;  %v2166_v11 = vor.u32 %v2946_v4, %v2165_v3  ;;  %v2906_v14 = vld [vmem:[%s4543_s1 + $0x54] sm:$0xf0]  ;;  %v2215_v3 = vld [vmem:[%s4543_s1 + $0x1f8] sm:$0xf0] }
  0x5e   :  { %v2942_v16 = vld [vmem:[%s4543_s1 + $0x174] sm:$0xf0]  ;;  %v2245_v20 = vld [vmem:[%s4543_s1 + $0x228] sm:$0xf] }
  0x5f   :  { %1423 = vmatpush.bf16.msrb.mxu2 %v2658_v42  ;;  %1412 = vmatpush.bf16.msra.mxu3 %v2498_v55  ;;  %v2310_v42 = vor.u32 %v2982_v30, %v2309_v29  ;;  %v3014_v55 = vld [vmem:[%s4543_s1 + $0x3b4] sm:$0xf0]  ;;  %v2150_v23 = vor.u32 %v2942_v16, %v2149_v15  ;;  %v1989_v24 = vld [vmem:[%s4543_s1 + $0x28] sm:$0xf]  ;;  %v2952_v15 = vld [vmem:[%s4543_s1 + $0x1cc] sm:$0xf] }
  0x60   :  { %1387 = vmatpush.bf16.msra.mxu0 %v2226_v2  ;;  %v2438_v1 = vor.u32 %v3014_v55, %v2437_v53  ;;  %v2910_v2 = vld [vmem:[%s4543_s1 + $0x74] sm:$0xf0]  ;;  %v2389_v29 = vld [vmem:[%s4543_s1 + $0x348] sm:$0xf]  ;;  %v2199_v16 = vld [vmem:[%s4543_s1 + $0x1d8] sm:$0xf0] }
  0x61   :  { %1400 = vmatpush.bf16.msra.mxu1 %v2354_v9  ;;  %v2970_v9 = vld [vmem:[%s4543_s1 + $0x254] sm:$0xf0]  ;;  %v2229_v33 = vld [vmem:[%s4543_s1 + $0x208] sm:$0xf] }
  0x62   :  { %v3006_v18 = vld [vmem:[%s4543_s1 + $0x374] sm:$0xf0]  ;;  %v2757_v40 = vld [vmem:[%s4543_s1 + $0x628] sm:$0xf] }
  0x63   :  { %1424 = vmatpush.bf16.msrb.mxu2 %v2642_v59  ;;  %1413 = vmatpush.bf16.msra.mxu3 %v2482_v10  ;;  %v2038_v59 = vor.u32 %v2914_v49, %v2037_v47  ;;  %v2022_v10 = vor.u32 %v2910_v2, %v2021_v63  ;;  %v2966_v21 = vld [vmem:[%s4543_s1 + $0x234] sm:$0xf0]  ;;  %v2117_v43 = vld [vmem:[%s4543_s1 + $0x128] sm:$0xf]  ;;  %v2956_v2 = vld [vmem:[%s4543_s1 + $0x1ec] sm:$0xf] }
  0x64   :  { %1471 = vmatpush.bf16.msrb.mxu0 %v2342_v8  ;;  %1401 = vmatmul.bf16.vlgmr.msra.gmra.mxu1 %v3418_v62  ;;  %v2261_v8 = vld [vmem:[%s4543_s1 + $0x248] sm:$0xf]  ;;  %v3002_v30 = vld [vmem:[%s4543_s1 + $0x354] sm:$0xf0] }
  0x65   :  { %1445 = vmatpush.bf16.msrb.mxu1 %v2086_v17  ;;  %1388 = vmatmul.bf16.vlgmr.msra.gmra.mxu0 %v3396_v54  ;;  %v2405_v17 = vld [vmem:[%s4543_s1 + $0x368] sm:$0xf]  ;;  %v2262_v19 = vor.u32 %v2970_v9, %v2261_v8  ;;  %v2898_v39 = vld [vmem:[%s4543_s1 + $0x14] sm:$0xf0]  ;;  %v2924_v8 = vld [vmem:[%s4543_s1 + $0xec] sm:$0xf] }
  0x66   :  { %1414 = vmatmul.bf16.vlgmr.msra.gmra.mxu3 %v3613_v37  ;;  %v2406_v25 = vor.u32 %v3006_v18, %v2405_v17  ;;  %v3094_v41 = vld [vmem:[%s4543_s1 + $0x634] sm:$0xf0]  ;;  %v2597_v47 = vld [vmem:[%s4543_s1 + $0x4e8] sm:$0xf]  ;;  %v2087_v9 = vld [vmem:[%s4543_s1 + $0xf8] sm:$0xf0] }
  0x67   :  { %1425 = vmatpush.bf16.msrb.mxu2 %v2626_v12  ;;  %1438 = vmatpush.bf16.msrb.mxu3 %v2754_v13  ;;  %v2005_v12 = vld [vmem:[%s4543_s1 + $0x48] sm:$0xf]  ;;  %v2422_v13 = vor.u32 %v3010_v6, %v2421_v5  ;;  %v2934_v44 = vld [vmem:[%s4543_s1 + $0x134] sm:$0xf0]  ;;  %v2758_v50 = vor.u32 %v3094_v41, %v2757_v40  ;;  %v2090_v18 = vor.u32 %v2924_v8, %v2087_v9  ;;  %v2944_v41 = vld [vmem:[%s4543_s1 + $0x18c] sm:$0xf] }
  0x68   :  { %1472 = vmatpush.bf16.msrb.mxu0 %v2326_v26  ;;  %v2006_v22 = vor.u32 %v2906_v14, %v2005_v12  ;;  %v2902_v26 = vld [vmem:[%s4543_s1 + $0x34] sm:$0xf0]  ;;  %v2101_v52 = vld [vmem:[%s4543_s1 + $0x108] sm:$0xf]  ;;  %v2218_v12 = vor.u32 %v2956_v2, %v2215_v3  ;;  %v2908_v2 = vld [vmem:[%s4543_s1 + $0x6c] sm:$0xf] }
  0x69   :  { %1446 = vmatpush.bf16.msrb.mxu1 %v2070_v31  ;;  %v2246_v31 = vor.u32 %v2966_v21, %v2245_v20  ;;  %v1990_v35 = vor.u32 %v2902_v26, %v1989_v24  ;;  %v2930_v53 = vld [vmem:[%s4543_s1 + $0x114] sm:$0xf0]  ;;  %v2357_v57 = vld [vmem:[%s4543_s1 + $0x308] sm:$0xf]  ;;  %v2071_v24 = vld [vmem:[%s4543_s1 + $0xd8] sm:$0xf0] }
  0x6a   :  { %v2741_v58 = vld [vmem:[%s4543_s1 + $0x608] sm:$0xf]  ;;  %v3050_v5 = vld [vmem:[%s4543_s1 + $0x4d4] sm:$0xf0]  ;;  %v2023_v3 = vld [vmem:[%s4543_s1 + $0x78] sm:$0xf0] }
  0x6b   :  { %1426 = vmatpush.bf16.msrb.mxu2 %v2610_v27  ;;  %1439 = vmatpush.bf16.msrb.mxu3 %v2738_v28  ;;  %v2133_v27 = vld [vmem:[%s4543_s1 + $0x148] sm:$0xf]  ;;  %v2938_v28 = vld [vmem:[%s4543_s1 + $0x154] sm:$0xf0]  ;;  %v2026_v9 = vor.u32 %v2908_v2, %v2023_v3  ;;  %v2311_v2 = vld [vmem:[%s4543_s1 + $0x2b8] sm:$0xf0] }
  0x6c   :  { %1473 = vmatpush.bf16.msrb.mxu0 %v2310_v42  ;;  %v2134_v36 = vor.u32 %v2938_v28, %v2133_v27  ;;  %v2390_v42 = vor.u32 %v3002_v30, %v2389_v29  ;;  %v2581_v4 = vld [vmem:[%s4543_s1 + $0x4c8] sm:$0xf]  ;;  %v3046_v20 = vld [vmem:[%s4543_s1 + $0x4b4] sm:$0xf0]  ;;  %v2948_v27 = vld [vmem:[%s4543_s1 + $0x1ac] sm:$0xf] }
  0x6d   :  { %1447 = vmatpush.bf16.msrb.mxu1 %v2054_v45  ;;  %v2373_v45 = vld [vmem:[%s4543_s1 + $0x328] sm:$0xf]  ;;  %v2582_v14 = vor.u32 %v3050_v5, %v2581_v4  ;;  %v2183_v28 = vld [vmem:[%s4543_s1 + $0x1b8] sm:$0xf0]  ;;  %v3016_v3 = vld [vmem:[%s4543_s1 + $0x3cc] sm:$0xf] }
  0x6e   :  { %1427 = vmatmul.bf16.vlgmr.msrb.gmra.mxu2 %v3615_v38  ;;  %v2725_v6 = vld [vmem:[%s4543_s1 + $0x5e8] sm:$0xf] }
  0x6f   :  { %1458 = vmatpush.bf16.msra.mxu3 %v2214_v32  ;;  %1484 = vmatpush.bf16.msra.mxu2 %v2470_v34  ;;  %v1973_v32 = vld [vmem:[%s4543_s1 + $0x8] sm:$0xf]  ;;  %v2962_v34 = vld [vmem:[%s4543_s1 + $0x214] sm:$0xf0] }
  0x70   :  { %1474 = vmatpush.bf16.msrb.mxu0 %v2294_v56  ;;  %v2230_v49 = vor.u32 %v2962_v34, %v2229_v33  ;;  %v1974_v55 = vor.u32 %v2898_v39, %v1973_v32  ;;  %v2118_v56 = vor.u32 %v2934_v44, %v2117_v43  ;;  %v2709_v21 = vld [vmem:[%s4543_s1 + $0x5c8] sm:$0xf]  ;;  %v3042_v32 = vld [vmem:[%s4543_s1 + $0x494] sm:$0xf0]  ;;  %v2186_v39 = vor.u32 %v2948_v27, %v2183_v28  ;;  %v1991_v27 = vld [vmem:[%s4543_s1 + $0x38] sm:$0xf0] }
  0x71   :  { %1448 = vmatpush.bf16.msrb.mxu1 %v2038_v59  ;;  %v3090_v59 = vld [vmem:[%s4543_s1 + $0x614] sm:$0xf0]  ;;  %v2693_v33 = vld [vmem:[%s4543_s1 + $0x5a8] sm:$0xf]  ;;  %v2988_v28 = vld [vmem:[%s4543_s1 + $0x2ec] sm:$0xf] }
  0x72   :  { %v3078_v34 = vld [vmem:[%s4543_s1 + $0x5b4] sm:$0xf0] }
  0x73   :  { %1459 = vmatpush.bf16.msra.mxu3 %v2198_v46  ;;  %1485 = vmatpush.bf16.msra.mxu2 %v2454_v48  ;;  %v2998_v46 = vld [vmem:[%s4543_s1 + $0x334] sm:$0xf0]  ;;  %v2694_v43 = vor.u32 %v3078_v34, %v2693_v33  ;;  %v2928_v33 = vld [vmem:[%s4543_s1 + $0x10c] sm:$0xf]  ;;  %v2103_v34 = vld [vmem:[%s4543_s1 + $0x118] sm:$0xf0] }
  0x74   :  { %1475 = vmatpush.bf16.msrb.mxu0 %v2278_v7  ;;  %v3054_v48 = vld [vmem:[%s4543_s1 + $0x4f4] sm:$0xf0] }
  0x75   :  { %1449 = vmatpush.bf16.msrb.mxu1 %v2022_v10  ;;  %v2598_v63 = vor.u32 %v3054_v48, %v2597_v47  ;;  %v3086_v7 = vld [vmem:[%s4543_s1 + $0x5f4] sm:$0xf0]  ;;  %v2742_v10 = vor.u32 %v3090_v59, %v2741_v58  ;;  %v2677_v47 = vld [vmem:[%s4543_s1 + $0x588] sm:$0xf] }
  0x76   :  { %2764 = vmatmul.msk.bf16.vlgmr.msrb.gmra.mxu3 %vm1259_vm0, %v3525_v51  ;;  %v2726_v17 = vor.u32 %v3086_v7, %v2725_v6  ;;  %v3074_v48 = vld [vmem:[%s4543_s1 + $0x594] sm:$0xf0]  ;;  %v2517_v59 = vld [vmem:[%s4543_s1 + $0x448] sm:$0xf]  ;;  %v2936_v6 = vld [vmem:[%s4543_s1 + $0x14c] sm:$0xf] }
  0x77   :  { %1460 = vmatpush.bf16.msra.mxu3 %v2182_v60  ;;  %1486 = vmatpush.bf16.msra.mxu2 %v2438_v1  ;;  %v2374_v60 = vor.u32 %v2998_v46, %v2373_v45  ;;  %v2994_v1 = vld [vmem:[%s4543_s1 + $0x314] sm:$0xf0]  ;;  %v2533_v45 = vld [vmem:[%s4543_s1 + $0x468] sm:$0xf]  ;;  %v2135_v7 = vld [vmem:[%s4543_s1 + $0x158] sm:$0xf0] }
  0x78   :  { %1476 = vmatpush.bf16.msrb.mxu0 %v2262_v19  ;;  %v2565_v19 = vld [vmem:[%s4543_s1 + $0x4a8] sm:$0xf]  ;;  %v3038_v46 = vld [vmem:[%s4543_s1 + $0x474] sm:$0xf0] }
  0x79   :  { %1450 = vmatpush.bf16.msrb.mxu1 %v2006_v22  ;;  %v3082_v22 = vld [vmem:[%s4543_s1 + $0x5d4] sm:$0xf0]  ;;  %v2566_v26 = vor.u32 %v3046_v20, %v2565_v19  ;;  %v2119_v19 = vld [vmem:[%s4543_s1 + $0x138] sm:$0xf0] }
  0x7a   :  { %v2710_v29 = vor.u32 %v3082_v22, %v2709_v21  ;;  %v2485_v22 = vld [vmem:[%s4543_s1 + $0x408] sm:$0xf] }
  0x7b   :  { %1461 = vmatpush.bf16.msra.mxu3 %v2166_v11  ;;  %1487 = vmatpush.bf16.msra.mxu2 %v2422_v13  ;;  %v2102_v11 = vor.u32 %v2930_v53, %v2101_v52  ;;  %v2358_v13 = vor.u32 %v2994_v1, %v2357_v57  ;;  %v2534_v53 = vor.u32 %v3038_v46, %v2533_v45  ;;  %v3070_v1 = vld [vmem:[%s4543_s1 + $0x574] sm:$0xf0]  ;;  %v2984_v45 = vld [vmem:[%s4543_s1 + $0x2cc] sm:$0xf]  ;;  %v2327_v46 = vld [vmem:[%s4543_s1 + $0x2d8] sm:$0xf0] }
  0x7c   :  { %1477 = vmatpush.bf16.msrb.mxu0 %v2246_v31  ;;  %v2549_v31 = vld [vmem:[%s4543_s1 + $0x488] sm:$0xf]  ;;  %v2678_v57 = vor.u32 %v3074_v48, %v2677_v47  ;;  %v3020_v47 = vld [vmem:[%s4543_s1 + $0x3ec] sm:$0xf]  ;;  %v2471_v48 = vld [vmem:[%s4543_s1 + $0x3f8] sm:$0xf0] }
  0x7d   :  { %1451 = vmatpush.bf16.msrb.mxu1 %v1990_v35  ;;  %v2916_v35 = vld [vmem:[%s4543_s1 + $0xac] sm:$0xf]  ;;  %v2550_v40 = vor.u32 %v3042_v32, %v2549_v31  ;;  %v2613_v32 = vld [vmem:[%s4543_s1 + $0x508] sm:$0xf] }
  0x7f   :  { %1462 = vmatpush.bf16.msra.mxu3 %v2150_v23  ;;  %1488 = vmatpush.bf16.msra.mxu2 %v2406_v25  ;;  %v2920_v23 = vld [vmem:[%s4543_s1 + $0xcc] sm:$0xf]  ;;  %v2202_v25 = vor.u32 %v2952_v15, %v2199_v16  ;;  %v2007_v15 = vld [vmem:[%s4543_s1 + $0x58] sm:$0xf0]  ;;  %v2138_v16 = vor.u32 %v2936_v6, %v2135_v7 }
  0x80   :  { %1478 = vmatpush.bf16.msrb.mxu0 %v2230_v49  ;;  %v2074_v30 = vor.u32 %v2920_v23, %v2071_v24  ;;  %v2912_v49 = vld [vmem:[%s4543_s1 + $0x8c] sm:$0xf]  ;;  %v3026_v23 = vld [vmem:[%s4543_s1 + $0x414] sm:$0xf0]  ;;  %v2629_v24 = vld [vmem:[%s4543_s1 + $0x528] sm:$0xf] }
  0x81   :  { %1452 = vmatpush.bf16.msrb.mxu1 %v1974_v55  ;;  %v2940_v55 = vld [vmem:[%s4543_s1 + $0x16c] sm:$0xf]  ;;  %v2486_v31 = vor.u32 %v3026_v23, %v2485_v22  ;;  %v2583_v6 = vld [vmem:[%s4543_s1 + $0x4d8] sm:$0xf0] }
  0x82   :  { %v2972_v23 = vld [vmem:[%s4543_s1 + $0x26c] sm:$0xf] }
  0x83   :  { %1463 = vmatpush.bf16.msra.mxu3 %v2134_v36  ;;  %1489 = vmatpush.bf16.msra.mxu2 %v2390_v42  ;;  %v2055_v36 = vld [vmem:[%s4543_s1 + $0xb8] sm:$0xf0] }
  0x84   :  { %1529 = vmatpush.bf16.msra.mxu0 %v2758_v50  ;;  %1453 = vmatmul.bf16.vlgmr.msrb.gmra.mxu1 %v3416_v61  ;;  %v2167_v42 = vld [vmem:[%s4543_s1 + $0x198] sm:$0xf0]  ;;  %v2058_v44 = vor.u32 %v2916_v35, %v2055_v36 }
  0x85   :  { %1497 = vmatpush.bf16.msra.mxu1 %v2598_v63  ;;  %1479 = vmatmul.bf16.vlgmr.msrb.gmra.mxu0 %v3396_v54  ;;  %v2039_v50 = vld [vmem:[%s4543_s1 + $0x98] sm:$0xf0]  ;;  %v2170_v52 = vor.u32 %v2944_v41, %v2167_v42  ;;  %v2661_v63 = vld [vmem:[%s4543_s1 + $0x568] sm:$0xf] }
  0x86   :  { %v2042_v58 = vor.u32 %v2912_v49, %v2039_v50  ;;  %v2662_v8 = vor.u32 %v3070_v1, %v2661_v63  ;;  %v2727_v41 = vld [vmem:[%s4543_s1 + $0x5f8] sm:$0xf0]  ;;  %v2106_v49 = vor.u32 %v2928_v33, %v2103_v34  ;;  %v3052_v50 = vld [vmem:[%s4543_s1 + $0x4ec] sm:$0xf] }
  0x87   :  { %1464 = vmatpush.bf16.msra.mxu3 %v2118_v56  ;;  %1490 = vmatpush.bf16.msra.mxu2 %v2374_v60  ;;  %v2151_v56 = vld [vmem:[%s4543_s1 + $0x178] sm:$0xf0]  ;;  %v3034_v60 = vld [vmem:[%s4543_s1 + $0x454] sm:$0xf0]  ;;  %v2980_v63 = vld [vmem:[%s4543_s1 + $0x2ac] sm:$0xf] }
  0x88   :  { %1530 = vmatpush.bf16.msra.mxu0 %v2742_v10  ;;  %v2154_v4 = vor.u32 %v2940_v55, %v2151_v56  ;;  %v2518_v5 = vor.u32 %v3034_v60, %v2517_v59  ;;  %v2501_v10 = vld [vmem:[%s4543_s1 + $0x428] sm:$0xf]  ;;  %v2330_v59 = vor.u32 %v2984_v45, %v2327_v46  ;;  %v2474_v60 = vor.u32 %v3020_v47, %v2471_v48  ;;  %v2663_v33 = vld [vmem:[%s4543_s1 + $0x578] sm:$0xf0]  ;;  %v3064_v48 = vld [vmem:[%s4543_s1 + $0x54c] sm:$0xf] }
  0x89   :  { %1498 = vmatpush.bf16.msra.mxu1 %v2582_v14  ;;  %v2904_v14 = vld [vmem:[%s4543_s1 + $0x4c] sm:$0xf]  ;;  %v2535_v45 = vld [vmem:[%s4543_s1 + $0x478] sm:$0xf0] }
  0x8a   :  { %v2010_v21 = vor.u32 %v2904_v14, %v2007_v15  ;;  %v2295_v14 = vld [vmem:[%s4543_s1 + $0x298] sm:$0xf0]  ;;  %v3012_v15 = vld [vmem:[%s4543_s1 + $0x3ac] sm:$0xf] }
  0x8b   :  { %1465 = vmatpush.bf16.msra.mxu3 %v2102_v11  ;;  %1491 = vmatpush.bf16.msra.mxu2 %v2358_v13  ;;  %v3030_v11 = vld [vmem:[%s4543_s1 + $0x434] sm:$0xf0] }
  0x8c   :  { %1549 = vmatpush.bf16.msrb.mxu0 %v2218_v12  ;;  %v2645_v12 = vld [vmem:[%s4543_s1 + $0x548] sm:$0xf]  ;;  %v3066_v13 = vld [vmem:[%s4543_s1 + $0x554] sm:$0xf0] }
  0x8d   :  { %1499 = vmatpush.bf16.msra.mxu1 %v2566_v26  ;;  %v2646_v20 = vor.u32 %v3066_v13, %v2645_v12  ;;  %v2900_v26 = vld [vmem:[%s4543_s1 + $0x2c] sm:$0xf] }
  0x8e   :  { %1466 = vmatmul.bf16.vlgmr.msra.gmra.mxu3 %v3420_v0  ;;  %1492 = vmatmul.bf16.vlgmr.msra.gmra.mxu2 %v3418_v62  ;;  %v1994_v36 = vor.u32 %v2900_v26, %v1991_v27  ;;  %v2976_v12 = vld [vmem:[%s4543_s1 + $0x28c] sm:$0xf]  ;;  %v2423_v27 = vld [vmem:[%s4543_s1 + $0x398] sm:$0xf0] }
  0x8f   :  { %1510 = vmatpush.bf16.msrb.mxu3 %v2726_v17  ;;  %1536 = vmatpush.bf16.msrb.mxu2 %v2090_v18  ;;  %v2502_v17 = vor.u32 %v3030_v11, %v2501_v10  ;;  %v2932_v18 = vld [vmem:[%s4543_s1 + $0x12c] sm:$0xf]  ;;  %v2314_v10 = vor.u32 %v2980_v63, %v2311_v2 }
  0x90   :  { %1550 = vmatpush.bf16.msrb.mxu0 %v2202_v25  ;;  %v3062_v25 = vld [vmem:[%s4543_s1 + $0x534] sm:$0xf0]  ;;  %v3008_v26 = vld [vmem:[%s4543_s1 + $0x38c] sm:$0xf] }
  0x91   :  { %1500 = vmatpush.bf16.msra.mxu1 %v2550_v40  ;;  %v2630_v35 = vor.u32 %v3062_v25, %v2629_v24  ;;  %v3084_v40 = vld [vmem:[%s4543_s1 + $0x5ec] sm:$0xf]  ;;  %v2279_v25 = vld [vmem:[%s4543_s1 + $0x278] sm:$0xf0] }
  0x92   :  { %v2282_v34 = vor.u32 %v2972_v23, %v2279_v25  ;;  %v3032_v63 = vld [vmem:[%s4543_s1 + $0x44c] sm:$0xf] }
  0x93   :  { %1511 = vmatpush.bf16.msrb.mxu3 %v2710_v29  ;;  %1537 = vmatpush.bf16.msrb.mxu2 %v2074_v30  ;;  %v2343_v29 = vld [vmem:[%s4543_s1 + $0x2f8] sm:$0xf0]  ;;  %v2122_v30 = vor.u32 %v2932_v18, %v2119_v19  ;;  %v2992_v25 = vld [vmem:[%s4543_s1 + $0x30c] sm:$0xf] }
  0x94   :  { %1551 = vmatpush.bf16.msrb.mxu0 %v2186_v39  ;;  %v3058_v39 = vld [vmem:[%s4543_s1 + $0x514] sm:$0xf0]  ;;  %v2346_v42 = vor.u32 %v2988_v28, %v2343_v29  ;;  %v2567_v18 = vld [vmem:[%s4543_s1 + $0x4b8] sm:$0xf0]  ;;  %v3040_v29 = vld [vmem:[%s4543_s1 + $0x48c] sm:$0xf] }
  0x95   :  { %1501 = vmatpush.bf16.msra.mxu1 %v2534_v53  ;;  %2765 = vmatmul.msk.bf16.vlgmr.msra.gmra.mxu0 %vm1259_vm0, %v3525_v51  ;;  %v2730_v53 = vor.u32 %v3084_v40, %v2727_v41  ;;  %v2614_v55 = vor.u32 %v3058_v39, %v2613_v32  ;;  %v3068_v32 = vld [vmem:[%s4543_s1 + $0x56c] sm:$0xf]  ;;  %v2263_v41 = vld [vmem:[%s4543_s1 + $0x258] sm:$0xf0] }
  0x96   :  { %v2666_v46 = vor.u32 %v3068_v32, %v2663_v33  ;;  %v2743_v32 = vld [vmem:[%s4543_s1 + $0x618] sm:$0xf0] }
  0x97   :  { %1512 = vmatpush.bf16.msrb.mxu3 %v2694_v43  ;;  %1538 = vmatpush.bf16.msrb.mxu2 %v2058_v44  ;;  %v2896_v43 = vld [vmem:[%s4543_s1 + $0xc] sm:$0xf]  ;;  %v1975_v44 = vld [vmem:[%s4543_s1 + $0x18] sm:$0xf0] }
  0x98   :  { %1552 = vmatpush.bf16.msrb.mxu0 %v2170_v52  ;;  %v2599_v52 = vld [vmem:[%s4543_s1 + $0x4f8] sm:$0xf0]  ;;  %v1978_v56 = vor.u32 %v2896_v43, %v1975_v44  ;;  %v3036_v44 = vld [vmem:[%s4543_s1 + $0x46c] sm:$0xf] }
  0x99   :  { %1502 = vmatpush.bf16.msra.mxu1 %v2518_v5  ;;  %v2602_v1 = vor.u32 %v3052_v50, %v2599_v52  ;;  %v3048_v5 = vld [vmem:[%s4543_s1 + $0x4cc] sm:$0xf]  ;;  %v2407_v43 = vld [vmem:[%s4543_s1 + $0x378] sm:$0xf0] }
  0x9a   :  { %v2586_v13 = vor.u32 %v3048_v5, %v2583_v6 }
  0x9b   :  { %1513 = vmatpush.bf16.msrb.mxu3 %v2678_v57  ;;  %1539 = vmatpush.bf16.msrb.mxu2 %v2042_v58  ;;  %v3080_v57 = vld [vmem:[%s4543_s1 + $0x5cc] sm:$0xf]  ;;  %v2711_v58 = vld [vmem:[%s4543_s1 + $0x5d8] sm:$0xf0] }
  0x9c   :  { %1553 = vmatpush.bf16.msrb.mxu0 %v2154_v4  ;;  %v2455_v4 = vld [vmem:[%s4543_s1 + $0x3d8] sm:$0xf0]  ;;  %v2714_v7 = vor.u32 %v3080_v57, %v2711_v58  ;;  %v3000_v58 = vld [vmem:[%s4543_s1 + $0x34c] sm:$0xf] }
  0x9d   :  { %1503 = vmatpush.bf16.msra.mxu1 %v2502_v17  ;;  %v2458_v11 = vor.u32 %v3016_v3, %v2455_v4  ;;  %v3044_v17 = vld [vmem:[%s4543_s1 + $0x4ac] sm:$0xf]  ;;  %v2247_v57 = vld [vmem:[%s4543_s1 + $0x238] sm:$0xf0] }
  0x9e   :  { %v3060_v3 = vld [vmem:[%s4543_s1 + $0x52c] sm:$0xf]  ;;  %v2631_v4 = vld [vmem:[%s4543_s1 + $0x538] sm:$0xf0] }
  0x9f   :  { %1514 = vmatpush.bf16.msrb.mxu3 %v2662_v8  ;;  %1540 = vmatpush.bf16.msrb.mxu2 %v2026_v9  ;;  %v3076_v8 = vld [vmem:[%s4543_s1 + $0x5ac] sm:$0xf]  ;;  %v2695_v9 = vld [vmem:[%s4543_s1 + $0x5b8] sm:$0xf0] }
  0xa0   :  { %1554 = vmatpush.bf16.msrb.mxu0 %v2138_v16  ;;  %v2439_v16 = vld [vmem:[%s4543_s1 + $0x3b8] sm:$0xf0]  ;;  %v2698_v19 = vor.u32 %v3076_v8, %v2695_v9 }
  0xa1   :  { %1504 = vmatpush.bf16.msra.mxu1 %v2486_v31  ;;  %v2442_v22 = vor.u32 %v3012_v15, %v2439_v16  ;;  %v2231_v8 = vld [vmem:[%s4543_s1 + $0x218] sm:$0xf0]  ;;  %v2634_v15 = vor.u32 %v3060_v3, %v2631_v4  ;;  %v3092_v16 = vld [vmem:[%s4543_s1 + $0x62c] sm:$0xf]  ;;  %v3095_v3 = vld [vmem:[%s4546_s3] sm:$0xff] }
  0xa2   :  { %v3104_v4 = vld [vmem:[%s4546_s3 + $0x48] sm:$0xff] }
  0xa3   :  { %1515 = vmatpush.bf16.msrb.mxu3 %v2646_v20  ;;  %1541 = vmatpush.bf16.msrb.mxu2 %v2010_v21  ;;  %v3072_v20 = vld [vmem:[%s4543_s1 + $0x58c] sm:$0xf]  ;;  %v2298_v21 = vor.u32 %v2976_v12, %v2295_v14  ;;  %v2375_v12 = vld [vmem:[%s4543_s1 + $0x338] sm:$0xf0] }
  0xa4   :  { %1555 = vmatpush.bf16.msrb.mxu0 %v2122_v30  ;;  %1505 = vmatmul.bf16.vlgmr.msra.gmra.mxu1 %v3613_v37  ;;  %v2551_v30 = vld [vmem:[%s4543_s1 + $0x498] sm:$0xf0] }
  0xa5   :  { %1562 = vmatpush.bf16.msrb.mxu1 %v2346_v42  ;;  %v2554_v40 = vor.u32 %v3040_v29, %v2551_v30  ;;  %v3004_v42 = vld [vmem:[%s4543_s1 + $0x36c] sm:$0xf]  ;;  %v2503_v14 = vld [vmem:[%s4543_s1 + $0x438] sm:$0xf0] }
  0xa6   :  { %v2410_v52 = vor.u32 %v3004_v42, %v2407_v43  ;;  %v2487_v29 = vld [vmem:[%s4543_s1 + $0x418] sm:$0xf0] }
  0xa7   :  { %1516 = vmatpush.bf16.msrb.mxu3 %v2630_v35  ;;  %1542 = vmatpush.bf16.msrb.mxu2 %v1994_v36  ;;  %v4297_v24 = vpop.f32.mrf.mxu0  ;;  %v4308_v28 = vpop.f32.mrf.mxu1  ;;  %v2426_v35 = vor.u32 %v3008_v26, %v2423_v27  ;;  %v2968_v36 = vld [vmem:[%s4543_s1 + $0x24c] sm:$0xf]  ;;  %v2359_v26 = vld [vmem:[%s4543_s1 + $0x318] sm:$0xf0] }
  0xa8   :  { %1556 = vmatpush.bf16.msrb.mxu0 %v2106_v49  ;;  %v4325_v39 = vpop.f32.mrf.mxu2  ;;  %v2647_v49 = vld [vmem:[%s4543_s1 + $0x558] sm:$0xf0]  ;;  %v2266_v50 = vor.u32 %v2968_v36, %v2263_v41  ;;  %v3024_v27 = vld [vmem:[%s4543_s1 + $0x40c] sm:$0xf] }
  0xa9   :  { %1563 = vmatpush.bf16.msrb.mxu1 %v2330_v59  ;;  %v4342_v47 = vpop.f32.mrf.mxu3  ;;  %v2391_v59 = vld [vmem:[%s4543_s1 + $0x358] sm:$0xf0]  ;;  %v2650_v2 = vor.u32 %v3064_v48, %v2647_v49  ;;  %v3109_v48 = vld [vmem:[%s4546_s3 + $0x70] sm:$0xff] }
  0xaa   :  { %v2394_v6 = vor.u32 %v3000_v58, %v2391_v59  ;;  %v3102_v36 = vld [vmem:[%s4546_s3 + $0x38] sm:$0xff] }
  0xab   :  { %1517 = vmatpush.bf16.msrb.mxu3 %v2614_v55  ;;  %1543 = vmatpush.bf16.msrb.mxu2 %v1978_v56  ;;  %v2538_v56 = vor.u32 %v3036_v44, %v2535_v45  ;;  %v3110_v43 = vld [vmem:[%s4546_s3 + $0x78] sm:$0xff]  ;;  %v3101_v44 = vld [vmem:[%s4546_s3 + $0x30] sm:$0xff] }
  0xac   :  { %1601 = vmatpush.bf16.msra.mxu0 %v2730_v53  ;;  %v2964_v53 = vld [vmem:[%s4543_s1 + $0x22c] sm:$0xf]  ;;  %v3106_v58 = vld [vmem:[%s4546_s3 + $0x58] sm:$0xff] }
  0xad   :  { %1557 = vmatmul.bf16.vlgmr.msrb.gmra.mxu0 %v3420_v0  ;;  %v2679_v0 = vld [vmem:[%s4543_s1 + $0x598] sm:$0xf0]  ;;  %1564 = vmatpush.bf16.msrb.mxu1 %v2314_v10  ;;  %v2250_v5 = vor.u32 %v2964_v53, %v2247_v57 }
  0xae   :  { %1518 = vmatmul.bf16.vlgmr.msrb.gmra.mxu3 %v3615_v38  ;;  %1544 = vmatmul.bf16.vlgmr.msrb.gmra.mxu2 %v3416_v61  ;;  %v2570_v61 = vor.u32 %v3044_v17, %v2567_v18  ;;  %v2682_v31 = vor.u32 %v3072_v20, %v2679_v0  ;;  %v2759_v17 = vld [vmem:[%s4543_s1 + $0x638] sm:$0xf0] }
  0xaf   :  { %1575 = vmatpush.bf16.msra.mxu3 %v2474_v60  ;;  %1588 = vmatpush.bf16.msra.mxu2 %v2602_v1  ;;  %v1274_v55 = vpop.f32.mrf.mxu0  ;;  %v1287_v60 = vpop.f32.mrf.mxu1  ;;  %v2519_v1 = vld [vmem:[%s4543_s1 + $0x458] sm:$0xf0] }
  0xb0   :  { %1602 = vmatpush.bf16.msra.mxu0 %v2714_v7  ;;  %v2960_v7 = vld [vmem:[%s4543_s1 + $0x20c] sm:$0xf]  ;;  %v1300_v9 = vpop.f32.mrf.mxu2  ;;  %v2522_v10 = vor.u32 %v3032_v63, %v2519_v1  ;;  %v2615_v20 = vld [vmem:[%s4543_s1 + $0x518] sm:$0xf0]  ;;  %v3105_v63 = vld [vmem:[%s4546_s3 + $0x50] sm:$0xff] }
  0xb1   :  { %1565 = vmatpush.bf16.msrb.mxu1 %v2298_v21  ;;  %v1313_v18 = vpop.f32.mrf.mxu3  ;;  %v2234_v0 = vor.u32 %v2960_v7, %v2231_v8 }
  0xb2   :  { %v3118_v18 = vld [vmem:[%s4546_s3 + $0xb8] sm:$0xff] }
  0xb3   :  { %1576 = vmatpush.bf16.msra.mxu3 %v2458_v11  ;;  %1589 = vmatpush.bf16.msra.mxu2 %v2586_v13  ;;  %v2996_v11 = vld [vmem:[%s4543_s1 + $0x32c] sm:$0xf] }
  0xb4   :  { %1603 = vmatpush.bf16.msra.mxu0 %v2698_v19  ;;  %v3028_v13 = vld [vmem:[%s4543_s1 + $0x42c] sm:$0xf]  ;;  %v2378_v21 = vor.u32 %v2996_v11, %v2375_v12 }
  0xb5   :  { %1566 = vmatpush.bf16.msrb.mxu1 %v2282_v34  ;;  %v3056_v19 = vld [vmem:[%s4543_s1 + $0x50c] sm:$0xf]  ;;  %v2506_v23 = vor.u32 %v3028_v13, %v2503_v14  ;;  %v2362_v34 = vor.u32 %v2992_v25, %v2359_v26 }
  0xb6   :  { %v2618_v30 = vor.u32 %v3056_v19, %v2615_v20  ;;  %v3117_v20 = vld [vmem:[%s4546_s3 + $0xb0] sm:$0xff] }
  0xb7   :  { %1577 = vmatpush.bf16.msra.mxu3 %v2442_v22  ;;  %1590 = vmatpush.bf16.msra.mxu2 %v2570_v61  ;;  %v4407_v22 = vld [vmem:[%s4545_s2] sm:$0xf]  ;;  %v2762_v61 = vor.u32 %v3092_v16, %v2759_v17 }
  0xb8   :  { %1604 = vmatpush.bf16.msra.mxu0 %v2682_v31  ;;  %v3088_v31 = vld [vmem:[%s4543_s1 + $0x60c] sm:$0xf]  ;;  %v227_v33 = vperm.slane %v4407_v22, 0  ;;  %v1350_v41 = vpop.f32.mrf.mxu2 }
  0xb9   :  { %1567 = vmatpush.bf16.msrb.mxu1 %v2266_v50 }
  0xba   :  { %v1273_v42 = vadd.f32 %v4297_v24, %v227_v33  ;;  %v3114_v33 = vld [vmem:[%s4546_s3 + $0x98] sm:$0xff] }
  0xbb   :  { %1578 = vmatpush.bf16.msra.mxu3 %v2426_v35  ;;  %1591 = vmatpush.bf16.msra.mxu2 %v2554_v40  ;;  %v2490_v35 = vor.u32 %v3024_v27, %v2487_v29  ;;  %v2746_v40 = vor.u32 %v3088_v31, %v2743_v32  ;;  %v3115_v31 = vld [vmem:[%s4546_s3 + $0xa0] sm:$0xff] }
  0xbc   :  { %1605 = vmatpush.bf16.msra.mxu0 %v2666_v46  ;;  %v3100_v46 = vld [vmem:[%s4546_s3 + $0x28] sm:$0xff] }
  0xbd   :  { %1568 = vmatpush.bf16.msrb.mxu1 %v2250_v5 }
  0xbf   :  { %1579 = vmatpush.bf16.msra.mxu3 %v2410_v52  ;;  %1592 = vmatpush.bf16.msra.mxu2 %v2538_v56  ;;  %v3107_v52 = vld [vmem:[%s4546_s3 + $0x60] sm:$0xff] }
  0xc0   :  { %1606 = vmatpush.bf16.msra.mxu0 %v2650_v2 }
  0xc1   :  { %1569 = vmatpush.bf16.msrb.mxu1 %v2234_v0  ;;  %v1337_v45 = vpop.f32.mrf.mxu1 }
  0xc2   :  { %v1324_v24 = vpop.f32.mrf.mxu0 }
  0xc3   :  { %1580 = vmatpush.bf16.msra.mxu3 %v2394_v6  ;;  %1593 = vmatpush.bf16.msra.mxu2 %v2522_v10  ;;  %v3103_v6 = vld [vmem:[%s4546_s3 + $0x40] sm:$0xff]  ;;  %v228_v10 = vperm.slane %v4407_v22, 1 }
  0xc4   :  { %1607 = vmatpush.bf16.msra.mxu0 %v2634_v15  ;;  %1570 = vmatmul.bf16.vlgmr.msrb.gmra.mxu1 %v3396_v54  ;;  %v1286_v54 = vadd.f32 %v4308_v28, %v1273_v42  ;;  %v3108_v28 = vld [vmem:[%s4546_s3 + $0x68] sm:$0xff] }
  0xc5   :  { %1620 = vmatpush.bf16.msra.mxu1 %v2762_v61  ;;  %v3116_v61 = vld [vmem:[%s4546_s3 + $0xa8] sm:$0xff] }
  0xc6   :  { %v3112_v42 = vld [vmem:[%s4546_s3 + $0x88] sm:$0xff] }
  0xc7   :  { %1581 = vmatpush.bf16.msra.mxu3 %v2378_v21  ;;  %1594 = vmatpush.bf16.msra.mxu2 %v2506_v23 }
  0xc8   :  { %1608 = vmatpush.bf16.msra.mxu0 %v2618_v30 }
  0xc9   :  { %1621 = vmatpush.bf16.msra.mxu1 %v2746_v40  ;;  %v1363_v50 = vpop.f32.mrf.mxu3  ;;  %v1339_v55 = vpop.f32.mrf.mxu1 }
  0xca   :  { %v1326_v53 = vpop.f32.mrf.mxu0  ;;  %v1364_v12 = vadd.f32 %v1363_v50, %v228_v10  ;;  %v3123_v50 = vld [vmem:[%s4546_s3 + $0xe0] sm:$0xff] }
  0xcb   :  { %1582 = vmatpush.bf16.msra.mxu3 %v2362_v34  ;;  %1595 = vmatpush.bf16.msra.mxu2 %v2490_v35 }
  0xcc   :  { %1609 = vmatmul.bf16.vlgmr.msra.gmra.mxu0 %v3615_v38  ;;  %v1352_v38 = vpop.f32.mrf.mxu2 }
  0xcd   :  { %1908 = vmatpush.bf16.msrb.mxu1 %v3110_v43  ;;  %v3125_v38 = vld [vmem:[%s4546_s3 + $0xf0] sm:$0xff] }
  0xce   :  { %1583 = vmatmul.bf16.vlgmr.msra.gmra.mxu3 %v3418_v62  ;;  %1596 = vmatmul.bf16.vlgmr.msra.gmra.mxu2 %v3613_v37  ;;  %v1299_v62 = vadd.f32 %v4325_v39, %v1286_v54  ;;  %v3099_v37 = vld [vmem:[%s4546_s3 + $0x20] sm:$0xff]  ;;  %v3098_v39 = vld [vmem:[%s4546_s3 + $0x18] sm:$0xff] }
  0xcf   :  { %1895 = vmatpush.bf16.msrb.mxu3 %v3102_v36  ;;  %1921 = vmatpush.bf16.msrb.mxu2 %v3118_v18  ;;  %v3113_v36 = vld [vmem:[%s4546_s3 + $0x90] sm:$0xff]  ;;  %v3111_v54 = vld [vmem:[%s4546_s3 + $0x80] sm:$0xff] }
  0xd0   :  { %v1312_v49 = vadd.f32 %v4342_v47, %v1299_v62  ;;  %v3097_v47 = vld [vmem:[%s4546_s3 + $0x10] sm:$0xff]  ;;  %v229_v62 = vperm.slane %v4407_v22, 2 }
  0xd1   :  { %1909 = vmatpush.bf16.msrb.mxu1 %v3109_v48  ;;  %v1365_v60 = vpop.f32.mrf.mxu3 }
  0xd2   :  { %v1325_v56 = vadd.f32 %v1324_v24, %v1312_v49  ;;  %v3124_v49 = vld [vmem:[%s4546_s3 + $0xe8] sm:$0xff] }
  0xd3   :  { %1896 = vmatpush.bf16.msrb.mxu3 %v3101_v44  ;;  %1922 = vmatpush.bf16.msrb.mxu2 %v3117_v20 }
  0xd4   :  { %2766 = vmatmul.msk.bf16.vlgmr.msra.gmra.mxu1 %vm1259_vm0, %v3525_v51  ;;  %v1376_v57 = vpop.f32.mrf.mxu2  ;;  %v1338_v59 = vadd.f32 %v1337_v45, %v1325_v56  ;;  %v3096_v51 = vld [vmem:[%s4546_s3 + $0x8] sm:$0xff]  ;;  %v3126_v45 = vld [vmem:[%s4546_s3 + $0xf8] sm:$0xff] }
  0xd5   :  { %1910 = vmatpush.bf16.msrb.mxu1 %v3108_v28  ;;  %v1377_v15 = vadd.f32 %v1376_v57, %v1364_v12  ;;  %1934 = vmatpush.bf16.msrb.mxu0 %v3126_v45  ;;  %v3122_v56 = vld [vmem:[%s4546_s3 + $0xd8] sm:$0xff] }
  0xd6   :  { %v1351_v1 = vadd.f32 %v1350_v41, %v1338_v59 }
  0xd7   :  { %1897 = vmatpush.bf16.msrb.mxu3 %v3100_v46  ;;  %1923 = vmatpush.bf16.msrb.mxu2 %v3116_v61 }
  0xd8   :  { %v1627_v5 = vmax.f32 %v1351_v1, 0.0 }
  0xd9   :  { %1911 = vmatpush.bf16.msrb.mxu1 %v3107_v52  ;;  %1935 = vmatpush.bf16.msrb.mxu0 %v3125_v38 }
  0xda   :  { %v1631_v7 = vpack.c.bf16 %v1627_v5, %v1627_v5  ;;  %v3119_v5 = vld [vmem:[%s4546_s3 + $0xc0] sm:$0xff] }
  0xdb   :  { %1898 = vmatpush.bf16.msrb.mxu3 %v3099_v37  ;;  %1924 = vmatpush.bf16.msrb.mxu2 %v3115_v31  ;;  %v3127_v31 = vld [vmem:[%s4547_s4] ss:$0 sm:$0xff] }
  0xdc   :  { %v1378_v2 = vpop.f32.mrf.mxu2 }
  0xdd   :  { %1912 = vmatpush.bf16.msrb.mxu1 %v3106_v58  ;;  %1936 = vmatpush.bf16.msrb.mxu0 %v3124_v49  ;;  %v3121_v58 = vld [vmem:[%s4546_s3 + $0xd0] sm:$0xff]  ;;  %v3120_v2 = vld [vmem:[%s4546_s3 + $0xc8] sm:$0xff] }
  0xdf   :  { %1899 = vmatpush.bf16.msrb.mxu3 %v3098_v39  ;;  %1925 = vmatpush.bf16.msrb.mxu2 %v3114_v33 }
  0xe1   :  { %1913 = vmatpush.bf16.msrb.mxu1 %v3105_v63  ;;  %v1402_v9 = vpop.f32.mrf.mxu1  ;;  %1937 = vmatpush.bf16.msrb.mxu0 %v3123_v50 }
  0xe2   :  { %v1389_v8 = vpop.f32.mrf.mxu0 }
  0xe3   :  { %1900 = vmatpush.bf16.msrb.mxu3 %v3097_v47  ;;  %v1390_v17 = vadd.f32 %v1389_v8, %v1377_v15  ;;  %1926 = vmatpush.bf16.msrb.mxu2 %v3113_v36 }
  0xe5   :  { %1914 = vmatpush.bf16.msrb.mxu1 %v3104_v4  ;;  %v1403_v0 = vadd.f32 %v1402_v9, %v1390_v17  ;;  %1938 = vmatpush.bf16.msrb.mxu0 %v3122_v56  ;;  %v230_v9 = vperm.slane %v4407_v22, 3 }
  0xe7   :  { %1901 = vmatpush.bf16.msrb.mxu3 %v3096_v51  ;;  %1927 = vmatpush.bf16.msrb.mxu2 %v3112_v42 }
  0xe9   :  { %1915 = vmatpush.bf16.msrb.mxu1 %v3103_v6  ;;  %v1415_v11 = vpop.f32.mrf.mxu3  ;;  %v1404_v14 = vpop.f32.mrf.mxu1  ;;  %1939 = vmatpush.bf16.msrb.mxu0 %v3121_v58 }
  0xea   :  { %v1391_v13 = vpop.f32.mrf.mxu0  ;;  %v1416_v21 = vadd.f32 %v1415_v11, %v1403_v0 }
  0xeb   :  { %1902 = vmatpush.bf16.msrb.mxu3 %v3095_v3  ;;  %1928 = vmatpush.bf16.msrb.mxu2 %v3111_v54 }
  0xed   :  { %1940 = vmatpush.bf16.msrb.mxu0 %v3120_v2 }
  0xee   :  { %1903 = vmatmul.bf16.vlgmr.msrb.gmra.mxu3 %v1631_v7 }
  0xf1   :  { %v1428_v16 = vpop.f32.mrf.mxu2  ;;  %v1417_v19 = vpop.f32.mrf.mxu3  ;;  %1941 = vmatpush.bf16.msrb.mxu0 %v3119_v5 }
  0xf2   :  { %v1429_v25 = vadd.f32 %v1428_v16, %v1416_v21 }
  0xf9   :  { %v1430_v23 = vpop.f32.mrf.mxu2  ;;  %v1441_v26 = vpop.f32.mrf.mxu3 }
  0xfa   :  { %v1442_v27 = vadd.f32 %v1441_v26, %v1429_v25 }
  0xfc   :  { %v1628_v29 = vmax.f32 %v1442_v27, 0.0 }
  0xfe   :  { %v1632_v30 = vpack.c.bf16 %v1628_v29, %v1628_v29 }
 0x100   :  { %1916 = vmatmul.bf16.vlgmr.msrb.gmra.mxu1 %v1632_v30 }
 0x101   :  { %v1443_v34 = vpop.f32.mrf.mxu3  ;;  %v1454_v35 = vpop.f32.mrf.mxu1 }
 0x102   :  { %v1480_v32 = vpop.f32.mrf.mxu0  ;;  %v1455_v28 = vadd.f32 %v1454_v35, %v229_v62 }
 0x109   :  { %v1456_v41 = vpop.f32.mrf.mxu1 }
 0x10a   :  { %v1482_v40 = vpop.f32.mrf.mxu0 }
 0x111   :  { %v1467_v43 = vpop.f32.mrf.mxu3  ;;  %v1493_v44 = vpop.f32.mrf.mxu2 }
 0x112   :  { %v1532_v24 = vpop.f32.mrf.mxu0  ;;  %v1468_v52 = vadd.f32 %v1467_v43, %v1455_v28 }
 0x114   :  { %v1481_v53 = vadd.f32 %v1480_v32, %v1468_v52 }
 0x116   :  { %v1494_v57 = vadd.f32 %v1493_v44, %v1481_v53 }
 0x119   :  { %v1469_v46 = vpop.f32.mrf.mxu3  ;;  %v1495_v48 = vpop.f32.mrf.mxu2 }
 0x11a   :  { %v1534_v37 = vpop.f32.mrf.mxu0 }
 0x121   :  { %v1506_v39 = vpop.f32.mrf.mxu1 }
 0x122   :  { %v1507_v59 = vadd.f32 %v1506_v39, %v1494_v57 }
 0x129   :  { %v1508_v47 = vpop.f32.mrf.mxu1 }
 0x12a   :  { %v1558_v55 = vpop.f32.mrf.mxu0 }
 0x131   :  { %v1519_v60 = vpop.f32.mrf.mxu3  ;;  %v1545_v51 = vpop.f32.mrf.mxu2 }
 0x132   :  { %v1520_v63 = vadd.f32 %v1519_v60, %v1507_v59  ;;  %v1560_v1 = vpop.f32.mrf.mxu0  ;;  %v1546_v11 = vadd.f32 %v1545_v51, %v230_v9 }
 0x134   :  { %v1533_v3 = vadd.f32 %v1532_v24, %v1520_v63  ;;  %v1559_v13 = vadd.f32 %v1558_v55, %v1546_v11 }
 0x136   :  { %v1629_v4 = vmax.f32 %v1533_v3, 0.0 }
 0x138   :  { %v1633_v6 = vpack.c.bf16 %v1629_v4, %v1629_v4 }
 0x139   :  { %v1521_v7 = vpop.f32.mrf.mxu3  ;;  %v1547_v8 = vpop.f32.mrf.mxu2 }
 0x13a   :  { %1929 = vmatmul.bf16.vlgmr.msrb.gmra.mxu2 %v1633_v6 }
 0x141   :  { %v1571_v10 = vpop.f32.mrf.mxu1 }
 0x142   :  { %v1572_v15 = vadd.f32 %v1571_v10, %v1559_v13 }
 0x149   :  { %v1610_v12 = vpop.f32.mrf.mxu0  ;;  %v1573_v14 = vpop.f32.mrf.mxu1 }
 0x151   :  { %v1584_v16 = vpop.f32.mrf.mxu3  ;;  %v1597_v18 = vpop.f32.mrf.mxu2 }
 0x152   :  { %v1585_v17 = vadd.f32 %v1584_v16, %v1572_v15  ;;  %v1612_v19 = vpop.f32.mrf.mxu0  ;;  %v1623_v21 = vpop.f32.mrf.mxu1 }
 0x154   :  { %v1598_v20 = vadd.f32 %v1597_v18, %v1585_v17 }
 0x156   :  { %v1611_v0 = vadd.f32 %v1610_v12, %v1598_v20 }
 0x158   :  { %v1624_v23 = vadd.f32 %v1623_v21, %v1611_v0 }
 0x159   :  { %v1586_v61 = vpop.f32.mrf.mxu3  ;;  %v1599_v26 = vpop.f32.mrf.mxu2 }
 0x15a   :  { %v1630_v25 = vmax.f32 %v1624_v23, 0.0  ;;  %v1625_v22 = vpop.f32.mrf.mxu1 }
 0x15c   :  { %v1634_v27 = vpack.c.bf16 %v1630_v25, %v1630_v25 }
 0x15e   :  { %1942 = vmatmul.bf16.vlgmr.msrb.gmra.mxu0 %v1634_v27 }
 0x171   :  { %v1904_v29 = vpop.f32.mrf.mxu3 }
 0x172   :  { %v1905_v32 = vadd.f32 %v3127_v31, %v1904_v29 }
 0x179   :  { %v1906_v30 = vpop.f32.mrf.mxu3 }
 0x17d   :  { %v1917_v33 = vpop.f32.mrf.mxu1 }
 0x17e   :  { %v1918_v34 = vadd.f32 %v1917_v33, %v1905_v32 }
 0x185   :  { %v1919_v35 = vpop.f32.mrf.mxu1 }
 0x1bd   :  { %v1930_v36 = vpop.f32.mrf.mxu2 }
 0x1be   :  { %v1931_v41 = vadd.f32 %v1930_v36, %v1918_v34 }
 0x1c5   :  { %v1932_v40 = vpop.f32.mrf.mxu2 }
 0x1db   :  { %v1943_v42 = vpop.f32.mrf.mxu0 }
 0x1dc   :  { %v1944_v43 = vadd.f32 %v1943_v42, %v1931_v41 }
 0x1de   :  { %1947 = vmax.xlane.f32.xlu0 %v1944_v43 }
 0x1e3   :  { %v1945_v44 = vpop.f32.mrf.mxu0 }
 0x251   :  { %v1948_v54 = vpop.xlane.xlu0 %1947 }
 0x252   :  { %v1949_v24 = vsub.f32 %v1944_v43, %v1948_v54 }
 0x254   :  { %v1950_v45 = vmul.f32 1.442695, %v1949_v24 }
 0x256   :  { %3128 = vpow2.f32 %v1950_v45 }
 0x25c   :  { %v3129_v46 = vpop.eup %3128 }
 0x25d   :  { %1952 = vadd.xlane.f32.xlu0 %v3129_v46 }
 0x2d0   :  { %v1953_v48 = vpop.xlane.xlu0 %1952 }
 0x2d1   :  { %3130 = vlog2.f32 %v1953_v48 }
 0x2d7   :  { %v3131_v38 = vpop.eup %3130 }
 0x2d8   :  { %v1955_v62 = vmul.f32 0.6931472, %v3131_v38 }
 0x2da   :  { %v1956_v37 = vadd.f32 %v1955_v62, %v1948_v54 }
 0x2dc   :  { %v1957_v28 = vsub.f32 %v1944_v43, %v1956_v37 }
 0x2de   :  { %1958 = vst [vmem:[%s4548_s5] sm:$0xff] %v1957_v28 }

</bundles_post_ra>
